<compile_context>
chip_gen: v7x
topology: tpu7x:2x2x1
jax: 0.10.0
libtpu: 0.0.40
codegen_flags: <defaults>
</compile_context>

<pallas_src>
from functools import partial
from types import SimpleNamespace

import numpy as np
import jax
import jax.numpy as jnp
from jax.experimental import pallas as pl
from jax.experimental.pallas import tpu as pltpu

BF16 = jnp.bfloat16


# ----------------------------------------------------------------------------
# Generation-gated tile plan
# ----------------------------------------------------------------------------
def _tpu_tile_plan():
    kind = ""
    try:
        kind = jax.devices()[0].device_kind.lower()
    except Exception:
        pass
    if "v5p" in kind or "v4" in kind or "v6" in kind:
        return dict(tn=1024, n_limit=1024, tk=512, k_limit=1024, vmem=64 * 2**20)
    if "v5" in kind:                       # v5e / v5 lite: lowest HBM BW, big tiles
        return dict(tn=1024, n_limit=1024, tk=512, k_limit=1024, vmem=96 * 2**20)
    if "7" in kind:                        # v7x: 64 MiB VMEM, 2 TCs -> keep >=2 N blocks
        return dict(tn=512, n_limit=512, tk=512, k_limit=1024, vmem=40 * 2**20)
    return dict(tn=512, n_limit=512, tk=512, k_limit=1024, vmem=32 * 2**20)


def _round_up(x, m):
    return -(-x // m) * m


# ----------------------------------------------------------------------------
# Generic Pallas MXU matmul with fused epilogue (pre-act relu, +residual, *mul)
# ----------------------------------------------------------------------------
def _mm_kernel(a_ref, b_ref, *rest, relu_a, relu_b, has_res, has_mul):
    i = 0
    res_ref = rest[i] if has_res else None
    i += 1 if has_res else 0
    mul_ref = rest[i] if has_mul else None
    i += 1 if has_mul else 0
    o_ref, acc_ref = rest[i], rest[i + 1]

    k = pl.program_id(2)
    a = a_ref[...]
    b = b_ref[...]
    if relu_a:
        a = jnp.maximum(a, 0.0)
    if relu_b:
        b = jnp.maximum(b, 0.0)
    part = jnp.dot(a, b, preferred_element_type=jnp.float32)

    @pl.when(k == 0)
    def _init():
        acc_ref[...] = part

    @pl.when(k != 0)
    def _acc():
        acc_ref[...] += part

    @pl.when(k == pl.num_programs(2) - 1)
    def _fin():
        acc = acc_ref[...]
        if has_res:
            acc = acc + res_ref[...].astype(jnp.float32)
        if has_mul:
            acc = acc * mul_ref[...].astype(jnp.float32)
        o_ref[...] = acc.astype(o_ref.dtype)


def pallas_matmul(a, b, *, relu_a=False, relu_b=False, residual=None,
                  multiplier=None, out_dtype=BF16):
    """out = relu?(a) @ relu?(b) [+ residual] [* multiplier].  a:(M,K) b:(K,N).

    bf16 inputs, f32 VMEM accumulation, output written once as `out_dtype`.
    M/N are never padded (ragged edge blocks can only pollute columns that the
    masked store drops); K is zero-padded only if it needs tiling.
    """
    M, K = a.shape
    K2, N = b.shape
    assert K == K2, (a.shape, b.shape)
    plan = _tpu_tile_plan()

    a = a.astype(BF16)
    b = b.astype(BF16)

    if K <= plan["k_limit"]:
        TK, Kp = K, K
    else:
        TK = plan["tk"]
        Kp = _round_up(K, TK)
        a = jnp.pad(a, ((0, 0), (0, Kp - K)))       # zero pad: relu(0)=0 is safe
        b = jnp.pad(b, ((0, Kp - K), (0, 0)))

    TN = N if N <= plan["n_limit"] else plan["tn"]
    TM = M                                           # Cout / row dim is small here

    grid = (1, pl.cdiv(N, TN), Kp // TK)

    inputs = [a, b]
    in_specs = [pl.BlockSpec((TM, TK), lambda i, j, k: (i, k)),
                pl.BlockSpec((TK, TN), lambda i, j, k: (k, j))]
    has_res = residual is not None
    has_mul = multiplier is not None
    if has_res:
        inputs.append(residual.astype(BF16))
        in_specs.append(pl.BlockSpec((TM, TN), lambda i, j, k: (i, j)))
    if has_mul:
        inputs.append(multiplier.astype(BF16))
        in_specs.append(pl.BlockSpec((TM, TN), lambda i, j, k: (i, j)))

    return pl.pallas_call(
        partial(_mm_kernel, relu_a=relu_a, relu_b=relu_b,
                has_res=has_res, has_mul=has_mul),
        out_shape=jax.ShapeDtypeStruct((M, N), out_dtype),
        grid=grid,
        in_specs=in_specs,
        out_specs=pl.BlockSpec((TM, TN), lambda i, j, k: (i, j)),
        scratch_shapes=[pltpu.VMEM((TM, TN), jnp.float32)],
        compiler_params=pltpu.CompilerParams(
            dimension_semantics=("parallel", "parallel", "arbitrary"),
            vmem_limit_bytes=plan["vmem"]),
    )(*inputs)


# ----------------------------------------------------------------------------
# Fused 3x3 conv kernel: 9 taps folded as shifted VMEM slices (no HBM im2col)
# ----------------------------------------------------------------------------
def _conv3x3_kernel(x_ref, w_ref, *rest, offsets, guard, width, relu_in,
                    has_res, has_mul):
    i = 0
    res_ref = rest[i] if has_res else None
    i += 1 if has_res else 0
    mul_ref = rest[i] if has_mul else None
    i += 1 if has_mul else 0
    o_ref = rest[i]

    acc = None
    for t, d in enumerate(offsets):                  # static 9-tap loop
        start = guard + d
        xt = x_ref[:, start:start + width]           # (Cin, S) shifted slice in VMEM
        if relu_in:
            xt = jnp.maximum(xt, 0.0)                # relu(0)=0 keeps pad rows inert
        part = jnp.dot(w_ref[t], xt, preferred_element_type=jnp.float32)
        acc = part if acc is None else acc + part
    if has_res:
        acc = acc + res_ref[...].astype(jnp.float32)
    if has_mul:
        acc = acc * mul_ref[...].astype(jnp.float32)
    o_ref[...] = acc.astype(o_ref.dtype)


def conv3x3(x, w, *, relu_in=True, residual=None, multiplier=None,
            out_dtype=BF16):
    """3x3 'same' conv on a channel-first (Cin, B, H, W) map.

    Output is computed in the zero-padded flattened geometry and the valid
    region is sliced out afterwards; shifted-slice garbage at image/batch
    borders can only land in discarded padded positions (all reads stay
    in-bounds of initialized data, so everything is finite).
    """
    Cin, B, H, W = x.shape
    Cout = w.shape[0]
    Hp, Wp = H + 2, W + 2
    S = B * Hp * Wp
    G = Wp + 1                                        # max |flat tap offset|

    xp = jnp.pad(x.astype(BF16), ((0, 0), (0, 0), (1, 1), (1, 1)))
    xf = jnp.pad(xp.reshape(Cin, S), ((0, 0), (G, G)))            # (Cin, S + 2G)
    w9 = jnp.transpose(w, (2, 3, 0, 1)).reshape(9, Cout, Cin).astype(BF16)
    offsets = tuple((ki - 1) * Wp + (kj - 1) for ki in range(3) for kj in range(3))

    has_res = residual is not None
    has_mul = multiplier is not None

    def pad_flat(v):
        vp = jnp.pad(v.astype(BF16), ((0, 0), (0, 0), (1, 1), (1, 1)))
        return vp.reshape(Cout, S)

    inputs = [xf, w9]
    if has_res:
        inputs.append(pad_flat(residual))
    if has_mul:
        inputs.append(pad_flat(multiplier))

    out = pl.pallas_call(
        partial(_conv3x3_kernel, offsets=offsets, guard=G, width=S,
                relu_in=relu_in, has_res=has_res, has_mul=has_mul),
        out_shape=jax.ShapeDtypeStruct((Cout, S), out_dtype),
    )(*inputs)
    # TODO(synk): at real MDX23C sizes, tile the flattened spatial axis with a
    # halo'd manual DMA (and write the valid region directly) instead of
    # whole-map VMEM residency + this wrapper slice.
    return out.reshape(Cout, B, Hp, Wp)[:, :, 1:1 + H, 1:1 + W]


# ----------------------------------------------------------------------------
# Conv / linear wrappers (channel-first (C, B, H, W) feature maps)
# ----------------------------------------------------------------------------
def conv1x1(x, w, *, relu_in=False, out_dtype=BF16):
    # x: (Cin, B, H, W), w: (Cout, Cin); lane-dense: flattened spatial on N.
    Cin, B, H, W = x.shape
    Cout = w.shape[0]
    o = pallas_matmul(w, x.reshape(Cin, B * H * W), relu_b=relu_in,
                      out_dtype=out_dtype)
    return o.reshape(Cout, B, H, W)


def downscale(x, w, sh, sw):
    # Downscale = Identity-norm -> ReLU -> Conv2d(kernel=stride=scale)
    Cin, B, H, W = x.shape
    Cout = w.shape[0]
    Ho, Wo = H // sh, W // sw
    # TODO(synk): fold this 6-D transpose into the matmul access pattern at real sizes.
    p = x.reshape(Cin, B, Ho, sh, Wo, sw)
    p = jnp.transpose(p, (0, 3, 5, 1, 2, 4)).reshape(Cin * sh * sw, B * Ho * Wo)
    o = pallas_matmul(w.reshape(Cout, Cin * sh * sw), p, relu_b=True)
    return o.reshape(Cout, B, Ho, Wo)


def upscale(x, w, sh, sw):
    # Upscale = Identity-norm -> ReLU -> ConvTranspose2d(kernel=stride=scale)
    # w: (Cin, Cout, sh, sw); valid only because stride == kernel (no overlap).
    Cin, B, H, W = x.shape
    Cout = w.shape[1]
    wm = jnp.transpose(w, (1, 2, 3, 0)).reshape(Cout * sh * sw, Cin)
    y = pallas_matmul(wm, x.reshape(Cin, B * H * W), relu_b=True)
    y = y.reshape(Cout, sh, sw, B, H, W)
    # TODO(synk): fold this transpose into the output layout at real sizes.
    return jnp.transpose(y, (0, 3, 4, 1, 5, 2)).reshape(Cout, B, H * sh, W * sw)


def tdf_residual(x, w1, w2):
    # x + TDF(x);  TDF = act -> Linear(F, F//bn) -> act -> Linear(F//bn, F)
    # Right-multiplication on the existing (C*B*T, F) layout: no HBM transposes.
    C, B, T, F = x.shape
    xm = x.reshape(C * B * T, F)
    h = pallas_matmul(xm, jnp.transpose(w1), relu_a=True)             # (CBT, F//bn)
    o = pallas_matmul(h, jnp.transpose(w2), relu_a=True, residual=xm)  # (CBT, F)
    return o.reshape(C, B, T, F)


def tfc_tdf_forward(x, blocks, final_multiplier=None):
    # TODO(synk): at these tiny shapes, grouping each block's four matmuls into
    # one pallas_call (inner grid) would amortize dispatch overhead.
    nblk = len(blocks)
    for i, blk in enumerate(blocks):
        s = conv1x1(x, blk["shortcut"])                     # no pre-activation
        x = conv3x3(x, blk["tfc1"], relu_in=True)
        x = tdf_residual(x, blk["tdf_w1"], blk["tdf_w2"])
        mlt = final_multiplier if i == nblk - 1 else None
        # x = tfc2(relu(x)) + s [* first_conv_out on the last decoder block],
        # the add / mul fused into the conv epilogue.
        x = conv3x3(x, blk["tfc2"], relu_in=True, residual=s, multiplier=mlt)
    return x


# ----------------------------------------------------------------------------
# STFT / ISTFT (jnp.fft + gather framing / scatter-add overlap-add, under jit)
# ----------------------------------------------------------------------------
def _hann(n_fft):
    n = np.arange(n_fft)
    return jnp.asarray(0.5 - 0.5 * np.cos(2.0 * np.pi * n / n_fft), jnp.float32)


def stft_forward(x, cfg):
    # x: (B, C, L) -> channel-first spec (C*2, B, dim_f, T), f32
    n_fft, hop, dim_f = cfg.audio.n_fft, cfg.audio.hop_length, cfg.audio.dim_f
    B, C, L = x.shape
    nb = n_fft // 2 + 1
    xr = x.reshape(B * C, L)
    pad = n_fft // 2
    xp = jnp.pad(xr, ((0, 0), (pad, pad)), mode="reflect")           # center=True
    n_frames = 1 + L // hop
    # TODO(synk): assumes L % hop == 0 (matches the reference harness).
    idx = np.arange(n_frames)[:, None] * hop + np.arange(n_fft)[None, :]
    frames = xp[:, idx] * _hann(n_fft)[None, None, :]                # gather framing
    spec = jnp.fft.rfft(frames, axis=-1)                             # (BC, T, nb)
    out = jnp.stack([jnp.real(spec), jnp.imag(spec)], axis=1)        # (BC, 2, T, nb)
    out = out.reshape(B, C, 2, n_frames, nb)
    out = jnp.transpose(out, (1, 2, 0, 4, 3)).reshape(C * 2, B, nb, n_frames)
    return out[:, :, :dim_f, :]


def stft_inverse(x, cfg):
    # x: (*bd, c, f, t) with c even -> (*bd, 2, L)   (batch-first, like torch)
    n_fft, hop = cfg.audio.n_fft, cfg.audio.hop_length
    nb = n_fft // 2 + 1
    *bd, c, f, t = x.shape
    x = x.astype(jnp.float32)
    x = jnp.concatenate([x, jnp.zeros((*bd, c, nb - f, t), x.dtype)], axis=-2)
    x = x.reshape(-1, 2, nb, t)
    spec = (x[:, 0] + 1j * x[:, 1]).transpose(0, 2, 1)               # (Bk, t, nb)
    frames = jnp.fft.irfft(spec, n=n_fft, axis=-1)                   # (Bk, t, n_fft)
    win = _hann(n_fft)
    frames = frames * win[None, None, :]
    Lf = n_fft + hop * (t - 1)
    idx = np.arange(t)[:, None] * hop + np.arange(n_fft)[None, :]
    y = jnp.zeros((x.shape[0], Lf), jnp.float32).at[:, idx].add(frames)
    wsq = jnp.zeros((Lf,), jnp.float32).at[idx].add(
        jnp.broadcast_to(win * win, (t, n_fft)))
    # TODO(synk): torch.istft uses a NOLA check instead of this eps clamp.
    y = y / jnp.maximum(wsq, 1e-11)[None, :]
    y = y[:, n_fft // 2:n_fft // 2 + hop * (t - 1)]                  # trim center pad
    return y.reshape(*bd, 2, -1)


# ----------------------------------------------------------------------------
# Model: config, parameters, forward
# ----------------------------------------------------------------------------
def make_config():
    cfg = SimpleNamespace()
    cfg.audio = SimpleNamespace(num_channels=2, n_fft=64, hop_length=16, dim_f=32)
    cfg.model = SimpleNamespace(num_subbands=2, num_scales=1, scale=(2, 2),
                                num_blocks_per_scale=1, num_channels=8, growth=8,
                                bottleneck_factor=4, norm="None", act="relu")
    cfg.training = SimpleNamespace(target_instrument=None,
                                   instruments=["vocals", "other"])
    return cfg


def make_params(cfg, key):
    keys = list(jax.random.split(key, 256))
    ctr = [0]

    def nxt(shape, fan_in):
        k = keys[ctr[0]]
        ctr[0] += 1
        return (jax.random.normal(k, shape, jnp.float32)
                * jnp.float32(1.0 / np.sqrt(float(fan_in))))

    def init_tfc_tdf(in_c, c, l, f, bn):
        blocks = []
        for _ in range(l):
            blocks.append(dict(
                tfc1=nxt((c, in_c, 3, 3), in_c * 9),
                tdf_w1=nxt((f // bn, f), f),
                tdf_w2=nxt((f, f // bn), f // bn),
                tfc2=nxt((c, c, 3, 3), c * 9),
                shortcut=nxt((c, in_c), in_c),
            ))
            in_c = c
        return blocks

    k = cfg.model.num_subbands
    dim_c = k * cfg.audio.num_channels * 2
    n, scale, l = cfg.model.num_scales, cfg.model.scale, cfg.model.num_blocks_per_scale
    c, g, bn = cfg.model.num_channels, cfg.model.growth, cfg.model.bottleneck_factor
    f = cfg.audio.dim_f // k
    num_t = 1 if cfg.training.target_instrument else len(cfg.training.instruments)

    params = {"first_conv": nxt((c, dim_c), dim_c)}
    enc = []
    for _ in range(n):
        enc.append(dict(
            tfc_tdf=init_tfc_tdf(c, c, l, f, bn),
            down=nxt((c + g, c, scale[0], scale[1]), c * scale[0] * scale[1]),
        ))
        f //= scale[1]
        c += g
    params["encoder"] = enc
    params["bottleneck"] = init_tfc_tdf(c, c, l, f, bn)
    dec = []
    for _ in range(n):
        up = nxt((c, c - g, scale[0], scale[1]), c)          # ConvTranspose2d weight
        f *= scale[1]
        c -= g
        dec.append(dict(up=up, tfc_tdf=init_tfc_tdf(2 * c, c, l, f, bn)))
    params["decoder"] = dec
    params["final_conv1"] = nxt((c, c + dim_c), c + dim_c)
    params["final_conv2"] = nxt((num_t * dim_c, c), c)
    return params, num_t, dim_c


def cac2cws_cf(x, k):
    c, b, f, t = x.shape
    x = x.reshape(c, b, k, f // k, t)
    x = jnp.transpose(x, (0, 2, 1, 3, 4))
    return x.reshape(c * k, b, f // k, t)


def cws2cac_cf(x, k):
    c, b, f, t = x.shape
    x = x.reshape(c // k, k, b, f, t)
    x = jnp.transpose(x, (0, 2, 1, 3, 4))
    return x.reshape(c // k, b, k * f, t)


def tfc_tdf_net_forward(params, cfg, num_t, x_audio):
    k = cfg.model.num_subbands
    sh, sw = cfg.model.scale

    spec = stft_forward(x_audio, cfg)                 # (2*ch, B, dim_f, T), f32
    mix = x = cac2cws_cf(spec, k).astype(BF16)        # (dim_c, B, f0, T), bf16
    first_conv_out = x = conv1x1(x, params["first_conv"])
    x = jnp.swapaxes(x, -1, -2)                       # (c, B, T, f0)

    enc_outs = []
    for bp in params["encoder"]:
        x = tfc_tdf_forward(x, bp["tfc_tdf"])
        enc_outs.append(x)
        x = downscale(x, bp["down"], sh, sw)

    x = tfc_tdf_forward(x, params["bottleneck"])

    # x * first_conv_out is fused into the last decoder conv's epilogue
    # (first_conv_out viewed in the decoder's (T, F) orientation).
    fco_tf = jnp.swapaxes(first_conv_out, -1, -2)     # (c, B, T, f0)

    ndec = len(params["decoder"])
    for di, bp in enumerate(params["decoder"]):
        x = upscale(x, bp["up"], sh, sw)
        x = jnp.concatenate([x, enc_outs.pop()], axis=0)
        mlt = fco_tf if di == ndec - 1 else None
        x = tfc_tdf_forward(x, bp["tfc_tdf"], final_multiplier=mlt)

    x = jnp.swapaxes(x, -1, -2)                       # (c, B, f0, T), already * fco
    x = jnp.concatenate([mix, x], axis=0)
    x = conv1x1(x, params["final_conv1"])             # Conv -> act -> Conv
    x = conv1x1(x, params["final_conv2"], relu_in=True, out_dtype=jnp.float32)
    x = cws2cac_cf(x, k)                              # (num_t*ch*2, B, dim_f, T)

    x = jnp.transpose(x, (1, 0, 2, 3))                # back to batch-first for ISTFT
    if num_t > 1:
        b, c, f, t = x.shape
        x = x.reshape(b, num_t, c // num_t, f, t)
    return stft_inverse(x, cfg)


# ----------------------------------------------------------------------------
if __name__ == "__main__":
    cfg = make_config()
    key = jax.random.PRNGKey(0)
    pkey, xkey = jax.random.split(key)
    params, num_t, dim_c = make_params(cfg, pkey)

    B = 2
    L = cfg.audio.hop_length * 7                      # 112 samples -> 8 STFT frames
    x = jax.random.normal(xkey, (B, cfg.audio.num_channels, L), jnp.float32)

    fwd = jax.jit(lambda p, xx: tfc_tdf_net_forward(p, cfg, num_t, xx))
    y = fwd(params, x)
    y = jax.block_until_ready(y)

    assert y.shape == (B, num_t, cfg.audio.num_channels, L), y.shape
    assert bool(jnp.all(jnp.isfinite(y)))
    print("KERNEL_OK")
</pallas_src>

<mosaic_0001>
module attributes {stable_mosaic.version = 11 : i64} {
  func.func @_mm_kernel(%arg0: i32, %arg1: i32, %arg2: i32, %arg3: memref<8x8xbf16, #tpu.memory_space<vmem>>, %arg4: memref<8x256xbf16, #tpu.memory_space<vmem>>, %arg5: memref<8x256xbf16, #tpu.memory_space<vmem>>, %arg6: memref<8x256xf32, #tpu.memory_space<vmem>>) attributes {dimension_semantics = [#tpu.dimension_semantics<parallel>, #tpu.dimension_semantics<parallel>, #tpu.dimension_semantics<arbitrary>], iteration_bounds = array<i64: 1, 1, 1>, scalar_prefetch = 0 : i64, scratch_operands = 1 : i64, tpu.core_type = #tpu.core_type<tc>, window_params = [{transform_indices = @transform_0, window_bounds = array<i64: 8, 8>}, {transform_indices = @transform_1, window_bounds = array<i64: 8, 256>}, {transform_indices = @transform_2, window_bounds = array<i64: 8, 256>}]} {
    %c0 = arith.constant 0 : index
    %c0_0 = arith.constant 0 : index
    %0 = vector.load %arg3[%c0, %c0_0] : memref<8x8xbf16, #tpu.memory_space<vmem>>, vector<8x8xbf16>
    %c0_1 = arith.constant 0 : index
    %c0_2 = arith.constant 0 : index
    %1 = vector.load %arg4[%c0_1, %c0_2] : memref<8x256xbf16, #tpu.memory_space<vmem>>, vector<8x256xbf16>
    %cst = arith.constant dense<0.000000e+00> : vector<8x256xf32>
    %2 = tpu.matmul %0, %1, %cst {dimension_numbers = #tpu.dot_dimension_numbers<[1], [0], [0], [1], [0, 0, 1, 1], [], []>} : vector<8x8xbf16>, vector<8x256xbf16>, vector<8x256xf32> -> vector<8x256xf32>
    %c0_i32 = arith.constant 0 : i32
    %3 = arith.cmpi eq, %arg2, %c0_i32 : i32
    %4 = arith.extui %3 : i1 to i32
    %c0_i32_3 = arith.constant 0 : i32
    %5 = arith.cmpi ne, %4, %c0_i32_3 : i32
    scf.if %5 {
      %c0_8 = arith.constant 0 : index
      %c0_9 = arith.constant 0 : index
      %12 = vector.load %arg6[%c0_8, %c0_9] : memref<8x256xf32, #tpu.memory_space<vmem>>, vector<8x256xf32>
      tpu.vector_store %arg6[%c0_8, %c0_9], %2 {strides = array<i32>} : memref<8x256xf32, #tpu.memory_space<vmem>>, vector<8x256xf32>,
    } else {
    }
    %c0_i32_4 = arith.constant 0 : i32
    %6 = arith.cmpi ne, %arg2, %c0_i32_4 : i32
    %7 = arith.extui %6 : i1 to i32
    %c0_i32_5 = arith.constant 0 : i32
    %8 = arith.cmpi ne, %7, %c0_i32_5 : i32
    scf.if %8 {
      %c0_8 = arith.constant 0 : index
      %c0_9 = arith.constant 0 : index
      %12 = vector.load %arg6[%c0_8, %c0_9] : memref<8x256xf32, #tpu.memory_space<vmem>>, vector<8x256xf32>
      %13 = arith.addf %12, %2 : vector<8x256xf32>
      %c0_10 = arith.constant 0 : index
      %c0_11 = arith.constant 0 : index
      %14 = vector.load %arg6[%c0_10, %c0_11] : memref<8x256xf32, #tpu.memory_space<vmem>>, vector<8x256xf32>
      tpu.vector_store %arg6[%c0_10, %c0_11], %13 {strides = array<i32>} : memref<8x256xf32, #tpu.memory_space<vmem>>, vector<8x256xf32>,
    } else {
    }
    %c0_i32_6 = arith.constant 0 : i32
    %9 = arith.cmpi eq, %arg2, %c0_i32_6 : i32
    %10 = arith.extui %9 : i1 to i32
    %c0_i32_7 = arith.constant 0 : i32
    %11 = arith.cmpi ne, %10, %c0_i32_7 : i32
    scf.if %11 {
      %c0_8 = arith.constant 0 : index
      %c0_9 = arith.constant 0 : index
      %12 = vector.load %arg6[%c0_8, %c0_9] : memref<8x256xf32, #tpu.memory_space<vmem>>, vector<8x256xf32>
      %13 = arith.truncf %12 : vector<8x256xf32> to vector<8x256xbf16>
      %c0_10 = arith.constant 0 : index
      %c0_11 = arith.constant 0 : index
      %14 = vector.load %arg5[%c0_10, %c0_11] : memref<8x256xbf16, #tpu.memory_space<vmem>>, vector<8x256xbf16>
      tpu.vector_store %arg5[%c0_10, %c0_11], %13 {strides = array<i32>} : memref<8x256xbf16, #tpu.memory_space<vmem>>, vector<8x256xbf16>,
    } else {
    }
    return
  }
  func.func @transform_0(%arg0: i32, %arg1: i32, %arg2: i32) -> (i32, i32) {
    %c0_i32 = arith.constant 0 : i32
    return %arg0, %arg2 : i32, i32
  }
  func.func @transform_1(%arg0: i32, %arg1: i32, %arg2: i32) -> (i32, i32) {
    %c0_i32 = arith.constant 0 : i32
    return %arg2, %arg1 : i32, i32
  }
  func.func @transform_2(%arg0: i32, %arg1: i32, %arg2: i32) -> (i32, i32) {
    %c0_i32 = arith.constant 0 : i32
    return %arg0, %arg1 : i32, i32
  }
}

module attributes {stable_mosaic.version = 11 : i64} {
  func.func @_conv3x3_kernel(%arg0: memref<8x398xbf16, #tpu.memory_space<vmem>>, %arg1: memref<9x8x8xbf16, #tpu.memory_space<vmem>>, %arg2: memref<8x360xbf16, #tpu.memory_space<vmem>>) attributes {dimension_semantics = [], scalar_prefetch = 0 : i64, scratch_operands = 0 : i64, tpu.core_type = #tpu.core_type<tc>} {
    %c0 = arith.constant 0 : index
    %c0_0 = arith.constant 0 : index
    %0 = vector.load %arg0[%c0, %c0_0] : memref<8x398xbf16, #tpu.memory_space<vmem>>, vector<8x360xbf16>
    %cst = arith.constant 0.000000e+00 : bf16
    %1 = vector.broadcast %cst : bf16 to vector<8x360xbf16>
    %2 = arith.maximumf %0, %1 : vector<8x360xbf16>
    %c0_1 = arith.constant 0 : index
    %c0_2 = arith.constant 0 : index
    %c0_3 = arith.constant 0 : index
    %3 = vector.load %arg1[%c0_1, %c0_2, %c0_3] : memref<9x8x8xbf16, #tpu.memory_space<vmem>>, vector<1x8x8xbf16>
    %4 = vector.shape_cast %3 : vector<1x8x8xbf16> to vector<8x8xbf16>
    %cst_4 = arith.constant dense<0.000000e+00> : vector<8x360xf32>
    %5 = tpu.matmul %4, %2, %cst_4 {dimension_numbers = #tpu.dot_dimension_numbers<[1], [0], [0], [1], [0, 0, 1, 1], [], []>} : vector<8x8xbf16>, vector<8x360xbf16>, vector<8x360xf32> -> vector<8x360xf32>
    %c0_5 = arith.constant 0 : index
    %c1 = arith.constant 1 : index
    %6 = vector.load %arg0[%c0_5, %c1] : memref<8x398xbf16, #tpu.memory_space<vmem>>, vector<8x360xbf16>
    %cst_6 = arith.constant 0.000000e+00 : bf16
    %7 = vector.broadcast %cst_6 : bf16 to vector<8x360xbf16>
    %8 = arith.maximumf %6, %7 : vector<8x360xbf16>
    %c1_7 = arith.constant 1 : index
    %c0_8 = arith.constant 0 : index
    %c0_9 = arith.constant 0 : index
    %9 = vector.load %arg1[%c1_7, %c0_8, %c0_9] : memref<9x8x8xbf16, #tpu.memory_space<vmem>>, vector<1x8x8xbf16>
    %10 = vector.shape_cast %9 : vector<1x8x8xbf16> to vector<8x8xbf16>
    %cst_10 = arith.constant dense<0.000000e+00> : vector<8x360xf32>
    %11 = tpu.matmul %10, %8, %cst_10 {dimension_numbers = #tpu.dot_dimension_numbers<[1], [0], [0], [1], [0, 0, 1, 1], [], []>} : vector<8x8xbf16>, vector<8x360xbf16>, vector<8x360xf32> -> vector<8x360xf32>
    %12 = arith.addf %5, %11 : vector<8x360xf32>
    %c0_11 = arith.constant 0 : index
    %c2 = arith.constant 2 : index
    %13 = vector.load %arg0[%c0_11, %c2] : memref<8x398xbf16, #tpu.memory_space<vmem>>, vector<8x360xbf16>
    %cst_12 = arith.constant 0.000000e+00 : bf16
    %14 = vector.broadcast %cst_12 : bf16 to vector<8x360xbf16>
    %15 = arith.maximumf %13, %14 : vector<8x360xbf16>
    %c2_13 = arith.constant 2 : index
    %c0_14 = arith.constant 0 : index
    %c0_15 = arith.constant 0 : index
    %16 = vector.load %arg1[%c2_13, %c0_14, %c0_15] : memref<9x8x8xbf16, #tpu.memory_space<vmem>>, vector<1x8x8xbf16>
    %17 = vector.shape_cast %16 : vector<1x8x8xbf16> to vector<8x8xbf16>
    %cst_16 = arith.constant dense<0.000000e+00> : vector<8x360xf32>
    %18 = tpu.matmul %17, %15, %cst_16 {dimension_numbers = #tpu.dot_dimension_numbers<[1], [0], [0], [1], [0, 0, 1, 1], [], []>} : vector<8x8xbf16>, vector<8x360xbf16>, vector<8x360xf32> -> vector<8x360xf32>
    %19 = arith.addf %12, %18 : vector<8x360xf32>
    %c0_17 = arith.constant 0 : index
    %c18 = arith.constant 18 : index
    %20 = vector.load %arg0[%c0_17, %c18] : memref<8x398xbf16, #tpu.memory_space<vmem>>, vector<8x360xbf16>
    %cst_18 = arith.constant 0.000000e+00 : bf16
    %21 = vector.broadcast %cst_18 : bf16 to vector<8x360xbf16>
    %22 = arith.maximumf %20, %21 : vector<8x360xbf16>
    %c3 = arith.constant 3 : index
    %c0_19 = arith.constant 0 : index
    %c0_20 = arith.constant 0 : index
    %23 = vector.load %arg1[%c3, %c0_19, %c0_20] : memref<9x8x8xbf16, #tpu.memory_space<vmem>>, vector<1x8x8xbf16>
    %24 = vector.shape_cast %23 : vector<1x8x8xbf16> to vector<8x8xbf16>
    %cst_21 = arith.constant dense<0.000000e+00> : vector<8x360xf32>
    %25 = tpu.matmul %24, %22, %cst_21 {dimension_numbers = #tpu.dot_dimension_numbers<[1], [0], [0], [1], [0, 0, 1, 1], [], []>} : vector<8x8xbf16>, vector<8x360xbf16>, vector<8x360xf32> -> vector<8x360xf32>
    %26 = arith.addf %19, %25 : vector<8x360xf32>
    %c0_22 = arith.constant 0 : index
    %c19 = arith.constant 19 : index
    %27 = vector.load %arg0[%c0_22, %c19] : memref<8x398xbf16, #tpu.memory_space<vmem>>, vector<8x360xbf16>
    %cst_23 = arith.constant 0.000000e+00 : bf16
    %28 = vector.broadcast %cst_23 : bf16 to vector<8x360xbf16>
    %29 = arith.maximumf %27, %28 : vector<8x360xbf16>
    %c4 = arith.constant 4 : index
    %c0_24 = arith.constant 0 : index
    %c0_25 = arith.constant 0 : index
    %30 = vector.load %arg1[%c4, %c0_24, %c0_25] : memref<9x8x8xbf16, #tpu.memory_space<vmem>>, vector<1x8x8xbf16>
    %31 = vector.shape_cast %30 : vector<1x8x8xbf16> to vector<8x8xbf16>
    %cst_26 = arith.constant dense<0.000000e+00> : vector<8x360xf32>
    %32 = tpu.matmul %31, %29, %cst_26 {dimension_numbers = #tpu.dot_dimension_numbers<[1], [0], [0], [1], [0, 0, 1, 1], [], []>} : vector<8x8xbf16>, vector<8x360xbf16>, vector<8x360xf32> -> vector<8x360xf32>
    %33 = arith.addf %26, %32 : vector<8x360xf32>
    %c0_27 = arith.constant 0 : index
    %c20 = arith.constant 20 : index
    %34 = vector.load %arg0[%c0_27, %c20] : memref<8x398xbf16, #tpu.memory_space<vmem>>, vector<8x360xbf16>
    %cst_28 = arith.constant 0.000000e+00 : bf16
    %35 = vector.broadcast %cst_28 : bf16 to vector<8x360xbf16>
    %36 = arith.maximumf %34, %35 : vector<8x360xbf16>
    %c5 = arith.constant 5 : index
    %c0_29 = arith.constant 0 : index
    %c0_30 = arith.constant 0 : index
    %37 = vector.load %arg1[%c5, %c0_29, %c0_30] : memref<9x8x8xbf16, #tpu.memory_space<vmem>>, vector<1x8x8xbf16>
    %38 = vector.shape_cast %37 : vector<1x8x8xbf16> to vector<8x8xbf16>
    %cst_31 = arith.constant dense<0.000000e+00> : vector<8x360xf32>
    %39 = tpu.matmul %38, %36, %cst_31 {dimension_numbers = #tpu.dot_dimension_numbers<[1], [0], [0], [1], [0, 0, 1, 1], [], []>} : vector<8x8xbf16>, vector<8x360xbf16>, vector<8x360xf32> -> vector<8x360xf32>
    %40 = arith.addf %33, %39 : vector<8x360xf32>
    %c0_32 = arith.constant 0 : index
    %c36 = arith.constant 36 : index
    %41 = vector.load %arg0[%c0_32, %c36] : memref<8x398xbf16, #tpu.memory_space<vmem>>, vector<8x360xbf16>
    %cst_33 = arith.constant 0.000000e+00 : bf16
    %42 = vector.broadcast %cst_33 : bf16 to vector<8x360xbf16>
    %43 = arith.maximumf %41, %42 : vector<8x360xbf16>
    %c6 = arith.constant 6 : index
    %c0_34 = arith.constant 0 : index
    %c0_35 = arith.constant 0 : index
    %44 = vector.load %arg1[%c6, %c0_34, %c0_35] : memref<9x8x8xbf16, #tpu.memory_space<vmem>>, vector<1x8x8xbf16>
    %45 = vector.shape_cast %44 : vector<1x8x8xbf16> to vector<8x8xbf16>
    %cst_36 = arith.constant dense<0.000000e+00> : vector<8x360xf32>
    %46 = tpu.matmul %45, %43, %cst_36 {dimension_numbers = #tpu.dot_dimension_numbers<[1], [0], [0], [1], [0, 0, 1, 1], [], []>} : vector<8x8xbf16>, vector<8x360xbf16>, vector<8x360xf32> -> vector<8x360xf32>
    %47 = arith.addf %40, %46 : vector<8x360xf32>
    %c0_37 = arith.constant 0 : index
    %c37 = arith.constant 37 : index
    %48 = vector.load %arg0[%c0_37, %c37] : memref<8x398xbf16, #tpu.memory_space<vmem>>, vector<8x360xbf16>
    %cst_38 = arith.constant 0.000000e+00 : bf16
    %49 = vector.broadcast %cst_38 : bf16 to vector<8x360xbf16>
    %50 = arith.maximumf %48, %49 : vector<8x360xbf16>
    %c7 = arith.constant 7 : index
    %c0_39 = arith.constant 0 : index
    %c0_40 = arith.constant 0 : index
    %51 = vector.load %arg1[%c7, %c0_39, %c0_40] : memref<9x8x8xbf16, #tpu.memory_space<vmem>>, vector<1x8x8xbf16>
    %52 = vector.shape_cast %51 : vector<1x8x8xbf16> to vector<8x8xbf16>
    %cst_41 = arith.constant dense<0.000000e+00> : vector<8x360xf32>
    %53 = tpu.matmul %52, %50, %cst_41 {dimension_numbers = #tpu.dot_dimension_numbers<[1], [0], [0], [1], [0, 0, 1, 1], [], []>} : vector<8x8xbf16>, vector<8x360xbf16>, vector<8x360xf32> -> vector<8x360xf32>
    %54 = arith.addf %47, %53 : vector<8x360xf32>
    %c0_42 = arith.constant 0 : index
    %c38 = arith.constant 38 : index
    %55 = vector.load %arg0[%c0_42, %c38] : memref<8x398xbf16, #tpu.memory_space<vmem>>, vector<8x360xbf16>
    %cst_43 = arith.constant 0.000000e+00 : bf16
    %56 = vector.broadcast %cst_43 : bf16 to vector<8x360xbf16>
    %57 = arith.maximumf %55, %56 : vector<8x360xbf16>
    %c8 = arith.constant 8 : index
    %c0_44 = arith.constant 0 : index
    %c0_45 = arith.constant 0 : index
    %58 = vector.load %arg1[%c8, %c0_44, %c0_45] : memref<9x8x8xbf16, #tpu.memory_space<vmem>>, vector<1x8x8xbf16>
    %59 = vector.shape_cast %58 : vector<1x8x8xbf16> to vector<8x8xbf16>
    %cst_46 = arith.constant dense<0.000000e+00> : vector<8x360xf32>
    %60 = tpu.matmul %59, %57, %cst_46 {dimension_numbers = #tpu.dot_dimension_numbers<[1], [0], [0], [1], [0, 0, 1, 1], [], []>} : vector<8x8xbf16>, vector<8x360xbf16>, vector<8x360xf32> -> vector<8x360xf32>
    %61 = arith.addf %54, %60 : vector<8x360xf32>
    %62 = arith.truncf %61 : vector<8x360xf32> to vector<8x360xbf16>
    %c0_47 = arith.constant 0 : index
    %c0_48 = arith.constant 0 : index
    %63 = vector.load %arg2[%c0_47, %c0_48] : memref<8x360xbf16, #tpu.memory_space<vmem>>, vector<8x360xbf16>
    tpu.vector_store %arg2[%c0_47, %c0_48], %62 {strides = array<i32>} : memref<8x360xbf16, #tpu.memory_space<vmem>>, vector<8x360xbf16>,
    return
  }
}

module attributes {stable_mosaic.version = 11 : i64} {
  func.func @_mm_kernel(%arg0: i32, %arg1: i32, %arg2: i32, %arg3: memref<128x16xbf16, #tpu.memory_space<vmem>>, %arg4: memref<16x4xbf16, #tpu.memory_space<vmem>>, %arg5: memref<128x4xbf16, #tpu.memory_space<vmem>>, %arg6: memref<128x4xf32, #tpu.memory_space<vmem>>) attributes {dimension_semantics = [#tpu.dimension_semantics<parallel>, #tpu.dimension_semantics<parallel>, #tpu.dimension_semantics<arbitrary>], iteration_bounds = array<i64: 1, 1, 1>, scalar_prefetch = 0 : i64, scratch_operands = 1 : i64, tpu.core_type = #tpu.core_type<tc>, window_params = [{transform_indices = @transform_0, window_bounds = array<i64: 128, 16>}, {transform_indices = @transform_1, window_bounds = array<i64: 16, 4>}, {transform_indices = @transform_2, window_bounds = array<i64: 128, 4>}]} {
    %c0 = arith.constant 0 : index
    %c0_0 = arith.constant 0 : index
    %0 = vector.load %arg3[%c0, %c0_0] : memref<128x16xbf16, #tpu.memory_space<vmem>>, vector<128x16xbf16>
    %c0_1 = arith.constant 0 : index
    %c0_2 = arith.constant 0 : index
    %1 = vector.load %arg4[%c0_1, %c0_2] : memref<16x4xbf16, #tpu.memory_space<vmem>>, vector<16x4xbf16>
    %cst = arith.constant 0.000000e+00 : bf16
    %2 = vector.broadcast %cst : bf16 to vector<128x16xbf16>
    %3 = arith.maximumf %0, %2 : vector<128x16xbf16>
    %cst_3 = arith.constant dense<0.000000e+00> : vector<128x4xf32>
    %4 = tpu.matmul %3, %1, %cst_3 {dimension_numbers = #tpu.dot_dimension_numbers<[1], [0], [0], [1], [0, 0, 1, 1], [], []>} : vector<128x16xbf16>, vector<16x4xbf16>, vector<128x4xf32> -> vector<128x4xf32>
    %c0_i32 = arith.constant 0 : i32
    %5 = arith.cmpi eq, %arg2, %c0_i32 : i32
    %6 = arith.extui %5 : i1 to i32
    %c0_i32_4 = arith.constant 0 : i32
    %7 = arith.cmpi ne, %6, %c0_i32_4 : i32
    scf.if %7 {
      %c0_9 = arith.constant 0 : index
      %c0_10 = arith.constant 0 : index
      %14 = vector.load %arg6[%c0_9, %c0_10] : memref<128x4xf32, #tpu.memory_space<vmem>>, vector<128x4xf32>
      tpu.vector_store %arg6[%c0_9, %c0_10], %4 {strides = array<i32>} : memref<128x4xf32, #tpu.memory_space<vmem>>, vector<128x4xf32>,
    } else {
    }
    %c0_i32_5 = arith.constant 0 : i32
    %8 = arith.cmpi ne, %arg2, %c0_i32_5 : i32
    %9 = arith.extui %8 : i1 to i32
    %c0_i32_6 = arith.constant 0 : i32
    %10 = arith.cmpi ne, %9, %c0_i32_6 : i32
    scf.if %10 {
      %c0_9 = arith.constant 0 : index
      %c0_10 = arith.constant 0 : index
      %14 = vector.load %arg6[%c0_9, %c0_10] : memref<128x4xf32, #tpu.memory_space<vmem>>, vector<128x4xf32>
      %15 = arith.addf %14, %4 : vector<128x4xf32>
      %c0_11 = arith.constant 0 : index
      %c0_12 = arith.constant 0 : index
      %16 = vector.load %arg6[%c0_11, %c0_12] : memref<128x4xf32, #tpu.memory_space<vmem>>, vector<128x4xf32>
      tpu.vector_store %arg6[%c0_11, %c0_12], %15 {strides = array<i32>} : memref<128x4xf32, #tpu.memory_space<vmem>>, vector<128x4xf32>,
    } else {
    }
    %c0_i32_7 = arith.constant 0 : i32
    %11 = arith.cmpi eq, %arg2, %c0_i32_7 : i32
    %12 = arith.extui %11 : i1 to i32
    %c0_i32_8 = arith.constant 0 : i32
    %13 = arith.cmpi ne, %12, %c0_i32_8 : i32
    scf.if %13 {
      %c0_9 = arith.constant 0 : index
      %c0_10 = arith.constant 0 : index
      %14 = vector.load %arg6[%c0_9, %c0_10] : memref<128x4xf32, #tpu.memory_space<vmem>>, vector<128x4xf32>
      %15 = arith.truncf %14 : vector<128x4xf32> to vector<128x4xbf16>
      %c0_11 = arith.constant 0 : index
      %c0_12 = arith.constant 0 : index
      %16 = vector.load %arg5[%c0_11, %c0_12] : memref<128x4xbf16, #tpu.memory_space<vmem>>, vector<128x4xbf16>
      tpu.vector_store %arg5[%c0_11, %c0_12], %15 {strides = array<i32>} : memref<128x4xbf16, #tpu.memory_space<vmem>>, vector<128x4xbf16>,
    } else {
    }
    return
  }
  func.func @transform_0(%arg0: i32, %arg1: i32, %arg2: i32) -> (i32, i32) {
    %c0_i32 = arith.constant 0 : i32
    return %arg0, %arg2 : i32, i32
  }
  func.func @transform_1(%arg0: i32, %arg1: i32, %arg2: i32) -> (i32, i32) {
    %c0_i32 = arith.constant 0 : i32
    return %arg2, %arg1 : i32, i32
  }
  func.func @transform_2(%arg0: i32, %arg1: i32, %arg2: i32) -> (i32, i32) {
    %c0_i32 = arith.constant 0 : i32
    return %arg0, %arg1 : i32, i32
  }
}

module attributes {stable_mosaic.version = 11 : i64} {
  func.func @_mm_kernel(%arg0: i32, %arg1: i32, %arg2: i32, %arg3: memref<128x4xbf16, #tpu.memory_space<vmem>>, %arg4: memref<4x16xbf16, #tpu.memory_space<vmem>>, %arg5: memref<128x16xbf16, #tpu.memory_space<vmem>>, %arg6: memref<128x16xbf16, #tpu.memory_space<vmem>>, %arg7: memref<128x16xf32, #tpu.memory_space<vmem>>) attributes {dimension_semantics = [#tpu.dimension_semantics<parallel>, #tpu.dimension_semantics<parallel>, #tpu.dimension_semantics<arbitrary>], iteration_bounds = array<i64: 1, 1, 1>, scalar_prefetch = 0 : i64, scratch_operands = 1 : i64, tpu.core_type = #tpu.core_type<tc>, window_params = [{transform_indices = @transform_0, window_bounds = array<i64: 128, 4>}, {transform_indices = @transform_1, window_bounds = array<i64: 4, 16>}, {transform_indices = @transform_2, window_bounds = array<i64: 128, 16>}, {transform_indices = @transform_3, window_bounds = array<i64: 128, 16>}]} {
    %c0 = arith.constant 0 : index
    %c0_0 = arith.constant 0 : index
    %0 = vector.load %arg3[%c0, %c0_0] : memref<128x4xbf16, #tpu.memory_space<vmem>>, vector<128x4xbf16>
    %c0_1 = arith.constant 0 : index
    %c0_2 = arith.constant 0 : index
    %1 = vector.load %arg4[%c0_1, %c0_2] : memref<4x16xbf16, #tpu.memory_space<vmem>>, vector<4x16xbf16>
    %cst = arith.constant 0.000000e+00 : bf16
    %2 = vector.broadcast %cst : bf16 to vector<128x4xbf16>
    %3 = arith.maximumf %0, %2 : vector<128x4xbf16>
    %cst_3 = arith.constant dense<0.000000e+00> : vector<128x16xf32>
    %4 = tpu.matmul %3, %1, %cst_3 {dimension_numbers = #tpu.dot_dimension_numbers<[1], [0], [0], [1], [0, 0, 1, 1], [], []>} : vector<128x4xbf16>, vector<4x16xbf16>, vector<128x16xf32> -> vector<128x16xf32>
    %c0_i32 = arith.constant 0 : i32
    %5 = arith.cmpi eq, %arg2, %c0_i32 : i32
    %6 = arith.extui %5 : i1 to i32
    %c0_i32_4 = arith.constant 0 : i32
    %7 = arith.cmpi ne, %6, %c0_i32_4 : i32
    scf.if %7 {
      %c0_9 = arith.constant 0 : index
      %c0_10 = arith.constant 0 : index
      %14 = vector.load %arg7[%c0_9, %c0_10] : memref<128x16xf32, #tpu.memory_space<vmem>>, vector<128x16xf32>
      tpu.vector_store %arg7[%c0_9, %c0_10], %4 {strides = array<i32>} : memref<128x16xf32, #tpu.memory_space<vmem>>, vector<128x16xf32>,
    } else {
    }
    %c0_i32_5 = arith.constant 0 : i32
    %8 = arith.cmpi ne, %arg2, %c0_i32_5 : i32
    %9 = arith.extui %8 : i1 to i32
    %c0_i32_6 = arith.constant 0 : i32
    %10 = arith.cmpi ne, %9, %c0_i32_6 : i32
    scf.if %10 {
      %c0_9 = arith.constant 0 : index
      %c0_10 = arith.constant 0 : index
      %14 = vector.load %arg7[%c0_9, %c0_10] : memref<128x16xf32, #tpu.memory_space<vmem>>, vector<128x16xf32>
      %15 = arith.addf %14, %4 : vector<128x16xf32>
      %c0_11 = arith.constant 0 : index
      %c0_12 = arith.constant 0 : index
      %16 = vector.load %arg7[%c0_11, %c0_12] : memref<128x16xf32, #tpu.memory_space<vmem>>, vector<128x16xf32>
      tpu.vector_store %arg7[%c0_11, %c0_12], %15 {strides = array<i32>} : memref<128x16xf32, #tpu.memory_space<vmem>>, vector<128x16xf32>,
    } else {
    }
    %c0_i32_7 = arith.constant 0 : i32
    %11 = arith.cmpi eq, %arg2, %c0_i32_7 : i32
    %12 = arith.extui %11 : i1 to i32
    %c0_i32_8 = arith.constant 0 : i32
    %13 = arith.cmpi ne, %12, %c0_i32_8 : i32
    scf.if %13 {
      %c0_9 = arith.constant 0 : index
      %c0_10 = arith.constant 0 : index
      %14 = vector.load %arg7[%c0_9, %c0_10] : memref<128x16xf32, #tpu.memory_space<vmem>>, vector<128x16xf32>
      %c0_11 = arith.constant 0 : index
      %c0_12 = arith.constant 0 : index
      %15 = vector.load %arg5[%c0_11, %c0_12] : memref<128x16xbf16, #tpu.memory_space<vmem>>, vector<128x16xbf16>
      %16 = arith.extf %15 : vector<128x16xbf16> to vector<128x16xf32>
      %17 = arith.addf %14, %16 : vector<128x16xf32>
      %18 = arith.truncf %17 : vector<128x16xf32> to vector<128x16xbf16>
      %c0_13 = arith.constant 0 : index
      %c0_14 = arith.constant 0 : index
      %19 = vector.load %arg6[%c0_13, %c0_14] : memref<128x16xbf16, #tpu.memory_space<vmem>>, vector<128x16xbf16>
      tpu.vector_store %arg6[%c0_13, %c0_14], %18 {strides = array<i32>} : memref<128x16xbf16, #tpu.memory_space<vmem>>, vector<128x16xbf16>,
    } else {
    }
    return
  }
  func.func @transform_0(%arg0: i32, %arg1: i32, %arg2: i32) -> (i32, i32) {
    %c0_i32 = arith.constant 0 : i32
    return %arg0, %arg2 : i32, i32
  }
  func.func @transform_1(%arg0: i32, %arg1: i32, %arg2: i32) -> (i32, i32) {
    %c0_i32 = arith.constant 0 : i32
    return %arg2, %arg1 : i32, i32
  }
  func.func @transform_2(%arg0: i32, %arg1: i32, %arg2: i32) -> (i32, i32) {
    %c0_i32 = arith.constant 0 : i32
    return %arg0, %arg1 : i32, i32
  }
  func.func @transform_3(%arg0: i32, %arg1: i32, %arg2: i32) -> (i32, i32) {
    %c0_i32 = arith.constant 0 : i32
    return %arg0, %arg1 : i32, i32
  }
}

module attributes {stable_mosaic.version = 11 : i64} {
  func.func @_conv3x3_kernel(%arg0: memref<8x398xbf16, #tpu.memory_space<vmem>>, %arg1: memref<9x8x8xbf16, #tpu.memory_space<vmem>>, %arg2: memref<8x360xbf16, #tpu.memory_space<vmem>>, %arg3: memref<8x360xbf16, #tpu.memory_space<vmem>>) attributes {dimension_semantics = [], scalar_prefetch = 0 : i64, scratch_operands = 0 : i64, tpu.core_type = #tpu.core_type<tc>} {
    %c0 = arith.constant 0 : index
    %c0_0 = arith.constant 0 : index
    %0 = vector.load %arg0[%c0, %c0_0] : memref<8x398xbf16, #tpu.memory_space<vmem>>, vector<8x360xbf16>
    %cst = arith.constant 0.000000e+00 : bf16
    %1 = vector.broadcast %cst : bf16 to vector<8x360xbf16>
    %2 = arith.maximumf %0, %1 : vector<8x360xbf16>
    %c0_1 = arith.constant 0 : index
    %c0_2 = arith.constant 0 : index
    %c0_3 = arith.constant 0 : index
    %3 = vector.load %arg1[%c0_1, %c0_2, %c0_3] : memref<9x8x8xbf16, #tpu.memory_space<vmem>>, vector<1x8x8xbf16>
    %4 = vector.shape_cast %3 : vector<1x8x8xbf16> to vector<8x8xbf16>
    %cst_4 = arith.constant dense<0.000000e+00> : vector<8x360xf32>
    %5 = tpu.matmul %4, %2, %cst_4 {dimension_numbers = #tpu.dot_dimension_numbers<[1], [0], [0], [1], [0, 0, 1, 1], [], []>} : vector<8x8xbf16>, vector<8x360xbf16>, vector<8x360xf32> -> vector<8x360xf32>
    %c0_5 = arith.constant 0 : index
    %c1 = arith.constant 1 : index
    %6 = vector.load %arg0[%c0_5, %c1] : memref<8x398xbf16, #tpu.memory_space<vmem>>, vector<8x360xbf16>
    %cst_6 = arith.constant 0.000000e+00 : bf16
    %7 = vector.broadcast %cst_6 : bf16 to vector<8x360xbf16>
    %8 = arith.maximumf %6, %7 : vector<8x360xbf16>
    %c1_7 = arith.constant 1 : index
    %c0_8 = arith.constant 0 : index
    %c0_9 = arith.constant 0 : index
    %9 = vector.load %arg1[%c1_7, %c0_8, %c0_9] : memref<9x8x8xbf16, #tpu.memory_space<vmem>>, vector<1x8x8xbf16>
    %10 = vector.shape_cast %9 : vector<1x8x8xbf16> to vector<8x8xbf16>
    %cst_10 = arith.constant dense<0.000000e+00> : vector<8x360xf32>
    %11 = tpu.matmul %10, %8, %cst_10 {dimension_numbers = #tpu.dot_dimension_numbers<[1], [0], [0], [1], [0, 0, 1, 1], [], []>} : vector<8x8xbf16>, vector<8x360xbf16>, vector<8x360xf32> -> vector<8x360xf32>
    %12 = arith.addf %5, %11 : vector<8x360xf32>
    %c0_11 = arith.constant 0 : index
    %c2 = arith.constant 2 : index
    %13 = vector.load %arg0[%c0_11, %c2] : memref<8x398xbf16, #tpu.memory_space<vmem>>, vector<8x360xbf16>
    %cst_12 = arith.constant 0.000000e+00 : bf16
    %14 = vector.broadcast %cst_12 : bf16 to vector<8x360xbf16>
    %15 = arith.maximumf %13, %14 : vector<8x360xbf16>
    %c2_13 = arith.constant 2 : index
    %c0_14 = arith.constant 0 : index
    %c0_15 = arith.constant 0 : index
    %16 = vector.load %arg1[%c2_13, %c0_14, %c0_15] : memref<9x8x8xbf16, #tpu.memory_space<vmem>>, vector<1x8x8xbf16>
    %17 = vector.shape_cast %16 : vector<1x8x8xbf16> to vector<8x8xbf16>
    %cst_16 = arith.constant dense<0.000000e+00> : vector<8x360xf32>
    %18 = tpu.matmul %17, %15, %cst_16 {dimension_numbers = #tpu.dot_dimension_numbers<[1], [0], [0], [1], [0, 0, 1, 1], [], []>} : vector<8x8xbf16>, vector<8x360xbf16>, vector<8x360xf32> -> vector<8x360xf32>
    %19 = arith.addf %12, %18 : vector<8x360xf32>
    %c0_17 = arith.constant 0 : index
    %c18 = arith.constant 18 : index
    %20 = vector.load %arg0[%c0_17, %c18] : memref<8x398xbf16, #tpu.memory_space<vmem>>, vector<8x360xbf16>
    %cst_18 = arith.constant 0.000000e+00 : bf16
    %21 = vector.broadcast %cst_18 : bf16 to vector<8x360xbf16>
    %22 = arith.maximumf %20, %21 : vector<8x360xbf16>
    %c3 = arith.constant 3 : index
    %c0_19 = arith.constant 0 : index
    %c0_20 = arith.constant 0 : index
    %23 = vector.load %arg1[%c3, %c0_19, %c0_20] : memref<9x8x8xbf16, #tpu.memory_space<vmem>>, vector<1x8x8xbf16>
    %24 = vector.shape_cast %23 : vector<1x8x8xbf16> to vector<8x8xbf16>
    %cst_21 = arith.constant dense<0.000000e+00> : vector<8x360xf32>
    %25 = tpu.matmul %24, %22, %cst_21 {dimension_numbers = #tpu.dot_dimension_numbers<[1], [0], [0], [1], [0, 0, 1, 1], [], []>} : vector<8x8xbf16>, vector<8x360xbf16>, vector<8x360xf32> -> vector<8x360xf32>
    %26 = arith.addf %19, %25 : vector<8x360xf32>
    %c0_22 = arith.constant 0 : index
    %c19 = arith.constant 19 : index
    %27 = vector.load %arg0[%c0_22, %c19] : memref<8x398xbf16, #tpu.memory_space<vmem>>, vector<8x360xbf16>
    %cst_23 = arith.constant 0.000000e+00 : bf16
    %28 = vector.broadcast %cst_23 : bf16 to vector<8x360xbf16>
    %29 = arith.maximumf %27, %28 : vector<8x360xbf16>
    %c4 = arith.constant 4 : index
    %c0_24 = arith.constant 0 : index
    %c0_25 = arith.constant 0 : index
    %30 = vector.load %arg1[%c4, %c0_24, %c0_25] : memref<9x8x8xbf16, #tpu.memory_space<vmem>>, vector<1x8x8xbf16>
    %31 = vector.shape_cast %30 : vector<1x8x8xbf16> to vector<8x8xbf16>
    %cst_26 = arith.constant dense<0.000000e+00> : vector<8x360xf32>
    %32 = tpu.matmul %31, %29, %cst_26 {dimension_numbers = #tpu.dot_dimension_numbers<[1], [0], [0], [1], [0, 0, 1, 1], [], []>} : vector<8x8xbf16>, vector<8x360xbf16>, vector<8x360xf32> -> vector<8x360xf32>
    %33 = arith.addf %26, %32 : vector<8x360xf32>
    %c0_27 = arith.constant 0 : index
    %c20 = arith.constant 20 : index
    %34 = vector.load %arg0[%c0_27, %c20] : memref<8x398xbf16, #tpu.memory_space<vmem>>, vector<8x360xbf16>
    %cst_28 = arith.constant 0.000000e+00 : bf16
    %35 = vector.broadcast %cst_28 : bf16 to vector<8x360xbf16>
    %36 = arith.maximumf %34, %35 : vector<8x360xbf16>
    %c5 = arith.constant 5 : index
    %c0_29 = arith.constant 0 : index
    %c0_30 = arith.constant 0 : index
    %37 = vector.load %arg1[%c5, %c0_29, %c0_30] : memref<9x8x8xbf16, #tpu.memory_space<vmem>>, vector<1x8x8xbf16>
    %38 = vector.shape_cast %37 : vector<1x8x8xbf16> to vector<8x8xbf16>
    %cst_31 = arith.constant dense<0.000000e+00> : vector<8x360xf32>
    %39 = tpu.matmul %38, %36, %cst_31 {dimension_numbers = #tpu.dot_dimension_numbers<[1], [0], [0], [1], [0, 0, 1, 1], [], []>} : vector<8x8xbf16>, vector<8x360xbf16>, vector<8x360xf32> -> vector<8x360xf32>
    %40 = arith.addf %33, %39 : vector<8x360xf32>
    %c0_32 = arith.constant 0 : index
    %c36 = arith.constant 36 : index
    %41 = vector.load %arg0[%c0_32, %c36] : memref<8x398xbf16, #tpu.memory_space<vmem>>, vector<8x360xbf16>
    %cst_33 = arith.constant 0.000000e+00 : bf16
    %42 = vector.broadcast %cst_33 : bf16 to vector<8x360xbf16>
    %43 = arith.maximumf %41, %42 : vector<8x360xbf16>
    %c6 = arith.constant 6 : index
    %c0_34 = arith.constant 0 : index
    %c0_35 = arith.constant 0 : index
    %44 = vector.load %arg1[%c6, %c0_34, %c0_35] : memref<9x8x8xbf16, #tpu.memory_space<vmem>>, vector<1x8x8xbf16>
    %45 = vector.shape_cast %44 : vector<1x8x8xbf16> to vector<8x8xbf16>
    %cst_36 = arith.constant dense<0.000000e+00> : vector<8x360xf32>
    %46 = tpu.matmul %45, %43, %cst_36 {dimension_numbers = #tpu.dot_dimension_numbers<[1], [0], [0], [1], [0, 0, 1, 1], [], []>} : vector<8x8xbf16>, vector<8x360xbf16>, vector<8x360xf32> -> vector<8x360xf32>
    %47 = arith.addf %40, %46 : vector<8x360xf32>
    %c0_37 = arith.constant 0 : index
    %c37 = arith.constant 37 : index
    %48 = vector.load %arg0[%c0_37, %c37] : memref<8x398xbf16, #tpu.memory_space<vmem>>, vector<8x360xbf16>
    %cst_38 = arith.constant 0.000000e+00 : bf16
    %49 = vector.broadcast %cst_38 : bf16 to vector<8x360xbf16>
    %50 = arith.maximumf %48, %49 : vector<8x360xbf16>
    %c7 = arith.constant 7 : index
    %c0_39 = arith.constant 0 : index
    %c0_40 = arith.constant 0 : index
    %51 = vector.load %arg1[%c7, %c0_39, %c0_40] : memref<9x8x8xbf16, #tpu.memory_space<vmem>>, vector<1x8x8xbf16>
    %52 = vector.shape_cast %51 : vector<1x8x8xbf16> to vector<8x8xbf16>
    %cst_41 = arith.constant dense<0.000000e+00> : vector<8x360xf32>
    %53 = tpu.matmul %52, %50, %cst_41 {dimension_numbers = #tpu.dot_dimension_numbers<[1], [0], [0], [1], [0, 0, 1, 1], [], []>} : vector<8x8xbf16>, vector<8x360xbf16>, vector<8x360xf32> -> vector<8x360xf32>
    %54 = arith.addf %47, %53 : vector<8x360xf32>
    %c0_42 = arith.constant 0 : index
    %c38 = arith.constant 38 : index
    %55 = vector.load %arg0[%c0_42, %c38] : memref<8x398xbf16, #tpu.memory_space<vmem>>, vector<8x360xbf16>
    %cst_43 = arith.constant 0.000000e+00 : bf16
    %56 = vector.broadcast %cst_43 : bf16 to vector<8x360xbf16>
    %57 = arith.maximumf %55, %56 : vector<8x360xbf16>
    %c8 = arith.constant 8 : index
    %c0_44 = arith.constant 0 : index
    %c0_45 = arith.constant 0 : index
    %58 = vector.load %arg1[%c8, %c0_44, %c0_45] : memref<9x8x8xbf16, #tpu.memory_space<vmem>>, vector<1x8x8xbf16>
    %59 = vector.shape_cast %58 : vector<1x8x8xbf16> to vector<8x8xbf16>
    %cst_46 = arith.constant dense<0.000000e+00> : vector<8x360xf32>
    %60 = tpu.matmul %59, %57, %cst_46 {dimension_numbers = #tpu.dot_dimension_numbers<[1], [0], [0], [1], [0, 0, 1, 1], [], []>} : vector<8x8xbf16>, vector<8x360xbf16>, vector<8x360xf32> -> vector<8x360xf32>
    %61 = arith.addf %54, %60 : vector<8x360xf32>
    %c0_47 = arith.constant 0 : index
    %c0_48 = arith.constant 0 : index
    %62 = vector.load %arg2[%c0_47, %c0_48] : memref<8x360xbf16, #tpu.memory_space<vmem>>, vector<8x360xbf16>
    %63 = arith.extf %62 : vector<8x360xbf16> to vector<8x360xf32>
    %64 = arith.addf %61, %63 : vector<8x360xf32>
    %65 = arith.truncf %64 : vector<8x360xf32> to vector<8x360xbf16>
    %c0_49 = arith.constant 0 : index
    %c0_50 = arith.constant 0 : index
    %66 = vector.load %arg3[%c0_49, %c0_50] : memref<8x360xbf16, #tpu.memory_space<vmem>>, vector<8x360xbf16>
    tpu.vector_store %arg3[%c0_49, %c0_50], %65 {strides = array<i32>} : memref<8x360xbf16, #tpu.memory_space<vmem>>, vector<8x360xbf16>,
    return
  }
}

module attributes {stable_mosaic.version = 11 : i64} {
  func.func @_mm_kernel(%arg0: i32, %arg1: i32, %arg2: i32, %arg3: memref<16x32xbf16, #tpu.memory_space<vmem>>, %arg4: memref<32x64xbf16, #tpu.memory_space<vmem>>, %arg5: memref<16x64xbf16, #tpu.memory_space<vmem>>, %arg6: memref<16x64xf32, #tpu.memory_space<vmem>>) attributes {dimension_semantics = [#tpu.dimension_semantics<parallel>, #tpu.dimension_semantics<parallel>, #tpu.dimension_semantics<arbitrary>], iteration_bounds = array<i64: 1, 1, 1>, scalar_prefetch = 0 : i64, scratch_operands = 1 : i64, tpu.core_type = #tpu.core_type<tc>, window_params = [{transform_indices = @transform_0, window_bounds = array<i64: 16, 32>}, {transform_indices = @transform_1, window_bounds = array<i64: 32, 64>}, {transform_indices = @transform_2, window_bounds = array<i64: 16, 64>}]} {
    %c0 = arith.constant 0 : index
    %c0_0 = arith.constant 0 : index
    %0 = vector.load %arg3[%c0, %c0_0] : memref<16x32xbf16, #tpu.memory_space<vmem>>, vector<16x32xbf16>
    %c0_1 = arith.constant 0 : index
    %c0_2 = arith.constant 0 : index
    %1 = vector.load %arg4[%c0_1, %c0_2] : memref<32x64xbf16, #tpu.memory_space<vmem>>, vector<32x64xbf16>
    %cst = arith.constant 0.000000e+00 : bf16
    %2 = vector.broadcast %cst : bf16 to vector<32x64xbf16>
    %3 = arith.maximumf %1, %2 : vector<32x64xbf16>
    %cst_3 = arith.constant dense<0.000000e+00> : vector<16x64xf32>
    %4 = tpu.matmul %0, %3, %cst_3 {dimension_numbers = #tpu.dot_dimension_numbers<[1], [0], [0], [1], [0, 0, 1, 1], [], []>} : vector<16x32xbf16>, vector<32x64xbf16>, vector<16x64xf32> -> vector<16x64xf32>
    %c0_i32 = arith.constant 0 : i32
    %5 = arith.cmpi eq, %arg2, %c0_i32 : i32
    %6 = arith.extui %5 : i1 to i32
    %c0_i32_4 = arith.constant 0 : i32
    %7 = arith.cmpi ne, %6, %c0_i32_4 : i32
    scf.if %7 {
      %c0_9 = arith.constant 0 : index
      %c0_10 = arith.constant 0 : index
      %14 = vector.load %arg6[%c0_9, %c0_10] : memref<16x64xf32, #tpu.memory_space<vmem>>, vector<16x64xf32>
      tpu.vector_store %arg6[%c0_9, %c0_10], %4 {strides = array<i32>} : memref<16x64xf32, #tpu.memory_space<vmem>>, vector<16x64xf32>,
    } else {
    }
    %c0_i32_5 = arith.constant 0 : i32
    %8 = arith.cmpi ne, %arg2, %c0_i32_5 : i32
    %9 = arith.extui %8 : i1 to i32
    %c0_i32_6 = arith.constant 0 : i32
    %10 = arith.cmpi ne, %9, %c0_i32_6 : i32
    scf.if %10 {
      %c0_9 = arith.constant 0 : index
      %c0_10 = arith.constant 0 : index
      %14 = vector.load %arg6[%c0_9, %c0_10] : memref<16x64xf32, #tpu.memory_space<vmem>>, vector<16x64xf32>
      %15 = arith.addf %14, %4 : vector<16x64xf32>
      %c0_11 = arith.constant 0 : index
      %c0_12 = arith.constant 0 : index
      %16 = vector.load %arg6[%c0_11, %c0_12] : memref<16x64xf32, #tpu.memory_space<vmem>>, vector<16x64xf32>
      tpu.vector_store %arg6[%c0_11, %c0_12], %15 {strides = array<i32>} : memref<16x64xf32, #tpu.memory_space<vmem>>, vector<16x64xf32>,
    } else {
    }
    %c0_i32_7 = arith.constant 0 : i32
    %11 = arith.cmpi eq, %arg2, %c0_i32_7 : i32
    %12 = arith.extui %11 : i1 to i32
    %c0_i32_8 = arith.constant 0 : i32
    %13 = arith.cmpi ne, %12, %c0_i32_8 : i32
    scf.if %13 {
      %c0_9 = arith.constant 0 : index
      %c0_10 = arith.constant 0 : index
      %14 = vector.load %arg6[%c0_9, %c0_10] : memref<16x64xf32, #tpu.memory_space<vmem>>, vector<16x64xf32>
      %15 = arith.truncf %14 : vector<16x64xf32> to vector<16x64xbf16>
      %c0_11 = arith.constant 0 : index
      %c0_12 = arith.constant 0 : index
      %16 = vector.load %arg5[%c0_11, %c0_12] : memref<16x64xbf16, #tpu.memory_space<vmem>>, vector<16x64xbf16>
      tpu.vector_store %arg5[%c0_11, %c0_12], %15 {strides = array<i32>} : memref<16x64xbf16, #tpu.memory_space<vmem>>, vector<16x64xbf16>,
    } else {
    }
    return
  }
  func.func @transform_0(%arg0: i32, %arg1: i32, %arg2: i32) -> (i32, i32) {
    %c0_i32 = arith.constant 0 : i32
    return %arg0, %arg2 : i32, i32
  }
  func.func @transform_1(%arg0: i32, %arg1: i32, %arg2: i32) -> (i32, i32) {
    %c0_i32 = arith.constant 0 : i32
    return %arg2, %arg1 : i32, i32
  }
  func.func @transform_2(%arg0: i32, %arg1: i32, %arg2: i32) -> (i32, i32) {
    %c0_i32 = arith.constant 0 : i32
    return %arg0, %arg1 : i32, i32
  }
}

module attributes {stable_mosaic.version = 11 : i64} {
  func.func @_conv3x3_kernel(%arg0: memref<16x142xbf16, #tpu.memory_space<vmem>>, %arg1: memref<9x16x16xbf16, #tpu.memory_space<vmem>>, %arg2: memref<16x120xbf16, #tpu.memory_space<vmem>>) attributes {dimension_semantics = [], scalar_prefetch = 0 : i64, scratch_operands = 0 : i64, tpu.core_type = #tpu.core_type<tc>} {
    %c0 = arith.constant 0 : index
    %c0_0 = arith.constant 0 : index
    %0 = vector.load %arg0[%c0, %c0_0] : memref<16x142xbf16, #tpu.memory_space<vmem>>, vector<16x120xbf16>
    %cst = arith.constant 0.000000e+00 : bf16
    %1 = vector.broadcast %cst : bf16 to vector<16x120xbf16>
    %2 = arith.maximumf %0, %1 : vector<16x120xbf16>
    %c0_1 = arith.constant 0 : index
    %c0_2 = arith.constant 0 : index
    %c0_3 = arith.constant 0 : index
    %3 = vector.load %arg1[%c0_1, %c0_2, %c0_3] : memref<9x16x16xbf16, #tpu.memory_space<vmem>>, vector<1x16x16xbf16>
    %4 = vector.shape_cast %3 : vector<1x16x16xbf16> to vector<16x16xbf16>
    %cst_4 = arith.constant dense<0.000000e+00> : vector<16x120xf32>
    %5 = tpu.matmul %4, %2, %cst_4 {dimension_numbers = #tpu.dot_dimension_numbers<[1], [0], [0], [1], [0, 0, 1, 1], [], []>} : vector<16x16xbf16>, vector<16x120xbf16>, vector<16x120xf32> -> vector<16x120xf32>
    %c0_5 = arith.constant 0 : index
    %c1 = arith.constant 1 : index
    %6 = vector.load %arg0[%c0_5, %c1] : memref<16x142xbf16, #tpu.memory_space<vmem>>, vector<16x120xbf16>
    %cst_6 = arith.constant 0.000000e+00 : bf16
    %7 = vector.broadcast %cst_6 : bf16 to vector<16x120xbf16>
    %8 = arith.maximumf %6, %7 : vector<16x120xbf16>
    %c1_7 = arith.constant 1 : index
    %c0_8 = arith.constant 0 : index
    %c0_9 = arith.constant 0 : index
    %9 = vector.load %arg1[%c1_7, %c0_8, %c0_9] : memref<9x16x16xbf16, #tpu.memory_space<vmem>>, vector<1x16x16xbf16>
    %10 = vector.shape_cast %9 : vector<1x16x16xbf16> to vector<16x16xbf16>
    %cst_10 = arith.constant dense<0.000000e+00> : vector<16x120xf32>
    %11 = tpu.matmul %10, %8, %cst_10 {dimension_numbers = #tpu.dot_dimension_numbers<[1], [0], [0], [1], [0, 0, 1, 1], [], []>} : vector<16x16xbf16>, vector<16x120xbf16>, vector<16x120xf32> -> vector<16x120xf32>
    %12 = arith.addf %5, %11 : vector<16x120xf32>
    %c0_11 = arith.constant 0 : index
    %c2 = arith.constant 2 : index
    %13 = vector.load %arg0[%c0_11, %c2] : memref<16x142xbf16, #tpu.memory_space<vmem>>, vector<16x120xbf16>
    %cst_12 = arith.constant 0.000000e+00 : bf16
    %14 = vector.broadcast %cst_12 : bf16 to vector<16x120xbf16>
    %15 = arith.maximumf %13, %14 : vector<16x120xbf16>
    %c2_13 = arith.constant 2 : index
    %c0_14 = arith.constant 0 : index
    %c0_15 = arith.constant 0 : index
    %16 = vector.load %arg1[%c2_13, %c0_14, %c0_15] : memref<9x16x16xbf16, #tpu.memory_space<vmem>>, vector<1x16x16xbf16>
    %17 = vector.shape_cast %16 : vector<1x16x16xbf16> to vector<16x16xbf16>
    %cst_16 = arith.constant dense<0.000000e+00> : vector<16x120xf32>
    %18 = tpu.matmul %17, %15, %cst_16 {dimension_numbers = #tpu.dot_dimension_numbers<[1], [0], [0], [1], [0, 0, 1, 1], [], []>} : vector<16x16xbf16>, vector<16x120xbf16>, vector<16x120xf32> -> vector<16x120xf32>
    %19 = arith.addf %12, %18 : vector<16x120xf32>
    %c0_17 = arith.constant 0 : index
    %c10 = arith.constant 10 : index
    %20 = vector.load %arg0[%c0_17, %c10] : memref<16x142xbf16, #tpu.memory_space<vmem>>, vector<16x120xbf16>
    %cst_18 = arith.constant 0.000000e+00 : bf16
    %21 = vector.broadcast %cst_18 : bf16 to vector<16x120xbf16>
    %22 = arith.maximumf %20, %21 : vector<16x120xbf16>
    %c3 = arith.constant 3 : index
    %c0_19 = arith.constant 0 : index
    %c0_20 = arith.constant 0 : index
    %23 = vector.load %arg1[%c3, %c0_19, %c0_20] : memref<9x16x16xbf16, #tpu.memory_space<vmem>>, vector<1x16x16xbf16>
    %24 = vector.shape_cast %23 : vector<1x16x16xbf16> to vector<16x16xbf16>
    %cst_21 = arith.constant dense<0.000000e+00> : vector<16x120xf32>
    %25 = tpu.matmul %24, %22, %cst_21 {dimension_numbers = #tpu.dot_dimension_numbers<[1], [0], [0], [1], [0, 0, 1, 1], [], []>} : vector<16x16xbf16>, vector<16x120xbf16>, vector<16x120xf32> -> vector<16x120xf32>
    %26 = arith.addf %19, %25 : vector<16x120xf32>
    %c0_22 = arith.constant 0 : index
    %c11 = arith.constant 11 : index
    %27 = vector.load %arg0[%c0_22, %c11] : memref<16x142xbf16, #tpu.memory_space<vmem>>, vector<16x120xbf16>
    %cst_23 = arith.constant 0.000000e+00 : bf16
    %28 = vector.broadcast %cst_23 : bf16 to vector<16x120xbf16>
    %29 = arith.maximumf %27, %28 : vector<16x120xbf16>
    %c4 = arith.constant 4 : index
    %c0_24 = arith.constant 0 : index
    %c0_25 = arith.constant 0 : index
    %30 = vector.load %arg1[%c4, %c0_24, %c0_25] : memref<9x16x16xbf16, #tpu.memory_space<vmem>>, vector<1x16x16xbf16>
    %31 = vector.shape_cast %30 : vector<1x16x16xbf16> to vector<16x16xbf16>
    %cst_26 = arith.constant dense<0.000000e+00> : vector<16x120xf32>
    %32 = tpu.matmul %31, %29, %cst_26 {dimension_numbers = #tpu.dot_dimension_numbers<[1], [0], [0], [1], [0, 0, 1, 1], [], []>} : vector<16x16xbf16>, vector<16x120xbf16>, vector<16x120xf32> -> vector<16x120xf32>
    %33 = arith.addf %26, %32 : vector<16x120xf32>
    %c0_27 = arith.constant 0 : index
    %c12 = arith.constant 12 : index
    %34 = vector.load %arg0[%c0_27, %c12] : memref<16x142xbf16, #tpu.memory_space<vmem>>, vector<16x120xbf16>
    %cst_28 = arith.constant 0.000000e+00 : bf16
    %35 = vector.broadcast %cst_28 : bf16 to vector<16x120xbf16>
    %36 = arith.maximumf %34, %35 : vector<16x120xbf16>
    %c5 = arith.constant 5 : index
    %c0_29 = arith.constant 0 : index
    %c0_30 = arith.constant 0 : index
    %37 = vector.load %arg1[%c5, %c0_29, %c0_30] : memref<9x16x16xbf16, #tpu.memory_space<vmem>>, vector<1x16x16xbf16>
    %38 = vector.shape_cast %37 : vector<1x16x16xbf16> to vector<16x16xbf16>
    %cst_31 = arith.constant dense<0.000000e+00> : vector<16x120xf32>
    %39 = tpu.matmul %38, %36, %cst_31 {dimension_numbers = #tpu.dot_dimension_numbers<[1], [0], [0], [1], [0, 0, 1, 1], [], []>} : vector<16x16xbf16>, vector<16x120xbf16>, vector<16x120xf32> -> vector<16x120xf32>
    %40 = arith.addf %33, %39 : vector<16x120xf32>
    %c0_32 = arith.constant 0 : index
    %c20 = arith.constant 20 : index
    %41 = vector.load %arg0[%c0_32, %c20] : memref<16x142xbf16, #tpu.memory_space<vmem>>, vector<16x120xbf16>
    %cst_33 = arith.constant 0.000000e+00 : bf16
    %42 = vector.broadcast %cst_33 : bf16 to vector<16x120xbf16>
    %43 = arith.maximumf %41, %42 : vector<16x120xbf16>
    %c6 = arith.constant 6 : index
    %c0_34 = arith.constant 0 : index
    %c0_35 = arith.constant 0 : index
    %44 = vector.load %arg1[%c6, %c0_34, %c0_35] : memref<9x16x16xbf16, #tpu.memory_space<vmem>>, vector<1x16x16xbf16>
    %45 = vector.shape_cast %44 : vector<1x16x16xbf16> to vector<16x16xbf16>
    %cst_36 = arith.constant dense<0.000000e+00> : vector<16x120xf32>
    %46 = tpu.matmul %45, %43, %cst_36 {dimension_numbers = #tpu.dot_dimension_numbers<[1], [0], [0], [1], [0, 0, 1, 1], [], []>} : vector<16x16xbf16>, vector<16x120xbf16>, vector<16x120xf32> -> vector<16x120xf32>
    %47 = arith.addf %40, %46 : vector<16x120xf32>
    %c0_37 = arith.constant 0 : index
    %c21 = arith.constant 21 : index
    %48 = vector.load %arg0[%c0_37, %c21] : memref<16x142xbf16, #tpu.memory_space<vmem>>, vector<16x120xbf16>
    %cst_38 = arith.constant 0.000000e+00 : bf16
    %49 = vector.broadcast %cst_38 : bf16 to vector<16x120xbf16>
    %50 = arith.maximumf %48, %49 : vector<16x120xbf16>
    %c7 = arith.constant 7 : index
    %c0_39 = arith.constant 0 : index
    %c0_40 = arith.constant 0 : index
    %51 = vector.load %arg1[%c7, %c0_39, %c0_40] : memref<9x16x16xbf16, #tpu.memory_space<vmem>>, vector<1x16x16xbf16>
    %52 = vector.shape_cast %51 : vector<1x16x16xbf16> to vector<16x16xbf16>
    %cst_41 = arith.constant dense<0.000000e+00> : vector<16x120xf32>
    %53 = tpu.matmul %52, %50, %cst_41 {dimension_numbers = #tpu.dot_dimension_numbers<[1], [0], [0], [1], [0, 0, 1, 1], [], []>} : vector<16x16xbf16>, vector<16x120xbf16>, vector<16x120xf32> -> vector<16x120xf32>
    %54 = arith.addf %47, %53 : vector<16x120xf32>
    %c0_42 = arith.constant 0 : index
    %c22 = arith.constant 22 : index
    %55 = vector.load %arg0[%c0_42, %c22] : memref<16x142xbf16, #tpu.memory_space<vmem>>, vector<16x120xbf16>
    %cst_43 = arith.constant 0.000000e+00 : bf16
    %56 = vector.broadcast %cst_43 : bf16 to vector<16x120xbf16>
    %57 = arith.maximumf %55, %56 : vector<16x120xbf16>
    %c8 = arith.constant 8 : index
    %c0_44 = arith.constant 0 : index
    %c0_45 = arith.constant 0 : index
    %58 = vector.load %arg1[%c8, %c0_44, %c0_45] : memref<9x16x16xbf16, #tpu.memory_space<vmem>>, vector<1x16x16xbf16>
    %59 = vector.shape_cast %58 : vector<1x16x16xbf16> to vector<16x16xbf16>
    %cst_46 = arith.constant dense<0.000000e+00> : vector<16x120xf32>
    %60 = tpu.matmul %59, %57, %cst_46 {dimension_numbers = #tpu.dot_dimension_numbers<[1], [0], [0], [1], [0, 0, 1, 1], [], []>} : vector<16x16xbf16>, vector<16x120xbf16>, vector<16x120xf32> -> vector<16x120xf32>
    %61 = arith.addf %54, %60 : vector<16x120xf32>
    %62 = arith.truncf %61 : vector<16x120xf32> to vector<16x120xbf16>
    %c0_47 = arith.constant 0 : index
    %c0_48 = arith.constant 0 : index
    %63 = vector.load %arg2[%c0_47, %c0_48] : memref<16x120xbf16, #tpu.memory_space<vmem>>, vector<16x120xbf16>
    tpu.vector_store %arg2[%c0_47, %c0_48], %62 {strides = array<i32>} : memref<16x120xbf16, #tpu.memory_space<vmem>>, vector<16x120xbf16>,
    return
  }
}

module attributes {stable_mosaic.version = 11 : i64} {
  func.func @_mm_kernel(%arg0: i32, %arg1: i32, %arg2: i32, %arg3: memref<128x8xbf16, #tpu.memory_space<vmem>>, %arg4: memref<8x2xbf16, #tpu.memory_space<vmem>>, %arg5: memref<128x2xbf16, #tpu.memory_space<vmem>>, %arg6: memref<128x2xf32, #tpu.memory_space<vmem>>) attributes {dimension_semantics = [#tpu.dimension_semantics<parallel>, #tpu.dimension_semantics<parallel>, #tpu.dimension_semantics<arbitrary>], iteration_bounds = array<i64: 1, 1, 1>, scalar_prefetch = 0 : i64, scratch_operands = 1 : i64, tpu.core_type = #tpu.core_type<tc>, window_params = [{transform_indices = @transform_0, window_bounds = array<i64: 128, 8>}, {transform_indices = @transform_1, window_bounds = array<i64: 8, 2>}, {transform_indices = @transform_2, window_bounds = array<i64: 128, 2>}]} {
    %c0 = arith.constant 0 : index
    %c0_0 = arith.constant 0 : index
    %0 = vector.load %arg3[%c0, %c0_0] : memref<128x8xbf16, #tpu.memory_space<vmem>>, vector<128x8xbf16>
    %c0_1 = arith.constant 0 : index
    %c0_2 = arith.constant 0 : index
    %1 = vector.load %arg4[%c0_1, %c0_2] : memref<8x2xbf16, #tpu.memory_space<vmem>>, vector<8x2xbf16>
    %cst = arith.constant 0.000000e+00 : bf16
    %2 = vector.broadcast %cst : bf16 to vector<128x8xbf16>
    %3 = arith.maximumf %0, %2 : vector<128x8xbf16>
    %cst_3 = arith.constant dense<0.000000e+00> : vector<128x2xf32>
    %4 = tpu.matmul %3, %1, %cst_3 {dimension_numbers = #tpu.dot_dimension_numbers<[1], [0], [0], [1], [0, 0, 1, 1], [], []>} : vector<128x8xbf16>, vector<8x2xbf16>, vector<128x2xf32> -> vector<128x2xf32>
    %c0_i32 = arith.constant 0 : i32
    %5 = arith.cmpi eq, %arg2, %c0_i32 : i32
    %6 = arith.extui %5 : i1 to i32
    %c0_i32_4 = arith.constant 0 : i32
    %7 = arith.cmpi ne, %6, %c0_i32_4 : i32
    scf.if %7 {
      %c0_9 = arith.constant 0 : index
      %c0_10 = arith.constant 0 : index
      %14 = vector.load %arg6[%c0_9, %c0_10] : memref<128x2xf32, #tpu.memory_space<vmem>>, vector<128x2xf32>
      tpu.vector_store %arg6[%c0_9, %c0_10], %4 {strides = array<i32>} : memref<128x2xf32, #tpu.memory_space<vmem>>, vector<128x2xf32>,
    } else {
    }
    %c0_i32_5 = arith.constant 0 : i32
    %8 = arith.cmpi ne, %arg2, %c0_i32_5 : i32
    %9 = arith.extui %8 : i1 to i32
    %c0_i32_6 = arith.constant 0 : i32
    %10 = arith.cmpi ne, %9, %c0_i32_6 : i32
    scf.if %10 {
      %c0_9 = arith.constant 0 : index
      %c0_10 = arith.constant 0 : index
      %14 = vector.load %arg6[%c0_9, %c0_10] : memref<128x2xf32, #tpu.memory_space<vmem>>, vector<128x2xf32>
      %15 = arith.addf %14, %4 : vector<128x2xf32>
      %c0_11 = arith.constant 0 : index
      %c0_12 = arith.constant 0 : index
      %16 = vector.load %arg6[%c0_11, %c0_12] : memref<128x2xf32, #tpu.memory_space<vmem>>, vector<128x2xf32>
      tpu.vector_store %arg6[%c0_11, %c0_12], %15 {strides = array<i32>} : memref<128x2xf32, #tpu.memory_space<vmem>>, vector<128x2xf32>,
    } else {
    }
    %c0_i32_7 = arith.constant 0 : i32
    %11 = arith.cmpi eq, %arg2, %c0_i32_7 : i32
    %12 = arith.extui %11 : i1 to i32
    %c0_i32_8 = arith.constant 0 : i32
    %13 = arith.cmpi ne, %12, %c0_i32_8 : i32
    scf.if %13 {
      %c0_9 = arith.constant 0 : index
      %c0_10 = arith.constant 0 : index
      %14 = vector.load %arg6[%c0_9, %c0_10] : memref<128x2xf32, #tpu.memory_space<vmem>>, vector<128x2xf32>
      %15 = arith.truncf %14 : vector<128x2xf32> to vector<128x2xbf16>
      %c0_11 = arith.constant 0 : index
      %c0_12 = arith.constant 0 : index
      %16 = vector.load %arg5[%c0_11, %c0_12] : memref<128x2xbf16, #tpu.memory_space<vmem>>, vector<128x2xbf16>
      tpu.vector_store %arg5[%c0_11, %c0_12], %15 {strides = array<i32>} : memref<128x2xbf16, #tpu.memory_space<vmem>>, vector<128x2xbf16>,
    } else {
    }
    return
  }
  func.func @transform_0(%arg0: i32, %arg1: i32, %arg2: i32) -> (i32, i32) {
    %c0_i32 = arith.constant 0 : i32
    return %arg0, %arg2 : i32, i32
  }
  func.func @transform_1(%arg0: i32, %arg1: i32, %arg2: i32) -> (i32, i32) {
    %c0_i32 = arith.constant 0 : i32
    return %arg2, %arg1 : i32, i32
  }
  func.func @transform_2(%arg0: i32, %arg1: i32, %arg2: i32) -> (i32, i32) {
    %c0_i32 = arith.constant 0 : i32
    return %arg0, %arg1 : i32, i32
  }
}

module attributes {stable_mosaic.version = 11 : i64} {
  func.func @_mm_kernel(%arg0: i32, %arg1: i32, %arg2: i32, %arg3: memref<128x2xbf16, #tpu.memory_space<vmem>>, %arg4: memref<2x8xbf16, #tpu.memory_space<vmem>>, %arg5: memref<128x8xbf16, #tpu.memory_space<vmem>>, %arg6: memref<128x8xbf16, #tpu.memory_space<vmem>>, %arg7: memref<128x8xf32, #tpu.memory_space<vmem>>) attributes {dimension_semantics = [#tpu.dimension_semantics<parallel>, #tpu.dimension_semantics<parallel>, #tpu.dimension_semantics<arbitrary>], iteration_bounds = array<i64: 1, 1, 1>, scalar_prefetch = 0 : i64, scratch_operands = 1 : i64, tpu.core_type = #tpu.core_type<tc>, window_params = [{transform_indices = @transform_0, window_bounds = array<i64: 128, 2>}, {transform_indices = @transform_1, window_bounds = array<i64: 2, 8>}, {transform_indices = @transform_2, window_bounds = array<i64: 128, 8>}, {transform_indices = @transform_3, window_bounds = array<i64: 128, 8>}]} {
    %c0 = arith.constant 0 : index
    %c0_0 = arith.constant 0 : index
    %0 = vector.load %arg3[%c0, %c0_0] : memref<128x2xbf16, #tpu.memory_space<vmem>>, vector<128x2xbf16>
    %c0_1 = arith.constant 0 : index
    %c0_2 = arith.constant 0 : index
    %1 = vector.load %arg4[%c0_1, %c0_2] : memref<2x8xbf16, #tpu.memory_space<vmem>>, vector<2x8xbf16>
    %cst = arith.constant 0.000000e+00 : bf16
    %2 = vector.broadcast %cst : bf16 to vector<128x2xbf16>
    %3 = arith.maximumf %0, %2 : vector<128x2xbf16>
    %cst_3 = arith.constant dense<0.000000e+00> : vector<128x8xf32>
    %4 = tpu.matmul %3, %1, %cst_3 {dimension_numbers = #tpu.dot_dimension_numbers<[1], [0], [0], [1], [0, 0, 1, 1], [], []>} : vector<128x2xbf16>, vector<2x8xbf16>, vector<128x8xf32> -> vector<128x8xf32>
    %c0_i32 = arith.constant 0 : i32
    %5 = arith.cmpi eq, %arg2, %c0_i32 : i32
    %6 = arith.extui %5 : i1 to i32
    %c0_i32_4 = arith.constant 0 : i32
    %7 = arith.cmpi ne, %6, %c0_i32_4 : i32
    scf.if %7 {
      %c0_9 = arith.constant 0 : index
      %c0_10 = arith.constant 0 : index
      %14 = vector.load %arg7[%c0_9, %c0_10] : memref<128x8xf32, #tpu.memory_space<vmem>>, vector<128x8xf32>
      tpu.vector_store %arg7[%c0_9, %c0_10], %4 {strides = array<i32>} : memref<128x8xf32, #tpu.memory_space<vmem>>, vector<128x8xf32>,
    } else {
    }
    %c0_i32_5 = arith.constant 0 : i32
    %8 = arith.cmpi ne, %arg2, %c0_i32_5 : i32
    %9 = arith.extui %8 : i1 to i32
    %c0_i32_6 = arith.constant 0 : i32
    %10 = arith.cmpi ne, %9, %c0_i32_6 : i32
    scf.if %10 {
      %c0_9 = arith.constant 0 : index
      %c0_10 = arith.constant 0 : index
      %14 = vector.load %arg7[%c0_9, %c0_10] : memref<128x8xf32, #tpu.memory_space<vmem>>, vector<128x8xf32>
      %15 = arith.addf %14, %4 : vector<128x8xf32>
      %c0_11 = arith.constant 0 : index
      %c0_12 = arith.constant 0 : index
      %16 = vector.load %arg7[%c0_11, %c0_12] : memref<128x8xf32, #tpu.memory_space<vmem>>, vector<128x8xf32>
      tpu.vector_store %arg7[%c0_11, %c0_12], %15 {strides = array<i32>} : memref<128x8xf32, #tpu.memory_space<vmem>>, vector<128x8xf32>,
    } else {
    }
    %c0_i32_7 = arith.constant 0 : i32
    %11 = arith.cmpi eq, %arg2, %c0_i32_7 : i32
    %12 = arith.extui %11 : i1 to i32
    %c0_i32_8 = arith.constant 0 : i32
    %13 = arith.cmpi ne, %12, %c0_i32_8 : i32
    scf.if %13 {
      %c0_9 = arith.constant 0 : index
      %c0_10 = arith.constant 0 : index
      %14 = vector.load %arg7[%c0_9, %c0_10] : memref<128x8xf32, #tpu.memory_space<vmem>>, vector<128x8xf32>
      %c0_11 = arith.constant 0 : index
      %c0_12 = arith.constant 0 : index
      %15 = vector.load %arg5[%c0_11, %c0_12] : memref<128x8xbf16, #tpu.memory_space<vmem>>, vector<128x8xbf16>
      %16 = arith.extf %15 : vector<128x8xbf16> to vector<128x8xf32>
      %17 = arith.addf %14, %16 : vector<128x8xf32>
      %18 = arith.truncf %17 : vector<128x8xf32> to vector<128x8xbf16>
      %c0_13 = arith.constant 0 : index
      %c0_14 = arith.constant 0 : index
      %19 = vector.load %arg6[%c0_13, %c0_14] : memref<128x8xbf16, #tpu.memory_space<vmem>>, vector<128x8xbf16>
      tpu.vector_store %arg6[%c0_13, %c0_14], %18 {strides = array<i32>} : memref<128x8xbf16, #tpu.memory_space<vmem>>, vector<128x8xbf16>,
    } else {
    }
    return
  }
  func.func @transform_0(%arg0: i32, %arg1: i32, %arg2: i32) -> (i32, i32) {
    %c0_i32 = arith.constant 0 : i32
    return %arg0, %arg2 : i32, i32
  }
  func.func @transform_1(%arg0: i32, %arg1: i32, %arg2: i32) -> (i32, i32) {
    %c0_i32 = arith.constant 0 : i32
    return %arg2, %arg1 : i32, i32
  }
  func.func @transform_2(%arg0: i32, %arg1: i32, %arg2: i32) -> (i32, i32) {
    %c0_i32 = arith.constant 0 : i32
    return %arg0, %arg1 : i32, i32
  }
  func.func @transform_3(%arg0: i32, %arg1: i32, %arg2: i32) -> (i32, i32) {
    %c0_i32 = arith.constant 0 : i32
    return %arg0, %arg1 : i32, i32
  }
}

module attributes {stable_mosaic.version = 11 : i64} {
  func.func @_mm_kernel(%arg0: i32, %arg1: i32, %arg2: i32, %arg3: memref<16x16xbf16, #tpu.memory_space<vmem>>, %arg4: memref<16x64xbf16, #tpu.memory_space<vmem>>, %arg5: memref<16x64xbf16, #tpu.memory_space<vmem>>, %arg6: memref<16x64xf32, #tpu.memory_space<vmem>>) attributes {dimension_semantics = [#tpu.dimension_semantics<parallel>, #tpu.dimension_semantics<parallel>, #tpu.dimension_semantics<arbitrary>], iteration_bounds = array<i64: 1, 1, 1>, scalar_prefetch = 0 : i64, scratch_operands = 1 : i64, tpu.core_type = #tpu.core_type<tc>, window_params = [{transform_indices = @transform_0, window_bounds = array<i64: 16, 16>}, {transform_indices = @transform_1, window_bounds = array<i64: 16, 64>}, {transform_indices = @transform_2, window_bounds = array<i64: 16, 64>}]} {
    %c0 = arith.constant 0 : index
    %c0_0 = arith.constant 0 : index
    %0 = vector.load %arg3[%c0, %c0_0] : memref<16x16xbf16, #tpu.memory_space<vmem>>, vector<16x16xbf16>
    %c0_1 = arith.constant 0 : index
    %c0_2 = arith.constant 0 : index
    %1 = vector.load %arg4[%c0_1, %c0_2] : memref<16x64xbf16, #tpu.memory_space<vmem>>, vector<16x64xbf16>
    %cst = arith.constant dense<0.000000e+00> : vector<16x64xf32>
    %2 = tpu.matmul %0, %1, %cst {dimension_numbers = #tpu.dot_dimension_numbers<[1], [0], [0], [1], [0, 0, 1, 1], [], []>} : vector<16x16xbf16>, vector<16x64xbf16>, vector<16x64xf32> -> vector<16x64xf32>
    %c0_i32 = arith.constant 0 : i32
    %3 = arith.cmpi eq, %arg2, %c0_i32 : i32
    %4 = arith.extui %3 : i1 to i32
    %c0_i32_3 = arith.constant 0 : i32
    %5 = arith.cmpi ne, %4, %c0_i32_3 : i32
    scf.if %5 {
      %c0_8 = arith.constant 0 : index
      %c0_9 = arith.constant 0 : index
      %12 = vector.load %arg6[%c0_8, %c0_9] : memref<16x64xf32, #tpu.memory_space<vmem>>, vector<16x64xf32>
      tpu.vector_store %arg6[%c0_8, %c0_9], %2 {strides = array<i32>} : memref<16x64xf32, #tpu.memory_space<vmem>>, vector<16x64xf32>,
    } else {
    }
    %c0_i32_4 = arith.constant 0 : i32
    %6 = arith.cmpi ne, %arg2, %c0_i32_4 : i32
    %7 = arith.extui %6 : i1 to i32
    %c0_i32_5 = arith.constant 0 : i32
    %8 = arith.cmpi ne, %7, %c0_i32_5 : i32
    scf.if %8 {
      %c0_8 = arith.constant 0 : index
      %c0_9 = arith.constant 0 : index
      %12 = vector.load %arg6[%c0_8, %c0_9] : memref<16x64xf32, #tpu.memory_space<vmem>>, vector<16x64xf32>
      %13 = arith.addf %12, %2 : vector<16x64xf32>
      %c0_10 = arith.constant 0 : index
      %c0_11 = arith.constant 0 : index
      %14 = vector.load %arg6[%c0_10, %c0_11] : memref<16x64xf32, #tpu.memory_space<vmem>>, vector<16x64xf32>
      tpu.vector_store %arg6[%c0_10, %c0_11], %13 {strides = array<i32>} : memref<16x64xf32, #tpu.memory_space<vmem>>, vector<16x64xf32>,
    } else {
    }
    %c0_i32_6 = arith.constant 0 : i32
    %9 = arith.cmpi eq, %arg2, %c0_i32_6 : i32
    %10 = arith.extui %9 : i1 to i32
    %c0_i32_7 = arith.constant 0 : i32
    %11 = arith.cmpi ne, %10, %c0_i32_7 : i32
    scf.if %11 {
      %c0_8 = arith.constant 0 : index
      %c0_9 = arith.constant 0 : index
      %12 = vector.load %arg6[%c0_8, %c0_9] : memref<16x64xf32, #tpu.memory_space<vmem>>, vector<16x64xf32>
      %13 = arith.truncf %12 : vector<16x64xf32> to vector<16x64xbf16>
      %c0_10 = arith.constant 0 : index
      %c0_11 = arith.constant 0 : index
      %14 = vector.load %arg5[%c0_10, %c0_11] : memref<16x64xbf16, #tpu.memory_space<vmem>>, vector<16x64xbf16>
      tpu.vector_store %arg5[%c0_10, %c0_11], %13 {strides = array<i32>} : memref<16x64xbf16, #tpu.memory_space<vmem>>, vector<16x64xbf16>,
    } else {
    }
    return
  }
  func.func @transform_0(%arg0: i32, %arg1: i32, %arg2: i32) -> (i32, i32) {
    %c0_i32 = arith.constant 0 : i32
    return %arg0, %arg2 : i32, i32
  }
  func.func @transform_1(%arg0: i32, %arg1: i32, %arg2: i32) -> (i32, i32) {
    %c0_i32 = arith.constant 0 : i32
    return %arg2, %arg1 : i32, i32
  }
  func.func @transform_2(%arg0: i32, %arg1: i32, %arg2: i32) -> (i32, i32) {
    %c0_i32 = arith.constant 0 : i32
    return %arg0, %arg1 : i32, i32
  }
}

module attributes {stable_mosaic.version = 11 : i64} {
  func.func @_conv3x3_kernel(%arg0: memref<16x142xbf16, #tpu.memory_space<vmem>>, %arg1: memref<9x16x16xbf16, #tpu.memory_space<vmem>>, %arg2: memref<16x120xbf16, #tpu.memory_space<vmem>>, %arg3: memref<16x120xbf16, #tpu.memory_space<vmem>>) attributes {dimension_semantics = [], scalar_prefetch = 0 : i64, scratch_operands = 0 : i64, tpu.core_type = #tpu.core_type<tc>} {
    %c0 = arith.constant 0 : index
    %c0_0 = arith.constant 0 : index
    %0 = vector.load %arg0[%c0, %c0_0] : memref<16x142xbf16, #tpu.memory_space<vmem>>, vector<16x120xbf16>
    %cst = arith.constant 0.000000e+00 : bf16
    %1 = vector.broadcast %cst : bf16 to vector<16x120xbf16>
    %2 = arith.maximumf %0, %1 : vector<16x120xbf16>
    %c0_1 = arith.constant 0 : index
    %c0_2 = arith.constant 0 : index
    %c0_3 = arith.constant 0 : index
    %3 = vector.load %arg1[%c0_1, %c0_2, %c0_3] : memref<9x16x16xbf16, #tpu.memory_space<vmem>>, vector<1x16x16xbf16>
    %4 = vector.shape_cast %3 : vector<1x16x16xbf16> to vector<16x16xbf16>
    %cst_4 = arith.constant dense<0.000000e+00> : vector<16x120xf32>
    %5 = tpu.matmul %4, %2, %cst_4 {dimension_numbers = #tpu.dot_dimension_numbers<[1], [0], [0], [1], [0, 0, 1, 1], [], []>} : vector<16x16xbf16>, vector<16x120xbf16>, vector<16x120xf32> -> vector<16x120xf32>
    %c0_5 = arith.constant 0 : index
    %c1 = arith.constant 1 : index
    %6 = vector.load %arg0[%c0_5, %c1] : memref<16x142xbf16, #tpu.memory_space<vmem>>, vector<16x120xbf16>
    %cst_6 = arith.constant 0.000000e+00 : bf16
    %7 = vector.broadcast %cst_6 : bf16 to vector<16x120xbf16>
    %8 = arith.maximumf %6, %7 : vector<16x120xbf16>
    %c1_7 = arith.constant 1 : index
    %c0_8 = arith.constant 0 : index
    %c0_9 = arith.constant 0 : index
    %9 = vector.load %arg1[%c1_7, %c0_8, %c0_9] : memref<9x16x16xbf16, #tpu.memory_space<vmem>>, vector<1x16x16xbf16>
    %10 = vector.shape_cast %9 : vector<1x16x16xbf16> to vector<16x16xbf16>
    %cst_10 = arith.constant dense<0.000000e+00> : vector<16x120xf32>
    %11 = tpu.matmul %10, %8, %cst_10 {dimension_numbers = #tpu.dot_dimension_numbers<[1], [0], [0], [1], [0, 0, 1, 1], [], []>} : vector<16x16xbf16>, vector<16x120xbf16>, vector<16x120xf32> -> vector<16x120xf32>
    %12 = arith.addf %5, %11 : vector<16x120xf32>
    %c0_11 = arith.constant 0 : index
    %c2 = arith.constant 2 : index
    %13 = vector.load %arg0[%c0_11, %c2] : memref<16x142xbf16, #tpu.memory_space<vmem>>, vector<16x120xbf16>
    %cst_12 = arith.constant 0.000000e+00 : bf16
    %14 = vector.broadcast %cst_12 : bf16 to vector<16x120xbf16>
    %15 = arith.maximumf %13, %14 : vector<16x120xbf16>
    %c2_13 = arith.constant 2 : index
    %c0_14 = arith.constant 0 : index
    %c0_15 = arith.constant 0 : index
    %16 = vector.load %arg1[%c2_13, %c0_14, %c0_15] : memref<9x16x16xbf16, #tpu.memory_space<vmem>>, vector<1x16x16xbf16>
    %17 = vector.shape_cast %16 : vector<1x16x16xbf16> to vector<16x16xbf16>
    %cst_16 = arith.constant dense<0.000000e+00> : vector<16x120xf32>
    %18 = tpu.matmul %17, %15, %cst_16 {dimension_numbers = #tpu.dot_dimension_numbers<[1], [0], [0], [1], [0, 0, 1, 1], [], []>} : vector<16x16xbf16>, vector<16x120xbf16>, vector<16x120xf32> -> vector<16x120xf32>
    %19 = arith.addf %12, %18 : vector<16x120xf32>
    %c0_17 = arith.constant 0 : index
    %c10 = arith.constant 10 : index
    %20 = vector.load %arg0[%c0_17, %c10] : memref<16x142xbf16, #tpu.memory_space<vmem>>, vector<16x120xbf16>
    %cst_18 = arith.constant 0.000000e+00 : bf16
    %21 = vector.broadcast %cst_18 : bf16 to vector<16x120xbf16>
    %22 = arith.maximumf %20, %21 : vector<16x120xbf16>
    %c3 = arith.constant 3 : index
    %c0_19 = arith.constant 0 : index
    %c0_20 = arith.constant 0 : index
    %23 = vector.load %arg1[%c3, %c0_19, %c0_20] : memref<9x16x16xbf16, #tpu.memory_space<vmem>>, vector<1x16x16xbf16>
    %24 = vector.shape_cast %23 : vector<1x16x16xbf16> to vector<16x16xbf16>
    %cst_21 = arith.constant dense<0.000000e+00> : vector<16x120xf32>
    %25 = tpu.matmul %24, %22, %cst_21 {dimension_numbers = #tpu.dot_dimension_numbers<[1], [0], [0], [1], [0, 0, 1, 1], [], []>} : vector<16x16xbf16>, vector<16x120xbf16>, vector<16x120xf32> -> vector<16x120xf32>
    %26 = arith.addf %19, %25 : vector<16x120xf32>
    %c0_22 = arith.constant 0 : index
    %c11 = arith.constant 11 : index
    %27 = vector.load %arg0[%c0_22, %c11] : memref<16x142xbf16, #tpu.memory_space<vmem>>, vector<16x120xbf16>
    %cst_23 = arith.constant 0.000000e+00 : bf16
    %28 = vector.broadcast %cst_23 : bf16 to vector<16x120xbf16>
    %29 = arith.maximumf %27, %28 : vector<16x120xbf16>
    %c4 = arith.constant 4 : index
    %c0_24 = arith.constant 0 : index
    %c0_25 = arith.constant 0 : index
    %30 = vector.load %arg1[%c4, %c0_24, %c0_25] : memref<9x16x16xbf16, #tpu.memory_space<vmem>>, vector<1x16x16xbf16>
    %31 = vector.shape_cast %30 : vector<1x16x16xbf16> to vector<16x16xbf16>
    %cst_26 = arith.constant dense<0.000000e+00> : vector<16x120xf32>
    %32 = tpu.matmul %31, %29, %cst_26 {dimension_numbers = #tpu.dot_dimension_numbers<[1], [0], [0], [1], [0, 0, 1, 1], [], []>} : vector<16x16xbf16>, vector<16x120xbf16>, vector<16x120xf32> -> vector<16x120xf32>
    %33 = arith.addf %26, %32 : vector<16x120xf32>
    %c0_27 = arith.constant 0 : index
    %c12 = arith.constant 12 : index
    %34 = vector.load %arg0[%c0_27, %c12] : memref<16x142xbf16, #tpu.memory_space<vmem>>, vector<16x120xbf16>
    %cst_28 = arith.constant 0.000000e+00 : bf16
    %35 = vector.broadcast %cst_28 : bf16 to vector<16x120xbf16>
    %36 = arith.maximumf %34, %35 : vector<16x120xbf16>
    %c5 = arith.constant 5 : index
    %c0_29 = arith.constant 0 : index
    %c0_30 = arith.constant 0 : index
    %37 = vector.load %arg1[%c5, %c0_29, %c0_30] : memref<9x16x16xbf16, #tpu.memory_space<vmem>>, vector<1x16x16xbf16>
    %38 = vector.shape_cast %37 : vector<1x16x16xbf16> to vector<16x16xbf16>
    %cst_31 = arith.constant dense<0.000000e+00> : vector<16x120xf32>
    %39 = tpu.matmul %38, %36, %cst_31 {dimension_numbers = #tpu.dot_dimension_numbers<[1], [0], [0], [1], [0, 0, 1, 1], [], []>} : vector<16x16xbf16>, vector<16x120xbf16>, vector<16x120xf32> -> vector<16x120xf32>
    %40 = arith.addf %33, %39 : vector<16x120xf32>
    %c0_32 = arith.constant 0 : index
    %c20 = arith.constant 20 : index
    %41 = vector.load %arg0[%c0_32, %c20] : memref<16x142xbf16, #tpu.memory_space<vmem>>, vector<16x120xbf16>
    %cst_33 = arith.constant 0.000000e+00 : bf16
    %42 = vector.broadcast %cst_33 : bf16 to vector<16x120xbf16>
    %43 = arith.maximumf %41, %42 : vector<16x120xbf16>
    %c6 = arith.constant 6 : index
    %c0_34 = arith.constant 0 : index
    %c0_35 = arith.constant 0 : index
    %44 = vector.load %arg1[%c6, %c0_34, %c0_35] : memref<9x16x16xbf16, #tpu.memory_space<vmem>>, vector<1x16x16xbf16>
    %45 = vector.shape_cast %44 : vector<1x16x16xbf16> to vector<16x16xbf16>
    %cst_36 = arith.constant dense<0.000000e+00> : vector<16x120xf32>
    %46 = tpu.matmul %45, %43, %cst_36 {dimension_numbers = #tpu.dot_dimension_numbers<[1], [0], [0], [1], [0, 0, 1, 1], [], []>} : vector<16x16xbf16>, vector<16x120xbf16>, vector<16x120xf32> -> vector<16x120xf32>
    %47 = arith.addf %40, %46 : vector<16x120xf32>
    %c0_37 = arith.constant 0 : index
    %c21 = arith.constant 21 : index
    %48 = vector.load %arg0[%c0_37, %c21] : memref<16x142xbf16, #tpu.memory_space<vmem>>, vector<16x120xbf16>
    %cst_38 = arith.constant 0.000000e+00 : bf16
    %49 = vector.broadcast %cst_38 : bf16 to vector<16x120xbf16>
    %50 = arith.maximumf %48, %49 : vector<16x120xbf16>
    %c7 = arith.constant 7 : index
    %c0_39 = arith.constant 0 : index
    %c0_40 = arith.constant 0 : index
    %51 = vector.load %arg1[%c7, %c0_39, %c0_40] : memref<9x16x16xbf16, #tpu.memory_space<vmem>>, vector<1x16x16xbf16>
    %52 = vector.shape_cast %51 : vector<1x16x16xbf16> to vector<16x16xbf16>
    %cst_41 = arith.constant dense<0.000000e+00> : vector<16x120xf32>
    %53 = tpu.matmul %52, %50, %cst_41 {dimension_numbers = #tpu.dot_dimension_numbers<[1], [0], [0], [1], [0, 0, 1, 1], [], []>} : vector<16x16xbf16>, vector<16x120xbf16>, vector<16x120xf32> -> vector<16x120xf32>
    %54 = arith.addf %47, %53 : vector<16x120xf32>
    %c0_42 = arith.constant 0 : index
    %c22 = arith.constant 22 : index
    %55 = vector.load %arg0[%c0_42, %c22] : memref<16x142xbf16, #tpu.memory_space<vmem>>, vector<16x120xbf16>
    %cst_43 = arith.constant 0.000000e+00 : bf16
    %56 = vector.broadcast %cst_43 : bf16 to vector<16x120xbf16>
    %57 = arith.maximumf %55, %56 : vector<16x120xbf16>
    %c8 = arith.constant 8 : index
    %c0_44 = arith.constant 0 : index
    %c0_45 = arith.constant 0 : index
    %58 = vector.load %arg1[%c8, %c0_44, %c0_45] : memref<9x16x16xbf16, #tpu.memory_space<vmem>>, vector<1x16x16xbf16>
    %59 = vector.shape_cast %58 : vector<1x16x16xbf16> to vector<16x16xbf16>
    %cst_46 = arith.constant dense<0.000000e+00> : vector<16x120xf32>
    %60 = tpu.matmul %59, %57, %cst_46 {dimension_numbers = #tpu.dot_dimension_numbers<[1], [0], [0], [1], [0, 0, 1, 1], [], []>} : vector<16x16xbf16>, vector<16x120xbf16>, vector<16x120xf32> -> vector<16x120xf32>
    %61 = arith.addf %54, %60 : vector<16x120xf32>
    %c0_47 = arith.constant 0 : index
    %c0_48 = arith.constant 0 : index
    %62 = vector.load %arg2[%c0_47, %c0_48] : memref<16x120xbf16, #tpu.memory_space<vmem>>, vector<16x120xbf16>
    %63 = arith.extf %62 : vector<16x120xbf16> to vector<16x120xf32>
    %64 = arith.addf %61, %63 : vector<16x120xf32>
    %65 = arith.truncf %64 : vector<16x120xf32> to vector<16x120xbf16>
    %c0_49 = arith.constant 0 : index
    %c0_50 = arith.constant 0 : index
    %66 = vector.load %arg3[%c0_49, %c0_50] : memref<16x120xbf16, #tpu.memory_space<vmem>>, vector<16x120xbf16>
    tpu.vector_store %arg3[%c0_49, %c0_50], %65 {strides = array<i32>} : memref<16x120xbf16, #tpu.memory_space<vmem>>, vector<16x120xbf16>,
    return
  }
}

module attributes {stable_mosaic.version = 11 : i64} {
  func.func @_mm_kernel(%arg0: i32, %arg1: i32, %arg2: i32, %arg3: memref<32x16xbf16, #tpu.memory_space<vmem>>, %arg4: memref<16x64xbf16, #tpu.memory_space<vmem>>, %arg5: memref<32x64xbf16, #tpu.memory_space<vmem>>, %arg6: memref<32x64xf32, #tpu.memory_space<vmem>>) attributes {dimension_semantics = [#tpu.dimension_semantics<parallel>, #tpu.dimension_semantics<parallel>, #tpu.dimension_semantics<arbitrary>], iteration_bounds = array<i64: 1, 1, 1>, scalar_prefetch = 0 : i64, scratch_operands = 1 : i64, tpu.core_type = #tpu.core_type<tc>, window_params = [{transform_indices = @transform_0, window_bounds = array<i64: 32, 16>}, {transform_indices = @transform_1, window_bounds = array<i64: 16, 64>}, {transform_indices = @transform_2, window_bounds = array<i64: 32, 64>}]} {
    %c0 = arith.constant 0 : index
    %c0_0 = arith.constant 0 : index
    %0 = vector.load %arg3[%c0, %c0_0] : memref<32x16xbf16, #tpu.memory_space<vmem>>, vector<32x16xbf16>
    %c0_1 = arith.constant 0 : index
    %c0_2 = arith.constant 0 : index
    %1 = vector.load %arg4[%c0_1, %c0_2] : memref<16x64xbf16, #tpu.memory_space<vmem>>, vector<16x64xbf16>
    %cst = arith.constant 0.000000e+00 : bf16
    %2 = vector.broadcast %cst : bf16 to vector<16x64xbf16>
    %3 = arith.maximumf %1, %2 : vector<16x64xbf16>
    %cst_3 = arith.constant dense<0.000000e+00> : vector<32x64xf32>
    %4 = tpu.matmul %0, %3, %cst_3 {dimension_numbers = #tpu.dot_dimension_numbers<[1], [0], [0], [1], [0, 0, 1, 1], [], []>} : vector<32x16xbf16>, vector<16x64xbf16>, vector<32x64xf32> -> vector<32x64xf32>
    %c0_i32 = arith.constant 0 : i32
    %5 = arith.cmpi eq, %arg2, %c0_i32 : i32
    %6 = arith.extui %5 : i1 to i32
    %c0_i32_4 = arith.constant 0 : i32
    %7 = arith.cmpi ne, %6, %c0_i32_4 : i32
    scf.if %7 {
      %c0_9 = arith.constant 0 : index
      %c0_10 = arith.constant 0 : index
      %14 = vector.load %arg6[%c0_9, %c0_10] : memref<32x64xf32, #tpu.memory_space<vmem>>, vector<32x64xf32>
      tpu.vector_store %arg6[%c0_9, %c0_10], %4 {strides = array<i32>} : memref<32x64xf32, #tpu.memory_space<vmem>>, vector<32x64xf32>,
    } else {
    }
    %c0_i32_5 = arith.constant 0 : i32
    %8 = arith.cmpi ne, %arg2, %c0_i32_5 : i32
    %9 = arith.extui %8 : i1 to i32
    %c0_i32_6 = arith.constant 0 : i32
    %10 = arith.cmpi ne, %9, %c0_i32_6 : i32
    scf.if %10 {
      %c0_9 = arith.constant 0 : index
      %c0_10 = arith.constant 0 : index
      %14 = vector.load %arg6[%c0_9, %c0_10] : memref<32x64xf32, #tpu.memory_space<vmem>>, vector<32x64xf32>
      %15 = arith.addf %14, %4 : vector<32x64xf32>
      %c0_11 = arith.constant 0 : index
      %c0_12 = arith.constant 0 : index
      %16 = vector.load %arg6[%c0_11, %c0_12] : memref<32x64xf32, #tpu.memory_space<vmem>>, vector<32x64xf32>
      tpu.vector_store %arg6[%c0_11, %c0_12], %15 {strides = array<i32>} : memref<32x64xf32, #tpu.memory_space<vmem>>, vector<32x64xf32>,
    } else {
    }
    %c0_i32_7 = arith.constant 0 : i32
    %11 = arith.cmpi eq, %arg2, %c0_i32_7 : i32
    %12 = arith.extui %11 : i1 to i32
    %c0_i32_8 = arith.constant 0 : i32
    %13 = arith.cmpi ne, %12, %c0_i32_8 : i32
    scf.if %13 {
      %c0_9 = arith.constant 0 : index
      %c0_10 = arith.constant 0 : index
      %14 = vector.load %arg6[%c0_9, %c0_10] : memref<32x64xf32, #tpu.memory_space<vmem>>, vector<32x64xf32>
      %15 = arith.truncf %14 : vector<32x64xf32> to vector<32x64xbf16>
      %c0_11 = arith.constant 0 : index
      %c0_12 = arith.constant 0 : index
      %16 = vector.load %arg5[%c0_11, %c0_12] : memref<32x64xbf16, #tpu.memory_space<vmem>>, vector<32x64xbf16>
      tpu.vector_store %arg5[%c0_11, %c0_12], %15 {strides = array<i32>} : memref<32x64xbf16, #tpu.memory_space<vmem>>, vector<32x64xbf16>,
    } else {
    }
    return
  }
  func.func @transform_0(%arg0: i32, %arg1: i32, %arg2: i32) -> (i32, i32) {
    %c0_i32 = arith.constant 0 : i32
    return %arg0, %arg2 : i32, i32
  }
  func.func @transform_1(%arg0: i32, %arg1: i32, %arg2: i32) -> (i32, i32) {
    %c0_i32 = arith.constant 0 : i32
    return %arg2, %arg1 : i32, i32
  }
  func.func @transform_2(%arg0: i32, %arg1: i32, %arg2: i32) -> (i32, i32) {
    %c0_i32 = arith.constant 0 : i32
    return %arg0, %arg1 : i32, i32
  }
}

module attributes {stable_mosaic.version = 11 : i64} {
  func.func @_mm_kernel(%arg0: i32, %arg1: i32, %arg2: i32, %arg3: memref<8x16xbf16, #tpu.memory_space<vmem>>, %arg4: memref<16x256xbf16, #tpu.memory_space<vmem>>, %arg5: memref<8x256xbf16, #tpu.memory_space<vmem>>, %arg6: memref<8x256xf32, #tpu.memory_space<vmem>>) attributes {dimension_semantics = [#tpu.dimension_semantics<parallel>, #tpu.dimension_semantics<parallel>, #tpu.dimension_semantics<arbitrary>], iteration_bounds = array<i64: 1, 1, 1>, scalar_prefetch = 0 : i64, scratch_operands = 1 : i64, tpu.core_type = #tpu.core_type<tc>, window_params = [{transform_indices = @transform_0, window_bounds = array<i64: 8, 16>}, {transform_indices = @transform_1, window_bounds = array<i64: 16, 256>}, {transform_indices = @transform_2, window_bounds = array<i64: 8, 256>}]} {
    %c0 = arith.constant 0 : index
    %c0_0 = arith.constant 0 : index
    %0 = vector.load %arg3[%c0, %c0_0] : memref<8x16xbf16, #tpu.memory_space<vmem>>, vector<8x16xbf16>
    %c0_1 = arith.constant 0 : index
    %c0_2 = arith.constant 0 : index
    %1 = vector.load %arg4[%c0_1, %c0_2] : memref<16x256xbf16, #tpu.memory_space<vmem>>, vector<16x256xbf16>
    %cst = arith.constant dense<0.000000e+00> : vector<8x256xf32>
    %2 = tpu.matmul %0, %1, %cst {dimension_numbers = #tpu.dot_dimension_numbers<[1], [0], [0], [1], [0, 0, 1, 1], [], []>} : vector<8x16xbf16>, vector<16x256xbf16>, vector<8x256xf32> -> vector<8x256xf32>
    %c0_i32 = arith.constant 0 : i32
    %3 = arith.cmpi eq, %arg2, %c0_i32 : i32
    %4 = arith.extui %3 : i1 to i32
    %c0_i32_3 = arith.constant 0 : i32
    %5 = arith.cmpi ne, %4, %c0_i32_3 : i32
    scf.if %5 {
      %c0_8 = arith.constant 0 : index
      %c0_9 = arith.constant 0 : index
      %12 = vector.load %arg6[%c0_8, %c0_9] : memref<8x256xf32, #tpu.memory_space<vmem>>, vector<8x256xf32>
      tpu.vector_store %arg6[%c0_8, %c0_9], %2 {strides = array<i32>} : memref<8x256xf32, #tpu.memory_space<vmem>>, vector<8x256xf32>,
    } else {
    }
    %c0_i32_4 = arith.constant 0 : i32
    %6 = arith.cmpi ne, %arg2, %c0_i32_4 : i32
    %7 = arith.extui %6 : i1 to i32
    %c0_i32_5 = arith.constant 0 : i32
    %8 = arith.cmpi ne, %7, %c0_i32_5 : i32
    scf.if %8 {
      %c0_8 = arith.constant 0 : index
      %c0_9 = arith.constant 0 : index
      %12 = vector.load %arg6[%c0_8, %c0_9] : memref<8x256xf32, #tpu.memory_space<vmem>>, vector<8x256xf32>
      %13 = arith.addf %12, %2 : vector<8x256xf32>
      %c0_10 = arith.constant 0 : index
      %c0_11 = arith.constant 0 : index
      %14 = vector.load %arg6[%c0_10, %c0_11] : memref<8x256xf32, #tpu.memory_space<vmem>>, vector<8x256xf32>
      tpu.vector_store %arg6[%c0_10, %c0_11], %13 {strides = array<i32>} : memref<8x256xf32, #tpu.memory_space<vmem>>, vector<8x256xf32>,
    } else {
    }
    %c0_i32_6 = arith.constant 0 : i32
    %9 = arith.cmpi eq, %arg2, %c0_i32_6 : i32
    %10 = arith.extui %9 : i1 to i32
    %c0_i32_7 = arith.constant 0 : i32
    %11 = arith.cmpi ne, %10, %c0_i32_7 : i32
    scf.if %11 {
      %c0_8 = arith.constant 0 : index
      %c0_9 = arith.constant 0 : index
      %12 = vector.load %arg6[%c0_8, %c0_9] : memref<8x256xf32, #tpu.memory_space<vmem>>, vector<8x256xf32>
      %13 = arith.truncf %12 : vector<8x256xf32> to vector<8x256xbf16>
      %c0_10 = arith.constant 0 : index
      %c0_11 = arith.constant 0 : index
      %14 = vector.load %arg5[%c0_10, %c0_11] : memref<8x256xbf16, #tpu.memory_space<vmem>>, vector<8x256xbf16>
      tpu.vector_store %arg5[%c0_10, %c0_11], %13 {strides = array<i32>} : memref<8x256xbf16, #tpu.memory_space<vmem>>, vector<8x256xbf16>,
    } else {
    }
    return
  }
  func.func @transform_0(%arg0: i32, %arg1: i32, %arg2: i32) -> (i32, i32) {
    %c0_i32 = arith.constant 0 : i32
    return %arg0, %arg2 : i32, i32
  }
  func.func @transform_1(%arg0: i32, %arg1: i32, %arg2: i32) -> (i32, i32) {
    %c0_i32 = arith.constant 0 : i32
    return %arg2, %arg1 : i32, i32
  }
  func.func @transform_2(%arg0: i32, %arg1: i32, %arg2: i32) -> (i32, i32) {
    %c0_i32 = arith.constant 0 : i32
    return %arg0, %arg1 : i32, i32
  }
}

module attributes {stable_mosaic.version = 11 : i64} {
  func.func @_conv3x3_kernel(%arg0: memref<16x398xbf16, #tpu.memory_space<vmem>>, %arg1: memref<9x8x16xbf16, #tpu.memory_space<vmem>>, %arg2: memref<8x360xbf16, #tpu.memory_space<vmem>>) attributes {dimension_semantics = [], scalar_prefetch = 0 : i64, scratch_operands = 0 : i64, tpu.core_type = #tpu.core_type<tc>} {
    %c0 = arith.constant 0 : index
    %c0_0 = arith.constant 0 : index
    %0 = vector.load %arg0[%c0, %c0_0] : memref<16x398xbf16, #tpu.memory_space<vmem>>, vector<16x360xbf16>
    %cst = arith.constant 0.000000e+00 : bf16
    %1 = vector.broadcast %cst : bf16 to vector<16x360xbf16>
    %2 = arith.maximumf %0, %1 : vector<16x360xbf16>
    %c0_1 = arith.constant 0 : index
    %c0_2 = arith.constant 0 : index
    %c0_3 = arith.constant 0 : index
    %3 = vector.load %arg1[%c0_1, %c0_2, %c0_3] : memref<9x8x16xbf16, #tpu.memory_space<vmem>>, vector<1x8x16xbf16>
    %4 = vector.shape_cast %3 : vector<1x8x16xbf16> to vector<8x16xbf16>
    %cst_4 = arith.constant dense<0.000000e+00> : vector<8x360xf32>
    %5 = tpu.matmul %4, %2, %cst_4 {dimension_numbers = #tpu.dot_dimension_numbers<[1], [0], [0], [1], [0, 0, 1, 1], [], []>} : vector<8x16xbf16>, vector<16x360xbf16>, vector<8x360xf32> -> vector<8x360xf32>
    %c0_5 = arith.constant 0 : index
    %c1 = arith.constant 1 : index
    %6 = vector.load %arg0[%c0_5, %c1] : memref<16x398xbf16, #tpu.memory_space<vmem>>, vector<16x360xbf16>
    %cst_6 = arith.constant 0.000000e+00 : bf16
    %7 = vector.broadcast %cst_6 : bf16 to vector<16x360xbf16>
    %8 = arith.maximumf %6, %7 : vector<16x360xbf16>
    %c1_7 = arith.constant 1 : index
    %c0_8 = arith.constant 0 : index
    %c0_9 = arith.constant 0 : index
    %9 = vector.load %arg1[%c1_7, %c0_8, %c0_9] : memref<9x8x16xbf16, #tpu.memory_space<vmem>>, vector<1x8x16xbf16>
    %10 = vector.shape_cast %9 : vector<1x8x16xbf16> to vector<8x16xbf16>
    %cst_10 = arith.constant dense<0.000000e+00> : vector<8x360xf32>
    %11 = tpu.matmul %10, %8, %cst_10 {dimension_numbers = #tpu.dot_dimension_numbers<[1], [0], [0], [1], [0, 0, 1, 1], [], []>} : vector<8x16xbf16>, vector<16x360xbf16>, vector<8x360xf32> -> vector<8x360xf32>
    %12 = arith.addf %5, %11 : vector<8x360xf32>
    %c0_11 = arith.constant 0 : index
    %c2 = arith.constant 2 : index
    %13 = vector.load %arg0[%c0_11, %c2] : memref<16x398xbf16, #tpu.memory_space<vmem>>, vector<16x360xbf16>
    %cst_12 = arith.constant 0.000000e+00 : bf16
    %14 = vector.broadcast %cst_12 : bf16 to vector<16x360xbf16>
    %15 = arith.maximumf %13, %14 : vector<16x360xbf16>
    %c2_13 = arith.constant 2 : index
    %c0_14 = arith.constant 0 : index
    %c0_15 = arith.constant 0 : index
    %16 = vector.load %arg1[%c2_13, %c0_14, %c0_15] : memref<9x8x16xbf16, #tpu.memory_space<vmem>>, vector<1x8x16xbf16>
    %17 = vector.shape_cast %16 : vector<1x8x16xbf16> to vector<8x16xbf16>
    %cst_16 = arith.constant dense<0.000000e+00> : vector<8x360xf32>
    %18 = tpu.matmul %17, %15, %cst_16 {dimension_numbers = #tpu.dot_dimension_numbers<[1], [0], [0], [1], [0, 0, 1, 1], [], []>} : vector<8x16xbf16>, vector<16x360xbf16>, vector<8x360xf32> -> vector<8x360xf32>
    %19 = arith.addf %12, %18 : vector<8x360xf32>
    %c0_17 = arith.constant 0 : index
    %c18 = arith.constant 18 : index
    %20 = vector.load %arg0[%c0_17, %c18] : memref<16x398xbf16, #tpu.memory_space<vmem>>, vector<16x360xbf16>
    %cst_18 = arith.constant 0.000000e+00 : bf16
    %21 = vector.broadcast %cst_18 : bf16 to vector<16x360xbf16>
    %22 = arith.maximumf %20, %21 : vector<16x360xbf16>
    %c3 = arith.constant 3 : index
    %c0_19 = arith.constant 0 : index
    %c0_20 = arith.constant 0 : index
    %23 = vector.load %arg1[%c3, %c0_19, %c0_20] : memref<9x8x16xbf16, #tpu.memory_space<vmem>>, vector<1x8x16xbf16>
    %24 = vector.shape_cast %23 : vector<1x8x16xbf16> to vector<8x16xbf16>
    %cst_21 = arith.constant dense<0.000000e+00> : vector<8x360xf32>
    %25 = tpu.matmul %24, %22, %cst_21 {dimension_numbers = #tpu.dot_dimension_numbers<[1], [0], [0], [1], [0, 0, 1, 1], [], []>} : vector<8x16xbf16>, vector<16x360xbf16>, vector<8x360xf32> -> vector<8x360xf32>
    %26 = arith.addf %19, %25 : vector<8x360xf32>
    %c0_22 = arith.constant 0 : index
    %c19 = arith.constant 19 : index
    %27 = vector.load %arg0[%c0_22, %c19] : memref<16x398xbf16, #tpu.memory_space<vmem>>, vector<16x360xbf16>
    %cst_23 = arith.constant 0.000000e+00 : bf16
    %28 = vector.broadcast %cst_23 : bf16 to vector<16x360xbf16>
    %29 = arith.maximumf %27, %28 : vector<16x360xbf16>
    %c4 = arith.constant 4 : index
    %c0_24 = arith.constant 0 : index
    %c0_25 = arith.constant 0 : index
    %30 = vector.load %arg1[%c4, %c0_24, %c0_25] : memref<9x8x16xbf16, #tpu.memory_space<vmem>>, vector<1x8x16xbf16>
    %31 = vector.shape_cast %30 : vector<1x8x16xbf16> to vector<8x16xbf16>
    %cst_26 = arith.constant dense<0.000000e+00> : vector<8x360xf32>
    %32 = tpu.matmul %31, %29, %cst_26 {dimension_numbers = #tpu.dot_dimension_numbers<[1], [0], [0], [1], [0, 0, 1, 1], [], []>} : vector<8x16xbf16>, vector<16x360xbf16>, vector<8x360xf32> -> vector<8x360xf32>
    %33 = arith.addf %26, %32 : vector<8x360xf32>
    %c0_27 = arith.constant 0 : index
    %c20 = arith.constant 20 : index
    %34 = vector.load %arg0[%c0_27, %c20] : memref<16x398xbf16, #tpu.memory_space<vmem>>, vector<16x360xbf16>
    %cst_28 = arith.constant 0.000000e+00 : bf16
    %35 = vector.broadcast %cst_28 : bf16 to vector<16x360xbf16>
    %36 = arith.maximumf %34, %35 : vector<16x360xbf16>
    %c5 = arith.constant 5 : index
    %c0_29 = arith.constant 0 : index
    %c0_30 = arith.constant 0 : index
    %37 = vector.load %arg1[%c5, %c0_29, %c0_30] : memref<9x8x16xbf16, #tpu.memory_space<vmem>>, vector<1x8x16xbf16>
    %38 = vector.shape_cast %37 : vector<1x8x16xbf16> to vector<8x16xbf16>
    %cst_31 = arith.constant dense<0.000000e+00> : vector<8x360xf32>
    %39 = tpu.matmul %38, %36, %cst_31 {dimension_numbers = #tpu.dot_dimension_numbers<[1], [0], [0], [1], [0, 0, 1, 1], [], []>} : vector<8x16xbf16>, vector<16x360xbf16>, vector<8x360xf32> -> vector<8x360xf32>
    %40 = arith.addf %33, %39 : vector<8x360xf32>
    %c0_32 = arith.constant 0 : index
    %c36 = arith.constant 36 : index
    %41 = vector.load %arg0[%c0_32, %c36] : memref<16x398xbf16, #tpu.memory_space<vmem>>, vector<16x360xbf16>
    %cst_33 = arith.constant 0.000000e+00 : bf16
    %42 = vector.broadcast %cst_33 : bf16 to vector<16x360xbf16>
    %43 = arith.maximumf %41, %42 : vector<16x360xbf16>
    %c6 = arith.constant 6 : index
    %c0_34 = arith.constant 0 : index
    %c0_35 = arith.constant 0 : index
    %44 = vector.load %arg1[%c6, %c0_34, %c0_35] : memref<9x8x16xbf16, #tpu.memory_space<vmem>>, vector<1x8x16xbf16>
    %45 = vector.shape_cast %44 : vector<1x8x16xbf16> to vector<8x16xbf16>
    %cst_36 = arith.constant dense<0.000000e+00> : vector<8x360xf32>
    %46 = tpu.matmul %45, %43, %cst_36 {dimension_numbers = #tpu.dot_dimension_numbers<[1], [0], [0], [1], [0, 0, 1, 1], [], []>} : vector<8x16xbf16>, vector<16x360xbf16>, vector<8x360xf32> -> vector<8x360xf32>
    %47 = arith.addf %40, %46 : vector<8x360xf32>
    %c0_37 = arith.constant 0 : index
    %c37 = arith.constant 37 : index
    %48 = vector.load %arg0[%c0_37, %c37] : memref<16x398xbf16, #tpu.memory_space<vmem>>, vector<16x360xbf16>
    %cst_38 = arith.constant 0.000000e+00 : bf16
    %49 = vector.broadcast %cst_38 : bf16 to vector<16x360xbf16>
    %50 = arith.maximumf %48, %49 : vector<16x360xbf16>
    %c7 = arith.constant 7 : index
    %c0_39 = arith.constant 0 : index
    %c0_40 = arith.constant 0 : index
    %51 = vector.load %arg1[%c7, %c0_39, %c0_40] : memref<9x8x16xbf16, #tpu.memory_space<vmem>>, vector<1x8x16xbf16>
    %52 = vector.shape_cast %51 : vector<1x8x16xbf16> to vector<8x16xbf16>
    %cst_41 = arith.constant dense<0.000000e+00> : vector<8x360xf32>
    %53 = tpu.matmul %52, %50, %cst_41 {dimension_numbers = #tpu.dot_dimension_numbers<[1], [0], [0], [1], [0, 0, 1, 1], [], []>} : vector<8x16xbf16>, vector<16x360xbf16>, vector<8x360xf32> -> vector<8x360xf32>
    %54 = arith.addf %47, %53 : vector<8x360xf32>
    %c0_42 = arith.constant 0 : index
    %c38 = arith.constant 38 : index
    %55 = vector.load %arg0[%c0_42, %c38] : memref<16x398xbf16, #tpu.memory_space<vmem>>, vector<16x360xbf16>
    %cst_43 = arith.constant 0.000000e+00 : bf16
    %56 = vector.broadcast %cst_43 : bf16 to vector<16x360xbf16>
    %57 = arith.maximumf %55, %56 : vector<16x360xbf16>
    %c8 = arith.constant 8 : index
    %c0_44 = arith.constant 0 : index
    %c0_45 = arith.constant 0 : index
    %58 = vector.load %arg1[%c8, %c0_44, %c0_45] : memref<9x8x16xbf16, #tpu.memory_space<vmem>>, vector<1x8x16xbf16>
    %59 = vector.shape_cast %58 : vector<1x8x16xbf16> to vector<8x16xbf16>
    %cst_46 = arith.constant dense<0.000000e+00> : vector<8x360xf32>
    %60 = tpu.matmul %59, %57, %cst_46 {dimension_numbers = #tpu.dot_dimension_numbers<[1], [0], [0], [1], [0, 0, 1, 1], [], []>} : vector<8x16xbf16>, vector<16x360xbf16>, vector<8x360xf32> -> vector<8x360xf32>
    %61 = arith.addf %54, %60 : vector<8x360xf32>
    %62 = arith.truncf %61 : vector<8x360xf32> to vector<8x360xbf16>
    %c0_47 = arith.constant 0 : index
    %c0_48 = arith.constant 0 : index
    %63 = vector.load %arg2[%c0_47, %c0_48] : memref<8x360xbf16, #tpu.memory_space<vmem>>, vector<8x360xbf16>
    tpu.vector_store %arg2[%c0_47, %c0_48], %62 {strides = array<i32>} : memref<8x360xbf16, #tpu.memory_space<vmem>>, vector<8x360xbf16>,
    return
  }
}

module attributes {stable_mosaic.version = 11 : i64} {
  func.func @_conv3x3_kernel(%arg0: memref<8x398xbf16, #tpu.memory_space<vmem>>, %arg1: memref<9x8x8xbf16, #tpu.memory_space<vmem>>, %arg2: memref<8x360xbf16, #tpu.memory_space<vmem>>, %arg3: memref<8x360xbf16, #tpu.memory_space<vmem>>, %arg4: memref<8x360xbf16, #tpu.memory_space<vmem>>) attributes {dimension_semantics = [], scalar_prefetch = 0 : i64, scratch_operands = 0 : i64, tpu.core_type = #tpu.core_type<tc>} {
    %c0 = arith.constant 0 : index
    %c0_0 = arith.constant 0 : index
    %0 = vector.load %arg0[%c0, %c0_0] : memref<8x398xbf16, #tpu.memory_space<vmem>>, vector<8x360xbf16>
    %cst = arith.constant 0.000000e+00 : bf16
    %1 = vector.broadcast %cst : bf16 to vector<8x360xbf16>
    %2 = arith.maximumf %0, %1 : vector<8x360xbf16>
    %c0_1 = arith.constant 0 : index
    %c0_2 = arith.constant 0 : index
    %c0_3 = arith.constant 0 : index
    %3 = vector.load %arg1[%c0_1, %c0_2, %c0_3] : memref<9x8x8xbf16, #tpu.memory_space<vmem>>, vector<1x8x8xbf16>
    %4 = vector.shape_cast %3 : vector<1x8x8xbf16> to vector<8x8xbf16>
    %cst_4 = arith.constant dense<0.000000e+00> : vector<8x360xf32>
    %5 = tpu.matmul %4, %2, %cst_4 {dimension_numbers = #tpu.dot_dimension_numbers<[1], [0], [0], [1], [0, 0, 1, 1], [], []>} : vector<8x8xbf16>, vector<8x360xbf16>, vector<8x360xf32> -> vector<8x360xf32>
    %c0_5 = arith.constant 0 : index
    %c1 = arith.constant 1 : index
    %6 = vector.load %arg0[%c0_5, %c1] : memref<8x398xbf16, #tpu.memory_space<vmem>>, vector<8x360xbf16>
    %cst_6 = arith.constant 0.000000e+00 : bf16
    %7 = vector.broadcast %cst_6 : bf16 to vector<8x360xbf16>
    %8 = arith.maximumf %6, %7 : vector<8x360xbf16>
    %c1_7 = arith.constant 1 : index
    %c0_8 = arith.constant 0 : index
    %c0_9 = arith.constant 0 : index
    %9 = vector.load %arg1[%c1_7, %c0_8, %c0_9] : memref<9x8x8xbf16, #tpu.memory_space<vmem>>, vector<1x8x8xbf16>
    %10 = vector.shape_cast %9 : vector<1x8x8xbf16> to vector<8x8xbf16>
    %cst_10 = arith.constant dense<0.000000e+00> : vector<8x360xf32>
    %11 = tpu.matmul %10, %8, %cst_10 {dimension_numbers = #tpu.dot_dimension_numbers<[1], [0], [0], [1], [0, 0, 1, 1], [], []>} : vector<8x8xbf16>, vector<8x360xbf16>, vector<8x360xf32> -> vector<8x360xf32>
    %12 = arith.addf %5, %11 : vector<8x360xf32>
    %c0_11 = arith.constant 0 : index
    %c2 = arith.constant 2 : index
    %13 = vector.load %arg0[%c0_11, %c2] : memref<8x398xbf16, #tpu.memory_space<vmem>>, vector<8x360xbf16>
    %cst_12 = arith.constant 0.000000e+00 : bf16
    %14 = vector.broadcast %cst_12 : bf16 to vector<8x360xbf16>
    %15 = arith.maximumf %13, %14 : vector<8x360xbf16>
    %c2_13 = arith.constant 2 : index
    %c0_14 = arith.constant 0 : index
    %c0_15 = arith.constant 0 : index
    %16 = vector.load %arg1[%c2_13, %c0_14, %c0_15] : memref<9x8x8xbf16, #tpu.memory_space<vmem>>, vector<1x8x8xbf16>
    %17 = vector.shape_cast %16 : vector<1x8x8xbf16> to vector<8x8xbf16>
    %cst_16 = arith.constant dense<0.000000e+00> : vector<8x360xf32>
    %18 = tpu.matmul %17, %15, %cst_16 {dimension_numbers = #tpu.dot_dimension_numbers<[1], [0], [0], [1], [0, 0, 1, 1], [], []>} : vector<8x8xbf16>, vector<8x360xbf16>, vector<8x360xf32> -> vector<8x360xf32>
    %19 = arith.addf %12, %18 : vector<8x360xf32>
    %c0_17 = arith.constant 0 : index
    %c18 = arith.constant 18 : index
    %20 = vector.load %arg0[%c0_17, %c18] : memref<8x398xbf16, #tpu.memory_space<vmem>>, vector<8x360xbf16>
    %cst_18 = arith.constant 0.000000e+00 : bf16
    %21 = vector.broadcast %cst_18 : bf16 to vector<8x360xbf16>
    %22 = arith.maximumf %20, %21 : vector<8x360xbf16>
    %c3 = arith.constant 3 : index
    %c0_19 = arith.constant 0 : index
    %c0_20 = arith.constant 0 : index
    %23 = vector.load %arg1[%c3, %c0_19, %c0_20] : memref<9x8x8xbf16, #tpu.memory_space<vmem>>, vector<1x8x8xbf16>
    %24 = vector.shape_cast %23 : vector<1x8x8xbf16> to vector<8x8xbf16>
    %cst_21 = arith.constant dense<0.000000e+00> : vector<8x360xf32>
    %25 = tpu.matmul %24, %22, %cst_21 {dimension_numbers = #tpu.dot_dimension_numbers<[1], [0], [0], [1], [0, 0, 1, 1], [], []>} : vector<8x8xbf16>, vector<8x360xbf16>, vector<8x360xf32> -> vector<8x360xf32>
    %26 = arith.addf %19, %25 : vector<8x360xf32>
    %c0_22 = arith.constant 0 : index
    %c19 = arith.constant 19 : index
    %27 = vector.load %arg0[%c0_22, %c19] : memref<8x398xbf16, #tpu.memory_space<vmem>>, vector<8x360xbf16>
    %cst_23 = arith.constant 0.000000e+00 : bf16
    %28 = vector.broadcast %cst_23 : bf16 to vector<8x360xbf16>
    %29 = arith.maximumf %27, %28 : vector<8x360xbf16>
    %c4 = arith.constant 4 : index
    %c0_24 = arith.constant 0 : index
    %c0_25 = arith.constant 0 : index
    %30 = vector.load %arg1[%c4, %c0_24, %c0_25] : memref<9x8x8xbf16, #tpu.memory_space<vmem>>, vector<1x8x8xbf16>
    %31 = vector.shape_cast %30 : vector<1x8x8xbf16> to vector<8x8xbf16>
    %cst_26 = arith.constant dense<0.000000e+00> : vector<8x360xf32>
    %32 = tpu.matmul %31, %29, %cst_26 {dimension_numbers = #tpu.dot_dimension_numbers<[1], [0], [0], [1], [0, 0, 1, 1], [], []>} : vector<8x8xbf16>, vector<8x360xbf16>, vector<8x360xf32> -> vector<8x360xf32>
    %33 = arith.addf %26, %32 : vector<8x360xf32>
    %c0_27 = arith.constant 0 : index
    %c20 = arith.constant 20 : index
    %34 = vector.load %arg0[%c0_27, %c20] : memref<8x398xbf16, #tpu.memory_space<vmem>>, vector<8x360xbf16>
    %cst_28 = arith.constant 0.000000e+00 : bf16
    %35 = vector.broadcast %cst_28 : bf16 to vector<8x360xbf16>
    %36 = arith.maximumf %34, %35 : vector<8x360xbf16>
    %c5 = arith.constant 5 : index
    %c0_29 = arith.constant 0 : index
    %c0_30 = arith.constant 0 : index
    %37 = vector.load %arg1[%c5, %c0_29, %c0_30] : memref<9x8x8xbf16, #tpu.memory_space<vmem>>, vector<1x8x8xbf16>
    %38 = vector.shape_cast %37 : vector<1x8x8xbf16> to vector<8x8xbf16>
    %cst_31 = arith.constant dense<0.000000e+00> : vector<8x360xf32>
    %39 = tpu.matmul %38, %36, %cst_31 {dimension_numbers = #tpu.dot_dimension_numbers<[1], [0], [0], [1], [0, 0, 1, 1], [], []>} : vector<8x8xbf16>, vector<8x360xbf16>, vector<8x360xf32> -> vector<8x360xf32>
    %40 = arith.addf %33, %39 : vector<8x360xf32>
    %c0_32 = arith.constant 0 : index
    %c36 = arith.constant 36 : index
    %41 = vector.load %arg0[%c0_32, %c36] : memref<8x398xbf16, #tpu.memory_space<vmem>>, vector<8x360xbf16>
    %cst_33 = arith.constant 0.000000e+00 : bf16
    %42 = vector.broadcast %cst_33 : bf16 to vector<8x360xbf16>
    %43 = arith.maximumf %41, %42 : vector<8x360xbf16>
    %c6 = arith.constant 6 : index
    %c0_34 = arith.constant 0 : index
    %c0_35 = arith.constant 0 : index
    %44 = vector.load %arg1[%c6, %c0_34, %c0_35] : memref<9x8x8xbf16, #tpu.memory_space<vmem>>, vector<1x8x8xbf16>
    %45 = vector.shape_cast %44 : vector<1x8x8xbf16> to vector<8x8xbf16>
    %cst_36 = arith.constant dense<0.000000e+00> : vector<8x360xf32>
    %46 = tpu.matmul %45, %43, %cst_36 {dimension_numbers = #tpu.dot_dimension_numbers<[1], [0], [0], [1], [0, 0, 1, 1], [], []>} : vector<8x8xbf16>, vector<8x360xbf16>, vector<8x360xf32> -> vector<8x360xf32>
    %47 = arith.addf %40, %46 : vector<8x360xf32>
    %c0_37 = arith.constant 0 : index
    %c37 = arith.constant 37 : index
    %48 = vector.load %arg0[%c0_37, %c37] : memref<8x398xbf16, #tpu.memory_space<vmem>>, vector<8x360xbf16>
    %cst_38 = arith.constant 0.000000e+00 : bf16
    %49 = vector.broadcast %cst_38 : bf16 to vector<8x360xbf16>
    %50 = arith.maximumf %48, %49 : vector<8x360xbf16>
    %c7 = arith.constant 7 : index
    %c0_39 = arith.constant 0 : index
    %c0_40 = arith.constant 0 : index
    %51 = vector.load %arg1[%c7, %c0_39, %c0_40] : memref<9x8x8xbf16, #tpu.memory_space<vmem>>, vector<1x8x8xbf16>
    %52 = vector.shape_cast %51 : vector<1x8x8xbf16> to vector<8x8xbf16>
    %cst_41 = arith.constant dense<0.000000e+00> : vector<8x360xf32>
    %53 = tpu.matmul %52, %50, %cst_41 {dimension_numbers = #tpu.dot_dimension_numbers<[1], [0], [0], [1], [0, 0, 1, 1], [], []>} : vector<8x8xbf16>, vector<8x360xbf16>, vector<8x360xf32> -> vector<8x360xf32>
    %54 = arith.addf %47, %53 : vector<8x360xf32>
    %c0_42 = arith.constant 0 : index
    %c38 = arith.constant 38 : index
    %55 = vector.load %arg0[%c0_42, %c38] : memref<8x398xbf16, #tpu.memory_space<vmem>>, vector<8x360xbf16>
    %cst_43 = arith.constant 0.000000e+00 : bf16
    %56 = vector.broadcast %cst_43 : bf16 to vector<8x360xbf16>
    %57 = arith.maximumf %55, %56 : vector<8x360xbf16>
    %c8 = arith.constant 8 : index
    %c0_44 = arith.constant 0 : index
    %c0_45 = arith.constant 0 : index
    %58 = vector.load %arg1[%c8, %c0_44, %c0_45] : memref<9x8x8xbf16, #tpu.memory_space<vmem>>, vector<1x8x8xbf16>
    %59 = vector.shape_cast %58 : vector<1x8x8xbf16> to vector<8x8xbf16>
    %cst_46 = arith.constant dense<0.000000e+00> : vector<8x360xf32>
    %60 = tpu.matmul %59, %57, %cst_46 {dimension_numbers = #tpu.dot_dimension_numbers<[1], [0], [0], [1], [0, 0, 1, 1], [], []>} : vector<8x8xbf16>, vector<8x360xbf16>, vector<8x360xf32> -> vector<8x360xf32>
    %61 = arith.addf %54, %60 : vector<8x360xf32>
    %c0_47 = arith.constant 0 : index
    %c0_48 = arith.constant 0 : index
    %62 = vector.load %arg2[%c0_47, %c0_48] : memref<8x360xbf16, #tpu.memory_space<vmem>>, vector<8x360xbf16>
    %63 = arith.extf %62 : vector<8x360xbf16> to vector<8x360xf32>
    %64 = arith.addf %61, %63 : vector<8x360xf32>
    %c0_49 = arith.constant 0 : index
    %c0_50 = arith.constant 0 : index
    %65 = vector.load %arg3[%c0_49, %c0_50] : memref<8x360xbf16, #tpu.memory_space<vmem>>, vector<8x360xbf16>
    %66 = arith.extf %65 : vector<8x360xbf16> to vector<8x360xf32>
    %67 = arith.mulf %64, %66 : vector<8x360xf32>
    %68 = arith.truncf %67 : vector<8x360xf32> to vector<8x360xbf16>
    %c0_51 = arith.constant 0 : index
    %c0_52 = arith.constant 0 : index
    %69 = vector.load %arg4[%c0_51, %c0_52] : memref<8x360xbf16, #tpu.memory_space<vmem>>, vector<8x360xbf16>
    tpu.vector_store %arg4[%c0_51, %c0_52], %68 {strides = array<i32>} : memref<8x360xbf16, #tpu.memory_space<vmem>>, vector<8x360xbf16>,
    return
  }
}

module attributes {stable_mosaic.version = 11 : i64} {
  func.func @_mm_kernel(%arg0: i32, %arg1: i32, %arg2: i32, %arg3: memref<16x8xbf16, #tpu.memory_space<vmem>>, %arg4: memref<8x256xbf16, #tpu.memory_space<vmem>>, %arg5: memref<16x256xf32, #tpu.memory_space<vmem>>, %arg6: memref<16x256xf32, #tpu.memory_space<vmem>>) attributes {dimension_semantics = [#tpu.dimension_semantics<parallel>, #tpu.dimension_semantics<parallel>, #tpu.dimension_semantics<arbitrary>], iteration_bounds = array<i64: 1, 1, 1>, scalar_prefetch = 0 : i64, scratch_operands = 1 : i64, tpu.core_type = #tpu.core_type<tc>, window_params = [{transform_indices = @transform_0, window_bounds = array<i64: 16, 8>}, {transform_indices = @transform_1, window_bounds = array<i64: 8, 256>}, {transform_indices = @transform_2, window_bounds = array<i64: 16, 256>}]} {
    %c0 = arith.constant 0 : index
    %c0_0 = arith.constant 0 : index
    %0 = vector.load %arg3[%c0, %c0_0] : memref<16x8xbf16, #tpu.memory_space<vmem>>, vector<16x8xbf16>
    %c0_1 = arith.constant 0 : index
    %c0_2 = arith.constant 0 : index
    %1 = vector.load %arg4[%c0_1, %c0_2] : memref<8x256xbf16, #tpu.memory_space<vmem>>, vector<8x256xbf16>
    %cst = arith.constant 0.000000e+00 : bf16
    %2 = vector.broadcast %cst : bf16 to vector<8x256xbf16>
    %3 = arith.maximumf %1, %2 : vector<8x256xbf16>
    %cst_3 = arith.constant dense<0.000000e+00> : vector<16x256xf32>
    %4 = tpu.matmul %0, %3, %cst_3 {dimension_numbers = #tpu.dot_dimension_numbers<[1], [0], [0], [1], [0, 0, 1, 1], [], []>} : vector<16x8xbf16>, vector<8x256xbf16>, vector<16x256xf32> -> vector<16x256xf32>
    %c0_i32 = arith.constant 0 : i32
    %5 = arith.cmpi eq, %arg2, %c0_i32 : i32
    %6 = arith.extui %5 : i1 to i32
    %c0_i32_4 = arith.constant 0 : i32
    %7 = arith.cmpi ne, %6, %c0_i32_4 : i32
    scf.if %7 {
      %c0_9 = arith.constant 0 : index
      %c0_10 = arith.constant 0 : index
      %14 = vector.load %arg6[%c0_9, %c0_10] : memref<16x256xf32, #tpu.memory_space<vmem>>, vector<16x256xf32>
      tpu.vector_store %arg6[%c0_9, %c0_10], %4 {strides = array<i32>} : memref<16x256xf32, #tpu.memory_space<vmem>>, vector<16x256xf32>,
    } else {
    }
    %c0_i32_5 = arith.constant 0 : i32
    %8 = arith.cmpi ne, %arg2, %c0_i32_5 : i32
    %9 = arith.extui %8 : i1 to i32
    %c0_i32_6 = arith.constant 0 : i32
    %10 = arith.cmpi ne, %9, %c0_i32_6 : i32
    scf.if %10 {
      %c0_9 = arith.constant 0 : index
      %c0_10 = arith.constant 0 : index
      %14 = vector.load %arg6[%c0_9, %c0_10] : memref<16x256xf32, #tpu.memory_space<vmem>>, vector<16x256xf32>
      %15 = arith.addf %14, %4 : vector<16x256xf32>
      %c0_11 = arith.constant 0 : index
      %c0_12 = arith.constant 0 : index
      %16 = vector.load %arg6[%c0_11, %c0_12] : memref<16x256xf32, #tpu.memory_space<vmem>>, vector<16x256xf32>
      tpu.vector_store %arg6[%c0_11, %c0_12], %15 {strides = array<i32>} : memref<16x256xf32, #tpu.memory_space<vmem>>, vector<16x256xf32>,
    } else {
    }
    %c0_i32_7 = arith.constant 0 : i32
    %11 = arith.cmpi eq, %arg2, %c0_i32_7 : i32
    %12 = arith.extui %11 : i1 to i32
    %c0_i32_8 = arith.constant 0 : i32
    %13 = arith.cmpi ne, %12, %c0_i32_8 : i32
    scf.if %13 {
      %c0_9 = arith.constant 0 : index
      %c0_10 = arith.constant 0 : index
      %14 = vector.load %arg6[%c0_9, %c0_10] : memref<16x256xf32, #tpu.memory_space<vmem>>, vector<16x256xf32>
      %c0_11 = arith.constant 0 : index
      %c0_12 = arith.constant 0 : index
      %15 = vector.load %arg5[%c0_11, %c0_12] : memref<16x256xf32, #tpu.memory_space<vmem>>, vector<16x256xf32>
      tpu.vector_store %arg5[%c0_11, %c0_12], %14 {strides = array<i32>} : memref<16x256xf32, #tpu.memory_space<vmem>>, vector<16x256xf32>,
    } else {
    }
    return
  }
  func.func @transform_0(%arg0: i32, %arg1: i32, %arg2: i32) -> (i32, i32) {
    %c0_i32 = arith.constant 0 : i32
    return %arg0, %arg2 : i32, i32
  }
  func.func @transform_1(%arg0: i32, %arg1: i32, %arg2: i32) -> (i32, i32) {
    %c0_i32 = arith.constant 0 : i32
    return %arg2, %arg1 : i32, i32
  }
  func.func @transform_2(%arg0: i32, %arg1: i32, %arg2: i32) -> (i32, i32) {
    %c0_i32 = arith.constant 0 : i32
    return %arg0, %arg1 : i32, i32
  }
}

</mosaic_0001>

<bundles_post_ra>
// kernel: _lambda_.20
= control target key start
LH: loop header
LB: loop body
LE: loop exit
PB: predicated region body
PF: predicated region fallthrough
CT: control target
= control target key end

     0   :  { %vm23_vm0 = vcmask 1043456   ;;  %v114_v1 = vmov 0   ;;  %vm19_vm1 = vcmask 64512   ;;  %s139_s1 = inlined_call_operand.vmem [shape: bf16[8,256], index: 1, kind: input, shape index: {}]   ;;  %s140_s0 = inlined_call_operand.vmem [shape: bf16[8,8], index: 0, kind: input, shape index: {}]   ;;  %s141_s2 = inlined_call_operand.vmem [shape: bf16[8,256], index: 2, kind: output, shape index: {}]  }
   0x1   :  { %v13_v0 = vld [vmem:[%s139_s1] sm:$0xff]  ;;  %62 = vmatprep.mubr.bf16.mxu0 %v114_v1 }
   0x2   :  { %v106_v2 = vcombine.high %v13_v0, %v13_v0  ;;  %v105_v3 = vcombine.low %v13_v0, %v13_v0  ;;  %v12_v5 = vld [vmem:[%s140_s0] sm:$0xf] }
   0x4   :  { %107 = vmatprep.subr.msk.bf16.mxu0 %vm23_vm0, %v106_v2  ;;  %v25_v4 = vsel %vm23_vm0, %v105_v3, 0 }
   0x5   :  { %31 = vmatpush1.bf16.msra.mxu0 %v25_v4 }
   0x8   :  { %108 = vmatmul.mubr.msk.bf16.vlgmr.msra.gmra.mrb[0].mxu0 %vm19_vm1, %v12_v5 }
  0xdb   :  { %v64_v6 = vpop.f32.mrb[0].mxu0 }
  0xdc   :  { %v66_v7 = vpop.f32.mrb[1].mxu0 }
  0xdd   :  { %v110_v8 = vpack.c.bf16 %v66_v7, %v64_v6  ;;  %v68_v9 = vpop.f32.mrb[2].mxu0 }
  0xde   :  { %v69_v10 = vpop.f32.mrb[3].mxu0 }
  0xdf   :  { %100 = vst [vmem:[%s141_s2] sm:$0xff] %v110_v8 }

// kernel: _lambda_.21
= control target key start
LH: loop header
LB: loop body
LE: loop exit
PB: predicated region body
PF: predicated region fallthrough
CT: control target
= control target key end

     0   :  { %v1209_v2 = vmov 0.0   ;;  %vm1210_vm0 = vmmov 0   ;;  %v1211_v3 = vmov 0   ;;  %s1212_s13 = smov 127   ;;  %s1213_s14 = smov 126   ;;  %vm40_vm1 = vcmask 1043456   ;;  %s1374_s0 = inlined_call_operand.vmem [shape: bf16[8,398], index: 0, kind: input, shape index: {}]   ;;  %s1375_s1 = inlined_call_operand.vmem [shape: bf16[9,8,8], index: 1, kind: input, shape index: {}]   ;;  %s1376_s2 = inlined_call_operand.vmem [shape: bf16[8,360], index: 2, kind: output, shape index: {}]  }
   0x1   :  { %v13_v0 = vld [vmem:[%s1374_s0 + $0x8] sm:$0xf]  ;;  %v12_v1 = vld [vmem:[%s1374_s0] sm:$0xff]  ;;  %1080 = vmatprep.subr.bf16.mxu1 %v1209_v2  ;;  %1082 = vmatprep.mubr.msk.bf16.mxu1 %vm1210_vm0, %v1209_v2  ;;  %s1214_s15 = smov 110   ;;  %s1215_s16 = smov 109   ;;  %vm36_vm2 = vcmask 64512  }
   0x2   :  { %v15_v4 = vmax.bf16 %v1211_v3, %v13_v0  ;;  %v14_v5 = vmax.bf16 %v1211_v3, %v12_v1  ;;  %82 = vmatprep.mubr.bf16.mxu0 %v1211_v3  ;;  %v653_v9 = vld [vmem:[%s1374_s0 + $0x8] sm:$0xff]  ;;  %s1216_s19 = smov 108   ;;  %s1217_s20 = smov 92   ;;  %v1016_v16 = vld [vmem:[%s1375_s1 + $0x4] sm:$0xf]  ;;  %vm33_vm3 = vcmask 1039360  }
   0x3   :  { %v655_v10 = vmax.bf16 %v1211_v3, %v653_v9  ;;  %s1218_s21 = smov 91   ;;  %s1219_s0 = smov 90   ;;  %vm232_vm4 = vcmask 1031168   ;;  %v16_v28 = vld [vmem:[%s1375_s1] sm:$0xf]  ;;  %vm339_vm5 = vcmask 900096  }
   0x4   :  { %v1019_v6 = vcombine.low %v15_v4, %v15_v4  ;;  %v1247_v7 = vcombine.low %v14_v5, %v14_v5  ;;  %v1018_v8 = vcombine.high %v14_v5, %v14_v5  ;;  %v1026_v36 = vld [vmem:[%s1375_s1 + $0x8] sm:$0xf]  ;;  %vm446_vm6 = vcmask 891904   ;;  %v1030_v44 = vld [vmem:[%s1375_s1 + $0xc] sm:$0xf] }
   0x5   :  { %v1045_v11 = vcombine.low %v655_v10, %v655_v10  ;;  %v1046_v12 = vcombine.high %v655_v10, %v655_v10  ;;  %vm553_vm7 = vcmask 883712   ;;  %v1034_v52 = vld [vmem:[%s1375_s1 + $0x10] sm:$0xf]  ;;  %vm676_vm8 = vcmask 752640   ;;  %v1038_v62 = vld [vmem:[%s1375_s1 + $0x14] sm:$0xf] }
   0x6   :  { %31 = vrot.lane.b32.xlu1 %v1019_v6, %s1212_s13  ;;  %27 = vrot.lane.b32.xlu0 %v1247_v7, %s1212_s13  ;;  %v141_v17 = vsel %vm40_vm1, %v1019_v6, 0  ;;  %v135_v23 = vsel %vm40_vm1, %v1247_v7, 0  ;;  %vm786_vm9 = vcmask 744448   ;;  %v1042_v10 = vld [vmem:[%s1375_s1 + $0x18] sm:$0xf]  ;;  %vm896_vm10 = vcmask 736256  }
   0x7   :  { %vm1010_vm11 = vcmask 846848  }
   0xa   :  { %29 = vrot.lane.b32.xlu0 %v1018_v8, %s1212_s13  ;;  %226 = vrot.lane.b32.xlu1 %v1247_v7, %s1213_s14 }
   0xe   :  { %228 = vrot.lane.b32.xlu0 %v1018_v8, %s1213_s14  ;;  %230 = vrot.lane.b32.xlu1 %v1019_v6, %s1213_s14 }
  0x12   :  { %333 = vrot.lane.b32.xlu0 %v1247_v7, %s1214_s15  ;;  %335 = vrot.lane.b32.xlu1 %v1018_v8, %s1214_s15 }
  0x16   :  { %337 = vrot.lane.b32.xlu0 %v1019_v6, %s1214_s15  ;;  %440 = vrot.lane.b32.xlu1 %v1247_v7, %s1215_s16 }
  0x1a   :  { %442 = vrot.lane.b32.xlu0 %v1018_v8, %s1215_s16  ;;  %444 = vrot.lane.b32.xlu1 %v1019_v6, %s1215_s16 }
  0x1e   :  { %547 = vrot.lane.b32.xlu0 %v1247_v7, %s1216_s19  ;;  %549 = vrot.lane.b32.xlu1 %v1018_v8, %s1216_s19 }
  0x22   :  { %551 = vrot.lane.b32.xlu0 %v1019_v6, %s1216_s19  ;;  %668 = vrot.lane.b32.xlu1 %v1247_v7, %s1217_s20 }
  0x26   :  { %670 = vrot.lane.b32.xlu0 %v1018_v8, %s1217_s20  ;;  %672 = vrot.lane.b32.xlu1 %v1045_v11, %s1217_s20 }
  0x2a   :  { %674 = vrot.lane.b32.xlu0 %v1046_v12, %s1217_s20  ;;  %778 = vrot.lane.b32.xlu1 %v1247_v7, %s1218_s21 }
  0x2e   :  { %780 = vrot.lane.b32.xlu0 %v1018_v8, %s1218_s21  ;;  %782 = vrot.lane.b32.xlu1 %v1045_v11, %s1218_s21 }
  0x32   :  { %784 = vrot.lane.b32.xlu0 %v1046_v12, %s1218_s21  ;;  %888 = vrot.lane.b32.xlu1 %v1247_v7, %s1219_s0 }
  0x36   :  { %890 = vrot.lane.b32.xlu0 %v1018_v8, %s1219_s0  ;;  %892 = vrot.lane.b32.xlu1 %v1045_v11, %s1219_s0 }
  0x3a   :  { %894 = vrot.lane.b32.xlu0 %v1046_v12, %s1219_s0 }
  0x78   :  { %v32_v13 = vpop.permute.xlu1 %31  ;;  %v28_v14 = vpop.permute.xlu0 %27 }
  0x79   :  { %v48_v15 = vsel %vm40_vm1, %v32_v13, 0 }
  0x7a   :  { %1081 = vmatpush3.bf16.msra.mxu1 %v48_v15 }
  0x7b   :  { %1086 = vmatprep.subr.bf16.mxu1 %v1209_v2 }
  0x7c   :  { %v30_v18 = vpop.permute.xlu0 %29  ;;  %v227_v19 = vpop.permute.xlu1 %226 }
  0x7d   :  { %1083 = vmatmul.mubr.msk.bf16.vlgmr.msra.gmra.mrb[0].mxu1 %vm36_vm2, %v1016_v16  ;;  %v35_v20 = vsel %vm33_vm3, %v30_v18, %v32_v13  ;;  %v34_v21 = vsel %vm33_vm3, %v28_v14, %v30_v18 }
  0x7e   :  { %1020 = vmatprep.subr.msk.bf16.mxu0 %vm40_vm1, %v35_v20  ;;  %v42_v22 = vsel %vm40_vm1, %v34_v21, 0  ;;  %1087 = vmatpush3.bf16.msra.mxu1 %v141_v17 }
  0x7f   :  { %51 = vmatpush1.bf16.msra.mxu0 %v42_v22  ;;  %1088 = vmatprep.mubr.msk.bf16.mxu1 %vm1210_vm0, %v1209_v2 }
  0x80   :  { %1023 = vmatprep.subr.msk.bf16.mxu0 %vm40_vm1, %v1018_v8  ;;  %v229_v24 = vpop.permute.xlu0 %228  ;;  %v231_v25 = vpop.permute.xlu1 %230  ;;  %1092 = vmatprep.subr.bf16.mxu1 %v1209_v2 }
  0x81   :  { %v234_v26 = vsel %vm232_vm4, %v229_v24, %v231_v25  ;;  %v245_v29 = vsel %vm40_vm1, %v231_v25, 0  ;;  %v233_v30 = vsel %vm232_vm4, %v227_v19, %v229_v24  ;;  %v1050_v19 = vld [vmem:[%s1375_s1 + $0x1c] sm:$0xf] }
  0x82   :  { %1021 = vmatmul.mubr.msk.bf16.vlgmr.msra.gmra.mrb[0].mxu0 %vm36_vm2, %v1016_v16  ;;  %v239_v33 = vsel %vm40_vm1, %v233_v30, 0 }
  0x83   :  { %144 = vmatpush1.bf16.msra.mxu0 %v135_v23  ;;  %175 = vmatprep.mubr.bf16.mxu0 %v1211_v3  ;;  %v1054_v23 = vld [vmem:[%s1375_s1 + $0x20] sm:$0xf] }
  0x84   :  { %1027 = vmatprep.subr.msk.bf16.mxu0 %vm40_vm1, %v234_v26  ;;  %v334_v27 = vpop.permute.xlu0 %333  ;;  %v336_v31 = vpop.permute.xlu1 %335 }
  0x85   :  { %v340_v38 = vsel %vm339_vm5, %v334_v27, %v336_v31 }
  0x86   :  { %v346_v41 = vsel %vm40_vm1, %v340_v38, 0 }
  0x88   :  { %v338_v32 = vpop.permute.xlu0 %337  ;;  %v441_v35 = vpop.permute.xlu1 %440 }
  0x89   :  { %1089 = vmatmul.mubr.msk.bf16.vlgmr.msra.gmra.mrb[0].mxu1 %vm36_vm2, %v16_v28  ;;  %v341_v34 = vsel %vm339_vm5, %v336_v31, %v338_v32  ;;  %v352_v37 = vsel %vm40_vm1, %v338_v32, 0 }
  0x8a   :  { %1093 = vmatpush3.bf16.msra.mxu1 %v245_v29  ;;  %1094 = vmatprep.mubr.msk.bf16.mxu1 %vm1210_vm0, %v1209_v2 }
  0x8b   :  { %1098 = vmatprep.subr.bf16.mxu1 %v1209_v2 }
  0x8c   :  { %v443_v39 = vpop.permute.xlu0 %442  ;;  %v445_v40 = vpop.permute.xlu1 %444 }
  0x8d   :  { %v448_v42 = vsel %vm446_vm6, %v443_v39, %v445_v40  ;;  %v459_v45 = vsel %vm40_vm1, %v445_v40, 0  ;;  %v447_v46 = vsel %vm446_vm6, %v441_v35, %v443_v39 }
  0x8e   :  { %1024 = vmatmul.mubr.msk.bf16.vlgmr.msra.gmra.mrb[0].mxu0 %vm36_vm2, %v16_v28  ;;  %v453_v49 = vsel %vm40_vm1, %v447_v46, 0 }
  0x8f   :  { %248 = vmatpush1.bf16.msra.mxu0 %v239_v33  ;;  %279 = vmatprep.mubr.bf16.mxu0 %v1211_v3 }
  0x90   :  { %1031 = vmatprep.subr.msk.bf16.mxu0 %vm40_vm1, %v341_v34  ;;  %v548_v43 = vpop.permute.xlu0 %547  ;;  %v550_v47 = vpop.permute.xlu1 %549 }
  0x91   :  { %v554_v55 = vsel %vm553_vm7, %v548_v43, %v550_v47 }
  0x92   :  { %v560_v57 = vsel %vm40_vm1, %v554_v55, 0 }
  0x94   :  { %v552_v48 = vpop.permute.xlu0 %551  ;;  %v669_v51 = vpop.permute.xlu1 %668 }
  0x95   :  { %1095 = vmatmul.mubr.msk.bf16.vlgmr.msra.gmra.mrb[0].mxu1 %vm36_vm2, %v1026_v36  ;;  %v555_v50 = vsel %vm553_vm7, %v550_v47, %v552_v48  ;;  %v566_v53 = vsel %vm40_vm1, %v552_v48, 0 }
  0x96   :  { %1099 = vmatpush3.bf16.msra.mxu1 %v352_v37  ;;  %1100 = vmatprep.mubr.msk.bf16.mxu1 %vm1210_vm0, %v1209_v2 }
  0x97   :  { %1104 = vmatprep.subr.bf16.mxu1 %v1209_v2 }
  0x98   :  { %v671_v54 = vpop.permute.xlu0 %670  ;;  %v673_v56 = vpop.permute.xlu1 %672 }
  0x99   :  { %v678_v58 = vsel %vm676_vm8, %v671_v54, %v673_v56  ;;  %v677_v1 = vsel %vm676_vm8, %v669_v51, %v671_v54 }
  0x9a   :  { %1028 = vmatmul.mubr.msk.bf16.vlgmr.msra.gmra.mrb[0].mxu0 %vm36_vm2, %v1026_v36  ;;  %v684_v5 = vsel %vm40_vm1, %v677_v1, 0 }
  0x9b   :  { %355 = vmatpush1.bf16.msra.mxu0 %v346_v41  ;;  %386 = vmatprep.mubr.bf16.mxu0 %v1211_v3 }
  0x9c   :  { %1035 = vmatprep.subr.msk.bf16.mxu0 %vm40_vm1, %v448_v42  ;;  %v675_v59 = vpop.permute.xlu0 %674  ;;  %v779_v61 = vpop.permute.xlu1 %778 }
  0x9d   :  { %v679_v60 = vsel %vm676_vm8, %v673_v56, %v675_v59 }
  0x9e   :  { %v690_v63 = vsel %vm40_vm1, %v679_v60, 0 }
  0xa0   :  { %v781_v0 = vpop.permute.xlu0 %780  ;;  %v783_v4 = vpop.permute.xlu1 %782 }
  0xa1   :  { %1101 = vmatmul.mubr.msk.bf16.vlgmr.msra.gmra.mrb[0].mxu1 %vm36_vm2, %v1030_v44  ;;  %v788_v6 = vsel %vm786_vm9, %v781_v0, %v783_v4  ;;  %v787_v13 = vsel %vm786_vm9, %v779_v61, %v781_v0 }
  0xa2   :  { %1105 = vmatpush3.bf16.msra.mxu1 %v459_v45  ;;  %1106 = vmatprep.mubr.msk.bf16.mxu1 %vm1210_vm0, %v1209_v2  ;;  %v794_v15 = vsel %vm40_vm1, %v787_v13, 0 }
  0xa3   :  { %1110 = vmatprep.subr.bf16.mxu1 %v1209_v2 }
  0xa4   :  { %v785_v7 = vpop.permute.xlu0 %784  ;;  %v889_v9 = vpop.permute.xlu1 %888 }
  0xa5   :  { %v789_v8 = vsel %vm786_vm9, %v783_v4, %v785_v7 }
  0xa6   :  { %1032 = vmatmul.mubr.msk.bf16.vlgmr.msra.gmra.mrb[0].mxu0 %vm36_vm2, %v1030_v44  ;;  %v800_v11 = vsel %vm40_vm1, %v789_v8, 0 }
  0xa7   :  { %462 = vmatpush1.bf16.msra.mxu0 %v453_v49  ;;  %493 = vmatprep.mubr.bf16.mxu0 %v1211_v3 }
  0xa8   :  { %1039 = vmatprep.subr.msk.bf16.mxu0 %vm40_vm1, %v555_v50  ;;  %v891_v12 = vpop.permute.xlu0 %890  ;;  %v893_v14 = vpop.permute.xlu1 %892 }
  0xa9   :  { %v898_v16 = vsel %vm896_vm10, %v891_v12, %v893_v14  ;;  %v897_v21 = vsel %vm896_vm10, %v889_v9, %v891_v12 }
  0xaa   :  { %v904_v22 = vsel %vm40_vm1, %v897_v21, 0 }
  0xac   :  { %v895_v17 = vpop.permute.xlu0 %894 }
  0xad   :  { %1107 = vmatmul.mubr.msk.bf16.vlgmr.msra.gmra.mrb[0].mxu1 %vm36_vm2, %v1034_v52  ;;  %v899_v18 = vsel %vm896_vm10, %v893_v14, %v895_v17 }
  0xae   :  { %1111 = vmatpush3.bf16.msra.mxu1 %v566_v53  ;;  %1112 = vmatprep.mubr.msk.bf16.mxu1 %vm1210_vm0, %v1209_v2  ;;  %v910_v20 = vsel %vm40_vm1, %v899_v18, 0 }
  0xaf   :  { %1116 = vmatprep.subr.bf16.mxu1 %v1209_v2 }
  0xb2   :  { %1036 = vmatmul.mubr.msk.bf16.vlgmr.msra.gmra.mrb[0].mxu0 %vm36_vm2, %v1034_v52 }
  0xb3   :  { %569 = vmatpush1.bf16.msra.mxu0 %v560_v57  ;;  %600 = vmatprep.mubr.bf16.mxu0 %v1211_v3 }
  0xb4   :  { %1047 = vmatprep.subr.msk.bf16.mxu0 %vm40_vm1, %v678_v58 }
  0xb9   :  { %1113 = vmatmul.mubr.msk.bf16.vlgmr.msra.gmra.mrb[0].mxu1 %vm36_vm2, %v1038_v62 }
  0xba   :  { %1117 = vmatpush3.bf16.msra.mxu1 %v690_v63  ;;  %1118 = vmatprep.mubr.msk.bf16.mxu1 %vm1210_vm0, %v1209_v2 }
  0xbb   :  { %1122 = vmatprep.subr.bf16.mxu1 %v1209_v2 }
  0xbe   :  { %1040 = vmatmul.mubr.msk.bf16.vlgmr.msra.gmra.mrb[0].mxu0 %vm36_vm2, %v1038_v62 }
  0xbf   :  { %693 = vmatpush1.bf16.msra.mxu0 %v684_v5  ;;  %724 = vmatprep.mubr.bf16.mxu0 %v1211_v3 }
  0xc0   :  { %1051 = vmatprep.subr.msk.bf16.mxu0 %vm40_vm1, %v788_v6 }
  0xc5   :  { %1119 = vmatmul.mubr.msk.bf16.vlgmr.msra.gmra.mrb[0].mxu1 %vm36_vm2, %v1042_v10 }
  0xc6   :  { %1123 = vmatpush3.bf16.msra.mxu1 %v800_v11  ;;  %1124 = vmatprep.mubr.msk.bf16.mxu1 %vm1210_vm0, %v1209_v2 }
  0xc7   :  { %1128 = vmatprep.subr.bf16.mxu1 %v1209_v2 }
  0xca   :  { %1048 = vmatmul.mubr.msk.bf16.vlgmr.msra.gmra.mrb[0].mxu0 %vm36_vm2, %v1042_v10 }
  0xcb   :  { %803 = vmatpush1.bf16.msra.mxu0 %v794_v15  ;;  %834 = vmatprep.mubr.bf16.mxu0 %v1211_v3 }
  0xcc   :  { %1055 = vmatprep.subr.msk.bf16.mxu0 %vm40_vm1, %v898_v16 }
  0xd1   :  { %1125 = vmatmul.mubr.msk.bf16.vlgmr.msra.gmra.mrb[0].mxu1 %vm36_vm2, %v1050_v19 }
  0xd2   :  { %1129 = vmatpush3.bf16.msra.mxu1 %v910_v20  ;;  %1130 = vmatprep.mubr.msk.bf16.mxu1 %vm1210_vm0, %v1209_v2 }
  0xd6   :  { %1052 = vmatmul.mubr.msk.bf16.vlgmr.msra.gmra.mrb[0].mxu0 %vm36_vm2, %v1050_v19 }
  0xd7   :  { %913 = vmatpush1.bf16.msra.mxu0 %v904_v22  ;;  %944 = vmatprep.mubr.bf16.mxu0 %v1211_v3 }
  0xdd   :  { %1131 = vmatmul.mubr.msk.bf16.vlgmr.msra.gmra.mrb[0].mxu1 %vm36_vm2, %v1054_v23 }
  0xe2   :  { %1056 = vmatmul.mubr.msk.bf16.vlgmr.msra.gmra.mrb[0].mxu0 %vm36_vm2, %v1054_v23 }
 0x1b0   :  { %v987_v24 = vpop.f32.mrb[0].mxu1 }
 0x1b1   :  { %v1061_v25 = vpack.c.bf16 %v987_v24, %v987_v24  ;;  %v1132_v26 = vpop.f32.mrb[1].mxu1 }
 0x1b2   :  { %v990_v2 = vpop.f32.mrb[2].mxu1 }
 0x1b3   :  { %v1133_v27 = vpop.f32.mrb[3].mxu1  ;;  %1011 = vst.msk [vmem:[%s1376_s2 + $0x8] sm:$0xf] %vm1010_vm11, %v1061_v25 }
 0x1b5   :  { %v946_v28 = vpop.f32.mrb[0].mxu0 }
 0x1b6   :  { %v948_v3 = vpop.f32.mrb[1].mxu0 }
 0x1b7   :  { %v1060_v29 = vpack.c.bf16 %v948_v3, %v946_v28  ;;  %v950_v30 = vpop.f32.mrb[2].mxu0 }
 0x1b8   :  { %v951_v31 = vpop.f32.mrb[3].mxu0 }
 0x1b9   :  { %1009 = vst [vmem:[%s1376_s2] sm:$0xff] %v1060_v29 }

// kernel: _lambda_.22
= control target key start
LH: loop header
LB: loop body
LE: loop exit
PB: predicated region body
PF: predicated region fallthrough
CT: control target
= control target key end

     0   :  { %vm92_vm0 = vcmask 130048   ;;  %v472_v4 = vmov 0   ;;  %vm218_vm1 = vcmask 31744   ;;  %vm371_vm2 = vcmask 27648   ;;  %s627_s1 = inlined_call_operand.vmem [shape: bf16[16,4], index: 1, kind: input, shape index: {}]   ;;  %s628_s0 = inlined_call_operand.vmem [shape: bf16[128,16], index: 0, kind: input, shape index: {}]   ;;  %s629_s2 = inlined_call_operand.vmem [shape: bf16[128,4], index: 2, kind: output, shape index: {}]  }
   0x1   :  { %v471_v0 = vld [vmem:[%s627_s1] sm:$0xff]   ;;  %v14_v9 = vld [vmem:[%s628_s0 + $0x8] sm:$0xf]  ;;  %v15_v10 = vld [vmem:[%s628_s0 + $0xc] sm:$0xf] }
   0x2   :  { %v12_v1 = vld [vmem:[%s628_s0] sm:$0xf]  ;;  %v13_v2 = vld [vmem:[%s628_s0 + $0x4] sm:$0xf]  ;;  %450 = vmatprep.subr.bf16.mxu0 %v471_v0  ;;  %468 = vmatprep.subr.bf16.mxu1 %v471_v0  ;;  %v32_v12 = vmax.bf16 %v472_v4, %v14_v9  ;;  %v33_v13 = vmax.bf16 %v472_v4, %v15_v10  ;;  %v22_v14 = vld [vmem:[%s628_s0 + $0x28] sm:$0xf] }
   0x3   :  { %v20_v3 = vld [vmem:[%s628_s0 + $0x20] sm:$0xf]  ;;  %v30_v5 = vmax.bf16 %v472_v4, %v12_v1  ;;  %v31_v6 = vmax.bf16 %v472_v4, %v13_v2  ;;  %v21_v7 = vld [vmem:[%s628_s0 + $0x24] sm:$0xf]  ;;  %451 = vmatpush3.bf16.msra.mxu0 %v471_v0  ;;  %469 = vmatpush3.bf16.msra.mxu1 %v471_v0  ;;  %v23_v15 = vld [vmem:[%s628_s0 + $0x2c] sm:$0xf]  ;;  %v40_v18 = vmax.bf16 %v472_v4, %v22_v14 }
   0x4   :  { %v38_v8 = vmax.bf16 %v472_v4, %v20_v3  ;;  %v39_v11 = vmax.bf16 %v472_v4, %v21_v7  ;;  %v16_v16 = vld [vmem:[%s628_s0 + $0x10] sm:$0xf]  ;;  %v41_v19 = vmax.bf16 %v472_v4, %v23_v15  ;;  %v17_v20 = vld [vmem:[%s628_s0 + $0x14] sm:$0xf]  ;;  %v393_v25 = vcombine.low %v32_v12, %v33_v13  ;;  %v18_v28 = vld [vmem:[%s628_s0 + $0x18] sm:$0xf] }
   0x5   :  { %v392_v17 = vcombine.low %v30_v5, %v31_v6  ;;  %v34_v21 = vmax.bf16 %v472_v4, %v16_v16  ;;  %v24_v22 = vld [vmem:[%s628_s0 + $0x30] sm:$0xf]  ;;  %v25_v23 = vld [vmem:[%s628_s0 + $0x34] sm:$0xf]  ;;  %v35_v26 = vmax.bf16 %v472_v4, %v17_v20  ;;  %v19_v29 = vld [vmem:[%s628_s0 + $0x1c] sm:$0xf]  ;;  %v36_v35 = vmax.bf16 %v472_v4, %v18_v28 }
   0x6   :  { %v396_v24 = vcombine.low %v38_v8, %v39_v11  ;;  %v42_v27 = vmax.bf16 %v472_v4, %v24_v22  ;;  %v26_v30 = vld [vmem:[%s628_s0 + $0x38] sm:$0xf]  ;;  %v397_v31 = vcombine.low %v40_v18, %v41_v19  ;;  %v43_v32 = vmax.bf16 %v472_v4, %v25_v23  ;;  %v27_v33 = vld [vmem:[%s628_s0 + $0x3c] sm:$0xf] }
   0x7   :  { %452 = vmatprep.mubr.msk.bf16.mxu0 %vm92_vm0, %v392_v17  ;;  %v394_v34 = vcombine.low %v34_v21, %v35_v26  ;;  %v37_v36 = vmax.bf16 %v472_v4, %v19_v29  ;;  %v44_v38 = vmax.bf16 %v472_v4, %v26_v30  ;;  %v45_v39 = vmax.bf16 %v472_v4, %v27_v33 }
   0x8   :  { %460 = vmatprep.mubr.msk.bf16.mxu1 %vm92_vm0, %v396_v24  ;;  %453 = vmatmul.mubr.msk.bf16.vlgmr.msra.gmra.mrb[0].mxu0 %vm92_vm0, %v393_v25  ;;  %v398_v37 = vcombine.low %v42_v27, %v43_v32 }
   0x9   :  { %461 = vmatmul.mubr.msk.bf16.vlgmr.msra.gmra.mrb[0].mxu1 %vm92_vm0, %v397_v31  ;;  %456 = vmatprep.mubr.msk.bf16.mxu0 %vm92_vm0, %v394_v34  ;;  %v395_v40 = vcombine.low %v36_v35, %v37_v36  ;;  %v399_v41 = vcombine.low %v44_v38, %v45_v39 }
   0xa   :  { %464 = vmatprep.mubr.msk.bf16.mxu1 %vm92_vm0, %v398_v37 }
  0x10   :  { %457 = vmatmul.mubr.msk.bf16.gmra.mrb[4].mxu0 %vm92_vm0, %v395_v40 }
  0x11   :  { %465 = vmatmul.mubr.msk.bf16.gmra.mrb[4].mxu1 %vm92_vm0, %v399_v41 }
  0xdb   :  { %v454_v42 = vpop.f32.mrb[0].mxu0 }
  0xdc   :  { %221 = vst.msk [vmem:[#allocation2 + $0x10] sm:$0xff] %vm218_vm1, %v454_v42  ;;  %v462_v43 = vpop.f32.mrb[0].mxu1  ;;  %v151_v44 = vpop.f32.mrb[1].mxu0 }
  0xdd   :  { %229 = vst.msk [vmem:[#allocation2 + $0x50] sm:$0xff] %vm218_vm1, %v462_v43  ;;  %219 = vst.msk [vmem:[#allocation2] sm:$0xff] %vm218_vm1, %v151_v44  ;;  %v183_v45 = vpop.f32.mrb[1].mxu1  ;;  %v455_v46 = vpop.f32.mrb[2].mxu0 }
  0xde   :  { %227 = vst.msk [vmem:[#allocation2 + $0x40] sm:$0xff] %vm218_vm1, %v183_v45  ;;  %222 = vst.msk [vmem:[#allocation2 + $0x18] sm:$0xff] %vm218_vm1, %v455_v46  ;;  %v463_v47 = vpop.f32.mrb[2].mxu1  ;;  %v154_v48 = vpop.f32.mrb[3].mxu0 }
  0xdf   :  { %230 = vst.msk [vmem:[#allocation2 + $0x58] sm:$0xff] %vm218_vm1, %v463_v47  ;;  %220 = vst.msk [vmem:[#allocation2 + $0x8] sm:$0xff] %vm218_vm1, %v154_v48  ;;  %v186_v49 = vpop.f32.mrb[3].mxu1 }
  0xe0   :  { %228 = vst.msk [vmem:[#allocation2 + $0x48] sm:$0xff] %vm218_vm1, %v186_v49 }
  0xe3   :  { %v293_v50 = vld [vmem:[#allocation2 + $0x10] sm:$0xff]  ;;  %v458_v51 = vpop.f32.mrb[4].mxu0 }
  0xe4   :  { %v427_v52 = vpack.c.bf16 %v293_v50, %v293_v50  ;;  %v301_v53 = vld [vmem:[#allocation2 + $0x50] sm:$0xff]  ;;  %v291_v54 = vld [vmem:[#allocation2] sm:$0xff]  ;;  %225 = vst.msk [vmem:[#allocation2 + $0x30] sm:$0xff] %vm218_vm1, %v458_v51  ;;  %v466_v55 = vpop.f32.mrb[4].mxu1  ;;  %v167_v56 = vpop.f32.mrb[5].mxu0 }
  0xe5   :  { %v435_v57 = vpack.c.bf16 %v301_v53, %v301_v53  ;;  %v425_v58 = vpack.c.bf16 %v291_v54, %v291_v54  ;;  %v299_v59 = vld [vmem:[#allocation2 + $0x40] sm:$0xff]  ;;  %v294_v60 = vld [vmem:[#allocation2 + $0x18] sm:$0xff]  ;;  %233 = vst.msk [vmem:[#allocation2 + $0x70] sm:$0xff] %vm218_vm1, %v466_v55  ;;  %223 = vst.msk [vmem:[#allocation2 + $0x20] sm:$0xff] %vm218_vm1, %v167_v56  ;;  %v199_v61 = vpop.f32.mrb[5].mxu1  ;;  %v459_v62 = vpop.f32.mrb[6].mxu0 }
  0xe6   :  { %374 = vst.msk [vmem:[%s629_s2 + $0x8] sm:$0xf] %vm371_vm2, %v427_v52  ;;  %v433_v63 = vpack.c.bf16 %v299_v59, %v299_v59  ;;  %v428_v0 = vpack.c.bf16 %v294_v60, %v294_v60  ;;  %v302_v1 = vld [vmem:[#allocation2 + $0x58] sm:$0xff]  ;;  %v292_v2 = vld [vmem:[#allocation2 + $0x8] sm:$0xff]  ;;  %v467_v3 = vpop.f32.mrb[6].mxu1  ;;  %v170_v4 = vpop.f32.mrb[7].mxu0 }
  0xe7   :  { %231 = vst.msk [vmem:[#allocation2 + $0x60] sm:$0xff] %vm218_vm1, %v199_v61  ;;  %226 = vst.msk [vmem:[#allocation2 + $0x38] sm:$0xff] %vm218_vm1, %v459_v62  ;;  %v436_v5 = vpack.c.bf16 %v302_v1, %v302_v1  ;;  %v426_v6 = vpack.c.bf16 %v292_v2, %v292_v2  ;;  %v300_v7 = vld [vmem:[#allocation2 + $0x48] sm:$0xff]  ;;  %v202_v8 = vpop.f32.mrb[7].mxu1 }
  0xe8   :  { %382 = vst.msk [vmem:[%s629_s2 + $0x28] sm:$0xf] %vm371_vm2, %v435_v57  ;;  %372 = vst.msk [vmem:[%s629_s2] sm:$0xf] %vm371_vm2, %v425_v58  ;;  %v434_v9 = vpack.c.bf16 %v300_v7, %v300_v7 }
  0xe9   :  { %234 = vst.msk [vmem:[#allocation2 + $0x78] sm:$0xff] %vm218_vm1, %v467_v3  ;;  %224 = vst.msk [vmem:[#allocation2 + $0x28] sm:$0xff] %vm218_vm1, %v170_v4 }
  0xea   :  { %380 = vst.msk [vmem:[%s629_s2 + $0x20] sm:$0xf] %vm371_vm2, %v433_v63  ;;  %375 = vst.msk [vmem:[%s629_s2 + $0xc] sm:$0xf] %vm371_vm2, %v428_v0 }
  0xeb   :  { %232 = vst.msk [vmem:[#allocation2 + $0x68] sm:$0xff] %vm218_vm1, %v202_v8  ;;  %v297_v10 = vld [vmem:[#allocation2 + $0x30] sm:$0xff] }
  0xec   :  { %383 = vst.msk [vmem:[%s629_s2 + $0x2c] sm:$0xf] %vm371_vm2, %v436_v5  ;;  %373 = vst.msk [vmem:[%s629_s2 + $0x4] sm:$0xf] %vm371_vm2, %v426_v6  ;;  %v431_v11 = vpack.c.bf16 %v297_v10, %v297_v10  ;;  %v305_v12 = vld [vmem:[#allocation2 + $0x70] sm:$0xff]  ;;  %v295_v13 = vld [vmem:[#allocation2 + $0x20] sm:$0xff] }
  0xed   :  { %381 = vst.msk [vmem:[%s629_s2 + $0x24] sm:$0xf] %vm371_vm2, %v434_v9  ;;  %v439_v14 = vpack.c.bf16 %v305_v12, %v305_v12  ;;  %v429_v15 = vpack.c.bf16 %v295_v13, %v295_v13 }
  0xee   :  { %v303_v16 = vld [vmem:[#allocation2 + $0x60] sm:$0xff]  ;;  %v298_v17 = vld [vmem:[#allocation2 + $0x38] sm:$0xff]  ;;  %378 = vst.msk [vmem:[%s629_s2 + $0x18] sm:$0xf] %vm371_vm2, %v431_v11 }
  0xef   :  { %v437_v18 = vpack.c.bf16 %v303_v16, %v303_v16  ;;  %v432_v19 = vpack.c.bf16 %v298_v17, %v298_v17  ;;  %386 = vst.msk [vmem:[%s629_s2 + $0x38] sm:$0xf] %vm371_vm2, %v439_v14  ;;  %376 = vst.msk [vmem:[%s629_s2 + $0x10] sm:$0xf] %vm371_vm2, %v429_v15 }
  0xf0   :  { %v306_v20 = vld [vmem:[#allocation2 + $0x78] sm:$0xff]  ;;  %v296_v21 = vld [vmem:[#allocation2 + $0x28] sm:$0xff] }
  0xf1   :  { %v440_v22 = vpack.c.bf16 %v306_v20, %v306_v20  ;;  %v430_v23 = vpack.c.bf16 %v296_v21, %v296_v21  ;;  %384 = vst.msk [vmem:[%s629_s2 + $0x30] sm:$0xf] %vm371_vm2, %v437_v18  ;;  %379 = vst.msk [vmem:[%s629_s2 + $0x1c] sm:$0xf] %vm371_vm2, %v432_v19 }
  0xf2   :  { %v304_v24 = vld [vmem:[#allocation2 + $0x68] sm:$0xff] }
  0xf3   :  { %v438_v25 = vpack.c.bf16 %v304_v24, %v304_v24  ;;  %387 = vst.msk [vmem:[%s629_s2 + $0x3c] sm:$0xf] %vm371_vm2, %v440_v22  ;;  %377 = vst.msk [vmem:[%s629_s2 + $0x14] sm:$0xf] %vm371_vm2, %v430_v23 }
  0xf5   :  { %385 = vst.msk [vmem:[%s629_s2 + $0x34] sm:$0xf] %vm371_vm2, %v438_v25 }

// kernel: _lambda_.23
= control target key start
LH: loop header
LB: loop body
LE: loop exit
PB: predicated region body
PF: predicated region fallthrough
CT: control target
= control target key end

     0   :  { %vm113_vm0 = vcmask 1041408   ;;  %v559_v4 = vmov 0   ;;  %vm88_vm1 = vcmask 31744   ;;  %vm218_vm2 = vcmask 130048   ;;  %s747_s1 = inlined_call_operand.vmem [shape: bf16[4,16], index: 1, kind: input, shape index: {}]   ;;  %s748_s0 = inlined_call_operand.vmem [shape: bf16[128,4], index: 0, kind: input, shape index: {}]   ;;  %s749_s2 = inlined_call_operand.vmem [shape: bf16[128,16], index: 2, kind: input, shape index: {}]   ;;  %s750_s3 = inlined_call_operand.vmem [shape: bf16[128,16], index: 3, kind: output, shape index: {}]  }
   0x1   :  { %v31_v0 = vld [vmem:[%s747_s1] sm:$0x3]  ;;  %v16_v2 = vld [vmem:[%s748_s0 + $0x4] sm:$0xf]  ;;  %v17_v11 = vld [vmem:[%s748_s0 + $0x8] sm:$0xf] }
   0x2   :  { %v15_v1 = vld [vmem:[%s748_s0] sm:$0xf]  ;;  %556 = vmatprep.subr.msk.bf16.mxu0 %vm113_vm0, %v31_v0  ;;  %557 = vmatprep.subr.msk.bf16.mxu1 %vm113_vm0, %v31_v0  ;;  %v115_v3 = vsel %vm113_vm0, %v31_v0, 0  ;;  %v33_v6 = vmax.bf16 %v559_v4, %v16_v2  ;;  %v24_v8 = vld [vmem:[%s748_s0 + $0x24] sm:$0xf]  ;;  %v34_v15 = vmax.bf16 %v559_v4, %v17_v11  ;;  %v520_v46 = vld [vmem:[%s749_s2 + $0x8] sm:$0xff]  }
   0x3   :  { %v32_v5 = vmax.bf16 %v559_v4, %v15_v1  ;;  %v23_v7 = vld [vmem:[%s748_s0 + $0x20] sm:$0xf]  ;;  %537 = vmatpush3.bf16.msra.mxu0 %v115_v3  ;;  %555 = vmatpush3.bf16.msra.mxu1 %v115_v3  ;;  %v41_v10 = vmax.bf16 %v559_v4, %v24_v8  ;;  %v18_v12 = vld [vmem:[%s748_s0 + $0xc] sm:$0xf]  ;;  %v25_v13 = vld [vmem:[%s748_s0 + $0x28] sm:$0xf]  ;;  %v494_v55 = vunpack.c.l.bf16 %v520_v46  ;;  %v495_v59 = vunpack.c.h.bf16 %v520_v46 }
   0x4   :  { %v40_v9 = vmax.bf16 %v559_v4, %v23_v7  ;;  %v35_v16 = vmax.bf16 %v559_v4, %v18_v12  ;;  %v26_v17 = vld [vmem:[%s748_s0 + $0x2c] sm:$0xf]  ;;  %v42_v18 = vmax.bf16 %v559_v4, %v25_v13  ;;  %v19_v19 = vld [vmem:[%s748_s0 + $0x10] sm:$0xf]  ;;  %v20_v20 = vld [vmem:[%s748_s0 + $0x14] sm:$0xf] }
   0x5   :  { %v440_v14 = vcombine.low %v32_v5, %v33_v6  ;;  %v43_v22 = vmax.bf16 %v559_v4, %v26_v17  ;;  %v36_v23 = vmax.bf16 %v559_v4, %v19_v19  ;;  %v37_v24 = vmax.bf16 %v559_v4, %v20_v20  ;;  %v27_v25 = vld [vmem:[%s748_s0 + $0x30] sm:$0xf]  ;;  %v28_v26 = vld [vmem:[%s748_s0 + $0x34] sm:$0xf]  ;;  %v21_v27 = vld [vmem:[%s748_s0 + $0x18] sm:$0xf] }
   0x6   :  { %v444_v21 = vcombine.low %v40_v9, %v41_v10  ;;  %v441_v28 = vcombine.low %v34_v15, %v35_v16  ;;  %v44_v29 = vmax.bf16 %v559_v4, %v27_v25  ;;  %v45_v30 = vmax.bf16 %v559_v4, %v28_v26  ;;  %v22_v31 = vld [vmem:[%s748_s0 + $0x1c] sm:$0xf]  ;;  %v29_v32 = vld [vmem:[%s748_s0 + $0x38] sm:$0xf]  ;;  %v524_v49 = vld [vmem:[%s749_s2 + $0x28] sm:$0xff]  }
   0x7   :  { %538 = vmatprep.mubr.msk.bf16.mxu0 %vm88_vm1, %v440_v14  ;;  %v30_v33 = vld [vmem:[%s748_s0 + $0x3c] sm:$0xf]  ;;  %v445_v34 = vcombine.low %v42_v18, %v43_v22  ;;  %v442_v35 = vcombine.low %v36_v23, %v37_v24  ;;  %v38_v37 = vmax.bf16 %v559_v4, %v21_v27  ;;  %v39_v38 = vmax.bf16 %v559_v4, %v22_v31  ;;  %v489_v50 = vld [vmem:[%s749_s2] sm:$0xff]   ;;  %v521_v19 = vld [vmem:[%s749_s2 + $0x10] sm:$0xff]  }
   0x8   :  { %546 = vmatprep.mubr.msk.bf16.mxu1 %vm88_vm1, %v444_v21  ;;  %539 = vmatmul.mubr.msk.bf16.vlgmr.msra.gmra.mrb[0].mxu0 %vm88_vm1, %v441_v28  ;;  %v446_v36 = vcombine.low %v44_v29, %v45_v30  ;;  %v46_v39 = vmax.bf16 %v559_v4, %v29_v32  ;;  %v47_v40 = vmax.bf16 %v559_v4, %v30_v33  ;;  %v523_v53 = vld [vmem:[%s749_s2 + $0x20] sm:$0xff]   ;;  %v510_v56 = vunpack.c.l.bf16 %v524_v49  ;;  %v663_v4 = vld [vmem:[%s749_s2 + $0x18] sm:$0xff]   ;;  %v525_v27 = vld [vmem:[%s749_s2 + $0x30] sm:$0xff]  }
   0x9   :  { %547 = vmatmul.mubr.msk.bf16.vlgmr.msra.gmra.mrb[0].mxu1 %vm88_vm1, %v445_v34  ;;  %542 = vmatprep.mubr.msk.bf16.mxu0 %vm88_vm1, %v442_v35  ;;  %v443_v41 = vcombine.low %v38_v37, %v39_v38  ;;  %v490_v57 = vunpack.c.l.bf16 %v489_v50  ;;  %v506_v58 = vunpack.c.l.bf16 %v523_v53  ;;  %v511_v61 = vunpack.c.h.bf16 %v524_v49  ;;  %v526_v11 = vld [vmem:[%s749_s2 + $0x38] sm:$0xff]  }
   0xa   :  { %550 = vmatprep.mubr.msk.bf16.mxu1 %vm88_vm1, %v446_v36  ;;  %v447_v42 = vcombine.low %v46_v39, %v47_v40  ;;  %v491_v62 = vunpack.c.h.bf16 %v489_v50  ;;  %v507_v3 = vunpack.c.h.bf16 %v523_v53  ;;  %vm419_vm3 = vcmask 125952  }
   0xb   :  { %v502_v32 = vunpack.c.l.bf16 %v663_v4  ;;  %v518_v35 = vunpack.c.l.bf16 %v526_v11  ;;  %v498_v36 = vunpack.c.l.bf16 %v521_v19  ;;  %v514_v38 = vunpack.c.l.bf16 %v525_v27 }
   0xc   :  { %v503_v39 = vunpack.c.h.bf16 %v663_v4  ;;  %v515_v46 = vunpack.c.h.bf16 %v525_v27 }
  0x10   :  { %543 = vmatmul.mubr.msk.bf16.gmra.mrb[4].mxu0 %vm88_vm1, %v443_v41  ;;  %v519_v41 = vunpack.c.h.bf16 %v526_v11 }
  0x11   :  { %551 = vmatmul.mubr.msk.bf16.gmra.mrb[4].mxu1 %vm88_vm1, %v447_v42  ;;  %v499_v42 = vunpack.c.h.bf16 %v521_v19 }
  0xdb   :  { %v540_v43 = vpop.f32.mrb[0].mxu0 }
  0xdc   :  { %221 = vst.msk [vmem:[#allocation2 + $0x10] sm:$0xff] %vm218_vm2, %v540_v43  ;;  %v548_v44 = vpop.f32.mrb[0].mxu1  ;;  %v151_v45 = vpop.f32.mrb[1].mxu0 }
  0xdd   :  { %229 = vst.msk [vmem:[#allocation2 + $0x50] sm:$0xff] %vm218_vm2, %v548_v44  ;;  %219 = vst.msk [vmem:[#allocation2] sm:$0xff] %vm218_vm2, %v151_v45  ;;  %v183_v47 = vpop.f32.mrb[1].mxu1  ;;  %v541_v48 = vpop.f32.mrb[2].mxu0 }
  0xde   :  { %227 = vst.msk [vmem:[#allocation2 + $0x40] sm:$0xff] %vm218_vm2, %v183_v47  ;;  %222 = vst.msk [vmem:[#allocation2 + $0x18] sm:$0xff] %vm218_vm2, %v541_v48  ;;  %v549_v51 = vpop.f32.mrb[2].mxu1  ;;  %v154_v52 = vpop.f32.mrb[3].mxu0 }
  0xdf   :  { %230 = vst.msk [vmem:[#allocation2 + $0x58] sm:$0xff] %vm218_vm2, %v549_v51  ;;  %220 = vst.msk [vmem:[#allocation2 + $0x8] sm:$0xff] %vm218_vm2, %v154_v52  ;;  %v186_v54 = vpop.f32.mrb[3].mxu1 }
  0xe0   :  { %228 = vst.msk [vmem:[#allocation2 + $0x48] sm:$0xff] %vm218_vm2, %v186_v54 }
  0xe3   :  { %v293_v60 = vld [vmem:[#allocation2 + $0x10] sm:$0xff]  ;;  %v544_v63 = vpop.f32.mrb[4].mxu0 }
  0xe4   :  { %v341_v0 = vadd.f32 %v494_v55, %v293_v60  ;;  %v301_v1 = vld [vmem:[#allocation2 + $0x50] sm:$0xff]  ;;  %v291_v2 = vld [vmem:[#allocation2] sm:$0xff]  ;;  %225 = vst.msk [vmem:[#allocation2 + $0x30] sm:$0xff] %vm218_vm2, %v544_v63  ;;  %v552_v5 = vpop.f32.mrb[4].mxu1  ;;  %v167_v6 = vpop.f32.mrb[5].mxu0 }
  0xe5   :  { %v349_v7 = vadd.f32 %v510_v56, %v301_v1  ;;  %v339_v8 = vadd.f32 %v490_v57, %v291_v2  ;;  %v299_v9 = vld [vmem:[#allocation2 + $0x40] sm:$0xff]  ;;  %v294_v10 = vld [vmem:[#allocation2 + $0x18] sm:$0xff]  ;;  %233 = vst.msk [vmem:[#allocation2 + $0x70] sm:$0xff] %vm218_vm2, %v552_v5  ;;  %223 = vst.msk [vmem:[#allocation2 + $0x20] sm:$0xff] %vm218_vm2, %v167_v6  ;;  %v199_v12 = vpop.f32.mrb[5].mxu1  ;;  %v545_v13 = vpop.f32.mrb[6].mxu0 }
  0xe6   :  { %v474_v14 = vpack.c.bf16 %v341_v0, %v341_v0  ;;  %v347_v15 = vadd.f32 %v506_v58, %v299_v9  ;;  %v342_v16 = vadd.f32 %v495_v59, %v294_v10  ;;  %v302_v17 = vld [vmem:[#allocation2 + $0x58] sm:$0xff]  ;;  %v292_v18 = vld [vmem:[#allocation2 + $0x8] sm:$0xff]  ;;  %231 = vst.msk [vmem:[#allocation2 + $0x60] sm:$0xff] %vm218_vm2, %v199_v12  ;;  %226 = vst.msk [vmem:[#allocation2 + $0x38] sm:$0xff] %vm218_vm2, %v545_v13  ;;  %v553_v20 = vpop.f32.mrb[6].mxu1  ;;  %v170_v21 = vpop.f32.mrb[7].mxu0 }
  0xe7   :  { %v482_v22 = vpack.c.bf16 %v349_v7, %v349_v7  ;;  %v472_v23 = vpack.c.bf16 %v339_v8, %v339_v8  ;;  %v350_v24 = vadd.f32 %v511_v61, %v302_v17  ;;  %v340_v25 = vadd.f32 %v491_v62, %v292_v18  ;;  %v300_v26 = vld [vmem:[#allocation2 + $0x48] sm:$0xff]  ;;  %234 = vst.msk [vmem:[#allocation2 + $0x78] sm:$0xff] %vm218_vm2, %v553_v20  ;;  %v202_v28 = vpop.f32.mrb[7].mxu1 }
  0xe8   :  { %224 = vst.msk [vmem:[#allocation2 + $0x28] sm:$0xff] %vm218_vm2, %v170_v21  ;;  %v480_v29 = vpack.c.bf16 %v347_v15, %v347_v15  ;;  %v475_v30 = vpack.c.bf16 %v342_v16, %v342_v16  ;;  %v348_v31 = vadd.f32 %v507_v3, %v300_v26  ;;  %232 = vst.msk [vmem:[#allocation2 + $0x68] sm:$0xff] %vm218_vm2, %v202_v28 }
  0xe9   :  { %422 = vst.msk [vmem:[%s750_s3 + $0x8] sm:$0xf] %vm419_vm3, %v474_v14  ;;  %430 = vst.msk [vmem:[%s750_s3 + $0x28] sm:$0xf] %vm419_vm3, %v482_v22  ;;  %v483_v33 = vpack.c.bf16 %v350_v24, %v350_v24  ;;  %v473_v34 = vpack.c.bf16 %v340_v25, %v340_v25 }
  0xea   :  { %420 = vst.msk [vmem:[%s750_s3] sm:$0xf] %vm419_vm3, %v472_v23  ;;  %428 = vst.msk [vmem:[%s750_s3 + $0x20] sm:$0xf] %vm419_vm3, %v480_v29  ;;  %v481_v37 = vpack.c.bf16 %v348_v31, %v348_v31 }
  0xeb   :  { %423 = vst.msk [vmem:[%s750_s3 + $0xc] sm:$0xf] %vm419_vm3, %v475_v30  ;;  %431 = vst.msk [vmem:[%s750_s3 + $0x2c] sm:$0xf] %vm419_vm3, %v483_v33  ;;  %v297_v40 = vld [vmem:[#allocation2 + $0x30] sm:$0xff] }
  0xec   :  { %421 = vst.msk [vmem:[%s750_s3 + $0x4] sm:$0xf] %vm419_vm3, %v473_v34  ;;  %429 = vst.msk [vmem:[%s750_s3 + $0x24] sm:$0xf] %vm419_vm3, %v481_v37  ;;  %v345_v43 = vadd.f32 %v502_v32, %v297_v40  ;;  %v305_v44 = vld [vmem:[#allocation2 + $0x70] sm:$0xff]  ;;  %v295_v45 = vld [vmem:[#allocation2 + $0x20] sm:$0xff] }
  0xed   :  { %v353_v47 = vadd.f32 %v518_v35, %v305_v44  ;;  %v343_v48 = vadd.f32 %v498_v36, %v295_v45  ;;  %v303_v49 = vld [vmem:[#allocation2 + $0x60] sm:$0xff]  ;;  %v298_v50 = vld [vmem:[#allocation2 + $0x38] sm:$0xff] }
  0xee   :  { %v478_v51 = vpack.c.bf16 %v345_v43, %v345_v43  ;;  %v351_v52 = vadd.f32 %v514_v38, %v303_v49  ;;  %v346_v53 = vadd.f32 %v503_v39, %v298_v50  ;;  %v306_v54 = vld [vmem:[#allocation2 + $0x78] sm:$0xff] }
  0xef   :  { %v296_v55 = vld [vmem:[#allocation2 + $0x28] sm:$0xff]  ;;  %v486_v56 = vpack.c.bf16 %v353_v47, %v353_v47  ;;  %v476_v57 = vpack.c.bf16 %v343_v48, %v343_v48  ;;  %v354_v58 = vadd.f32 %v519_v41, %v306_v54 }
  0xf0   :  { %v344_v59 = vadd.f32 %v499_v42, %v296_v55  ;;  %v304_v60 = vld [vmem:[#allocation2 + $0x68] sm:$0xff]  ;;  %426 = vst.msk [vmem:[%s750_s3 + $0x18] sm:$0xf] %vm419_vm3, %v478_v51  ;;  %v484_v61 = vpack.c.bf16 %v351_v52, %v351_v52  ;;  %v479_v62 = vpack.c.bf16 %v346_v53, %v346_v53 }
  0xf1   :  { %v352_v63 = vadd.f32 %v515_v46, %v304_v60  ;;  %434 = vst.msk [vmem:[%s750_s3 + $0x38] sm:$0xf] %vm419_vm3, %v486_v56  ;;  %424 = vst.msk [vmem:[%s750_s3 + $0x10] sm:$0xf] %vm419_vm3, %v476_v57  ;;  %v487_v0 = vpack.c.bf16 %v354_v58, %v354_v58 }
  0xf2   :  { %v477_v1 = vpack.c.bf16 %v344_v59, %v344_v59  ;;  %432 = vst.msk [vmem:[%s750_s3 + $0x30] sm:$0xf] %vm419_vm3, %v484_v61  ;;  %427 = vst.msk [vmem:[%s750_s3 + $0x1c] sm:$0xf] %vm419_vm3, %v479_v62 }
  0xf3   :  { %v485_v2 = vpack.c.bf16 %v352_v63, %v352_v63  ;;  %435 = vst.msk [vmem:[%s750_s3 + $0x3c] sm:$0xf] %vm419_vm3, %v487_v0 }
  0xf4   :  { %425 = vst.msk [vmem:[%s750_s3 + $0x14] sm:$0xf] %vm419_vm3, %v477_v1 }
  0xf5   :  { %433 = vst.msk [vmem:[%s750_s3 + $0x34] sm:$0xf] %vm419_vm3, %v485_v2 }

// kernel: _lambda_.25
= control target key start
LH: loop header
LB: loop body
LE: loop exit
PB: predicated region body
PF: predicated region fallthrough
CT: control target
= control target key end

     0   :  { %v1156_v2 = vmov 0.0   ;;  %vm1157_vm0 = vmmov 0   ;;  %v1158_v3 = vmov 0   ;;  %s1159_s16 = smov 127   ;;  %s1160_s17 = smov 126   ;;  %vm43_vm1 = vcmask 1043456   ;;  %s1335_s0 = inlined_call_operand.vmem [shape: bf16[8,398], index: 0, kind: input, shape index: {}]   ;;  %s1336_s1 = inlined_call_operand.vmem [shape: bf16[9,8,8], index: 1, kind: input, shape index: {}]   ;;  %s1337_s2 = inlined_call_operand.vmem [shape: bf16[8,360], index: 2, kind: input, shape index: {}]   ;;  %s1338_s3 = inlined_call_operand.vmem [shape: bf16[8,360], index: 3, kind: output, shape index: {}]  }
   0x1   :  { %v16_v0 = vld [vmem:[%s1335_s0 + $0x8] sm:$0xf]  ;;  %v15_v1 = vld [vmem:[%s1335_s0] sm:$0xff]  ;;  %1091 = vmatprep.subr.bf16.mxu1 %v1156_v2  ;;  %1093 = vmatprep.mubr.msk.bf16.mxu1 %vm1157_vm0, %v1156_v2  ;;  %s1161_s18 = smov 110   ;;  %s1162_s19 = smov 109   ;;  %vm39_vm2 = vcmask 64512  }
   0x2   :  { %v18_v4 = vmax.bf16 %v1158_v3, %v16_v0  ;;  %v17_v5 = vmax.bf16 %v1158_v3, %v15_v1  ;;  %85 = vmatprep.mubr.bf16.mxu0 %v1158_v3  ;;  %v656_v9 = vld [vmem:[%s1335_s0 + $0x8] sm:$0xff]  ;;  %s1163_s22 = smov 108   ;;  %s1164_s23 = smov 92   ;;  %v1027_v16 = vld [vmem:[%s1336_s1 + $0x4] sm:$0xf]  ;;  %vm36_vm3 = vcmask 1039360  }
   0x3   :  { %v658_v10 = vmax.bf16 %v1158_v3, %v656_v9  ;;  %s1165_s24 = smov 91   ;;  %s1166_s0 = smov 90   ;;  %vm235_vm4 = vcmask 1031168   ;;  %v19_v27 = vld [vmem:[%s1336_s1] sm:$0xf]  ;;  %vm342_vm5 = vcmask 900096  }
   0x4   :  { %v1030_v6 = vcombine.low %v18_v4, %v18_v4  ;;  %v1199_v7 = vcombine.low %v17_v5, %v17_v5  ;;  %v1029_v8 = vcombine.high %v17_v5, %v17_v5  ;;  %v1037_v36 = vld [vmem:[%s1336_s1 + $0x8] sm:$0xf]  ;;  %vm449_vm6 = vcmask 891904   ;;  %v1041_v45 = vld [vmem:[%s1336_s1 + $0xc] sm:$0xf] }
   0x5   :  { %v1056_v11 = vcombine.low %v658_v10, %v658_v10  ;;  %v1057_v12 = vcombine.high %v658_v10, %v658_v10  ;;  %vm556_vm7 = vcmask 883712   ;;  %v1045_v54 = vld [vmem:[%s1336_s1 + $0x10] sm:$0xf]  ;;  %vm679_vm8 = vcmask 752640   ;;  %v1049_v0 = vld [vmem:[%s1336_s1 + $0x14] sm:$0xf] }
   0x6   :  { %34 = vrot.lane.b32.xlu1 %v1030_v6, %s1159_s16  ;;  %30 = vrot.lane.b32.xlu0 %v1199_v7, %s1159_s16  ;;  %v144_v17 = vsel %vm43_vm1, %v1030_v6, 0  ;;  %v138_v23 = vsel %vm43_vm1, %v1199_v7, 0  ;;  %vm789_vm9 = vcmask 744448   ;;  %vm899_vm10 = vcmask 736256  }
   0x7   :  { %vm1021_vm11 = vcmask 846848  }
   0xa   :  { %32 = vrot.lane.b32.xlu0 %v1029_v8, %s1159_s16  ;;  %229 = vrot.lane.b32.xlu1 %v1199_v7, %s1160_s17 }
   0xe   :  { %231 = vrot.lane.b32.xlu0 %v1029_v8, %s1160_s17  ;;  %233 = vrot.lane.b32.xlu1 %v1030_v6, %s1160_s17 }
  0x12   :  { %336 = vrot.lane.b32.xlu0 %v1199_v7, %s1161_s18  ;;  %338 = vrot.lane.b32.xlu1 %v1029_v8, %s1161_s18 }
  0x16   :  { %340 = vrot.lane.b32.xlu0 %v1030_v6, %s1161_s18  ;;  %443 = vrot.lane.b32.xlu1 %v1199_v7, %s1162_s19 }
  0x1a   :  { %445 = vrot.lane.b32.xlu0 %v1029_v8, %s1162_s19  ;;  %447 = vrot.lane.b32.xlu1 %v1030_v6, %s1162_s19 }
  0x1e   :  { %550 = vrot.lane.b32.xlu0 %v1199_v7, %s1163_s22  ;;  %552 = vrot.lane.b32.xlu1 %v1029_v8, %s1163_s22 }
  0x22   :  { %554 = vrot.lane.b32.xlu0 %v1030_v6, %s1163_s22  ;;  %671 = vrot.lane.b32.xlu1 %v1199_v7, %s1164_s23 }
  0x26   :  { %673 = vrot.lane.b32.xlu0 %v1029_v8, %s1164_s23  ;;  %675 = vrot.lane.b32.xlu1 %v1056_v11, %s1164_s23 }
  0x2a   :  { %677 = vrot.lane.b32.xlu0 %v1057_v12, %s1164_s23  ;;  %781 = vrot.lane.b32.xlu1 %v1199_v7, %s1165_s24 }
  0x2e   :  { %783 = vrot.lane.b32.xlu0 %v1029_v8, %s1165_s24  ;;  %785 = vrot.lane.b32.xlu1 %v1056_v11, %s1165_s24 }
  0x32   :  { %787 = vrot.lane.b32.xlu0 %v1057_v12, %s1165_s24  ;;  %891 = vrot.lane.b32.xlu1 %v1199_v7, %s1166_s0 }
  0x36   :  { %893 = vrot.lane.b32.xlu0 %v1029_v8, %s1166_s0  ;;  %895 = vrot.lane.b32.xlu1 %v1056_v11, %s1166_s0  ;;  %v1053_v11 = vld [vmem:[%s1336_s1 + $0x18] sm:$0xf] }
  0x3a   :  { %897 = vrot.lane.b32.xlu0 %v1057_v12, %s1166_s0 }
  0x78   :  { %v35_v13 = vpop.permute.xlu1 %34  ;;  %v31_v14 = vpop.permute.xlu0 %30 }
  0x79   :  { %v51_v15 = vsel %vm43_vm1, %v35_v13, 0 }
  0x7a   :  { %1092 = vmatpush3.bf16.msra.mxu1 %v51_v15 }
  0x7b   :  { %1097 = vmatprep.subr.bf16.mxu1 %v1156_v2 }
  0x7c   :  { %v33_v18 = vpop.permute.xlu0 %32  ;;  %v230_v19 = vpop.permute.xlu1 %229 }
  0x7d   :  { %1094 = vmatmul.mubr.msk.bf16.vlgmr.msra.gmra.mrb[0].mxu1 %vm39_vm2, %v1027_v16  ;;  %v38_v20 = vsel %vm36_vm3, %v33_v18, %v35_v13  ;;  %v37_v21 = vsel %vm36_vm3, %v31_v14, %v33_v18 }
  0x7e   :  { %1031 = vmatprep.subr.msk.bf16.mxu0 %vm43_vm1, %v38_v20  ;;  %v45_v22 = vsel %vm43_vm1, %v37_v21, 0  ;;  %1098 = vmatpush3.bf16.msra.mxu1 %v144_v17 }
  0x7f   :  { %54 = vmatpush1.bf16.msra.mxu0 %v45_v22  ;;  %1099 = vmatprep.mubr.msk.bf16.mxu1 %vm1157_vm0, %v1156_v2 }
  0x80   :  { %1034 = vmatprep.subr.msk.bf16.mxu0 %vm43_vm1, %v1029_v8  ;;  %v232_v24 = vpop.permute.xlu0 %231  ;;  %v234_v25 = vpop.permute.xlu1 %233  ;;  %1103 = vmatprep.subr.bf16.mxu1 %v1156_v2 }
  0x81   :  { %v237_v26 = vsel %vm235_vm4, %v232_v24, %v234_v25  ;;  %v248_v28 = vsel %vm43_vm1, %v234_v25, 0  ;;  %v236_v31 = vsel %vm235_vm4, %v230_v19, %v232_v24  ;;  %v1061_v19 = vld [vmem:[%s1336_s1 + $0x1c] sm:$0xf] }
  0x82   :  { %1032 = vmatmul.mubr.msk.bf16.vlgmr.msra.gmra.mrb[0].mxu0 %vm39_vm2, %v1027_v16  ;;  %v242_v32 = vsel %vm43_vm1, %v236_v31, 0 }
  0x83   :  { %147 = vmatpush1.bf16.msra.mxu0 %v138_v23  ;;  %178 = vmatprep.mubr.bf16.mxu0 %v1158_v3  ;;  %v1065_v23 = vld [vmem:[%s1336_s1 + $0x20] sm:$0xf] }
  0x84   :  { %1038 = vmatprep.subr.msk.bf16.mxu0 %vm43_vm1, %v237_v26  ;;  %v337_v29 = vpop.permute.xlu0 %336  ;;  %v339_v30 = vpop.permute.xlu1 %338 }
  0x85   :  { %1100 = vmatmul.mubr.msk.bf16.vlgmr.msra.gmra.mrb[4].mxu1 %vm39_vm2, %v19_v27  ;;  %v343_v40 = vsel %vm342_vm5, %v337_v29, %v339_v30 }
  0x86   :  { %1104 = vmatpush3.bf16.msra.mxu1 %v248_v28  ;;  %1105 = vmatprep.mubr.msk.bf16.mxu1 %vm1157_vm0, %v1156_v2  ;;  %v349_v41 = vsel %vm43_vm1, %v343_v40, 0 }
  0x87   :  { %1109 = vmatprep.subr.bf16.mxu1 %v1156_v2 }
  0x88   :  { %v341_v33 = vpop.permute.xlu0 %340  ;;  %v444_v34 = vpop.permute.xlu1 %443 }
  0x89   :  { %v344_v35 = vsel %vm342_vm5, %v339_v30, %v341_v33  ;;  %v355_v37 = vsel %vm43_vm1, %v341_v33, 0 }
  0x8a   :  { %1035 = vmatmul.mubr.msk.bf16.vlgmr.msra.gmra.mrb[4].mxu0 %vm39_vm2, %v19_v27 }
  0x8b   :  { %251 = vmatpush1.bf16.msra.mxu0 %v242_v32  ;;  %282 = vmatprep.mubr.bf16.mxu0 %v1158_v3 }
  0x8c   :  { %1042 = vmatprep.subr.msk.bf16.mxu0 %vm43_vm1, %v344_v35  ;;  %v446_v38 = vpop.permute.xlu0 %445  ;;  %v448_v39 = vpop.permute.xlu1 %447 }
  0x8d   :  { %1106 = vmatmul.mubr.msk.bf16.vlgmr.msra.gmra.mrb[8].mxu1 %vm39_vm2, %v1037_v36  ;;  %v451_v44 = vsel %vm449_vm6, %v446_v38, %v448_v39  ;;  %v462_v46 = vsel %vm43_vm1, %v448_v39, 0  ;;  %v450_v49 = vsel %vm449_vm6, %v444_v34, %v446_v38 }
  0x8e   :  { %1110 = vmatpush3.bf16.msra.mxu1 %v355_v37  ;;  %1111 = vmatprep.mubr.msk.bf16.mxu1 %vm1157_vm0, %v1156_v2  ;;  %v456_v50 = vsel %vm43_vm1, %v450_v49, 0 }
  0x8f   :  { %1115 = vmatprep.subr.bf16.mxu1 %v1156_v2 }
  0x90   :  { %v551_v42 = vpop.permute.xlu0 %550  ;;  %v553_v43 = vpop.permute.xlu1 %552 }
  0x91   :  { %v557_v58 = vsel %vm556_vm7, %v551_v42, %v553_v43 }
  0x92   :  { %1039 = vmatmul.mubr.msk.bf16.vlgmr.msra.gmra.mrb[8].mxu0 %vm39_vm2, %v1037_v36  ;;  %v563_v59 = vsel %vm43_vm1, %v557_v58, 0 }
  0x93   :  { %358 = vmatpush1.bf16.msra.mxu0 %v349_v41  ;;  %389 = vmatprep.mubr.bf16.mxu0 %v1158_v3 }
  0x94   :  { %1046 = vmatprep.subr.msk.bf16.mxu0 %vm43_vm1, %v451_v44  ;;  %v555_v47 = vpop.permute.xlu0 %554  ;;  %v672_v48 = vpop.permute.xlu1 %671 }
  0x95   :  { %1112 = vmatmul.mubr.msk.bf16.vlgmr.msra.gmra.mrb[12].mxu1 %vm39_vm2, %v1041_v45  ;;  %v558_v53 = vsel %vm556_vm7, %v553_v43, %v555_v47  ;;  %v569_v55 = vsel %vm43_vm1, %v555_v47, 0 }
  0x96   :  { %1116 = vmatpush3.bf16.msra.mxu1 %v462_v46  ;;  %1117 = vmatprep.mubr.msk.bf16.mxu1 %vm1157_vm0, %v1156_v2 }
  0x97   :  { %1121 = vmatprep.subr.bf16.mxu1 %v1156_v2 }
  0x98   :  { %v674_v51 = vpop.permute.xlu0 %673  ;;  %v676_v52 = vpop.permute.xlu1 %675 }
  0x99   :  { %v681_v62 = vsel %vm679_vm8, %v674_v51, %v676_v52  ;;  %v680_v5 = vsel %vm679_vm8, %v672_v48, %v674_v51 }
  0x9a   :  { %1043 = vmatmul.mubr.msk.bf16.vlgmr.msra.gmra.mrb[12].mxu0 %vm39_vm2, %v1041_v45  ;;  %v687_v7 = vsel %vm43_vm1, %v680_v5, 0 }
  0x9b   :  { %465 = vmatpush1.bf16.msra.mxu0 %v456_v50  ;;  %496 = vmatprep.mubr.bf16.mxu0 %v1158_v3 }
  0x9c   :  { %1050 = vmatprep.subr.msk.bf16.mxu0 %vm43_vm1, %v558_v53  ;;  %v678_v56 = vpop.permute.xlu0 %677  ;;  %v782_v57 = vpop.permute.xlu1 %781 }
  0x9d   :  { %1118 = vmatmul.mubr.msk.bf16.vlgmr.msra.gmra.mrb[16].mxu1 %vm39_vm2, %v1045_v54  ;;  %v682_v60 = vsel %vm679_vm8, %v676_v52, %v678_v56 }
  0x9e   :  { %1122 = vmatpush3.bf16.msra.mxu1 %v569_v55  ;;  %1123 = vmatprep.mubr.msk.bf16.mxu1 %vm1157_vm0, %v1156_v2  ;;  %v693_v1 = vsel %vm43_vm1, %v682_v60, 0 }
  0x9f   :  { %1127 = vmatprep.subr.bf16.mxu1 %v1156_v2 }
  0xa0   :  { %v784_v61 = vpop.permute.xlu0 %783  ;;  %v786_v63 = vpop.permute.xlu1 %785 }
  0xa1   :  { %v791_v10 = vsel %vm789_vm9, %v784_v61, %v786_v63  ;;  %v790_v13 = vsel %vm789_vm9, %v782_v57, %v784_v61 }
  0xa2   :  { %1047 = vmatmul.mubr.msk.bf16.vlgmr.msra.gmra.mrb[16].mxu0 %vm39_vm2, %v1045_v54  ;;  %v797_v16 = vsel %vm43_vm1, %v790_v13, 0 }
  0xa3   :  { %572 = vmatpush1.bf16.msra.mxu0 %v563_v59  ;;  %603 = vmatprep.mubr.bf16.mxu0 %v1158_v3 }
  0xa4   :  { %1058 = vmatprep.subr.msk.bf16.mxu0 %vm43_vm1, %v681_v62  ;;  %v788_v4 = vpop.permute.xlu0 %787  ;;  %v892_v6 = vpop.permute.xlu1 %891 }
  0xa5   :  { %1124 = vmatmul.mubr.msk.bf16.vlgmr.msra.gmra.mrb[20].mxu1 %vm39_vm2, %v1049_v0  ;;  %v792_v8 = vsel %vm789_vm9, %v786_v63, %v788_v4 }
  0xa6   :  { %1128 = vmatpush3.bf16.msra.mxu1 %v693_v1  ;;  %1129 = vmatprep.mubr.msk.bf16.mxu1 %vm1157_vm0, %v1156_v2  ;;  %v803_v12 = vsel %vm43_vm1, %v792_v8, 0 }
  0xa7   :  { %1133 = vmatprep.subr.bf16.mxu1 %v1156_v2 }
  0xa8   :  { %v894_v9 = vpop.permute.xlu0 %893  ;;  %v896_v14 = vpop.permute.xlu1 %895 }
  0xa9   :  { %v901_v18 = vsel %vm899_vm10, %v894_v9, %v896_v14  ;;  %v900_v21 = vsel %vm899_vm10, %v892_v6, %v894_v9 }
  0xaa   :  { %1051 = vmatmul.mubr.msk.bf16.vlgmr.msra.gmra.mrb[20].mxu0 %vm39_vm2, %v1049_v0  ;;  %v907_v22 = vsel %vm43_vm1, %v900_v21, 0 }
  0xab   :  { %696 = vmatpush1.bf16.msra.mxu0 %v687_v7  ;;  %727 = vmatprep.mubr.bf16.mxu0 %v1158_v3 }
  0xac   :  { %1062 = vmatprep.subr.msk.bf16.mxu0 %vm43_vm1, %v791_v10  ;;  %v898_v15 = vpop.permute.xlu0 %897 }
  0xad   :  { %1130 = vmatmul.mubr.msk.bf16.vlgmr.msra.gmra.mrb[24].mxu1 %vm39_vm2, %v1053_v11  ;;  %v902_v17 = vsel %vm899_vm10, %v896_v14, %v898_v15 }
  0xae   :  { %1134 = vmatpush3.bf16.msra.mxu1 %v803_v12  ;;  %1135 = vmatprep.mubr.msk.bf16.mxu1 %vm1157_vm0, %v1156_v2  ;;  %v913_v20 = vsel %vm43_vm1, %v902_v17, 0 }
  0xaf   :  { %1139 = vmatprep.subr.bf16.mxu1 %v1156_v2 }
  0xb2   :  { %1059 = vmatmul.mubr.msk.bf16.vlgmr.msra.gmra.mrb[24].mxu0 %vm39_vm2, %v1053_v11 }
  0xb3   :  { %806 = vmatpush1.bf16.msra.mxu0 %v797_v16  ;;  %837 = vmatprep.mubr.bf16.mxu0 %v1158_v3 }
  0xb4   :  { %1066 = vmatprep.subr.msk.bf16.mxu0 %vm43_vm1, %v901_v18 }
  0xb5   :  { %1136 = vmatmul.mubr.msk.bf16.vlgmr.msra.gmra.mrb[28].mxu1 %vm39_vm2, %v1061_v19 }
  0xb6   :  { %1140 = vmatpush3.bf16.msra.mxu1 %v913_v20  ;;  %1141 = vmatprep.mubr.msk.bf16.mxu1 %vm1157_vm0, %v1156_v2 }
  0xba   :  { %1063 = vmatmul.mubr.msk.bf16.vlgmr.msra.gmra.mrb[28].mxu0 %vm39_vm2, %v1061_v19 }
  0xbb   :  { %916 = vmatpush1.bf16.msra.mxu0 %v907_v22  ;;  %947 = vmatprep.mubr.bf16.mxu0 %v1158_v3 }
  0xbd   :  { %1142 = vmatmul.mubr.msk.bf16.vlgmr.msra.gmra.mrb[32].mxu1 %vm39_vm2, %v1065_v23 }
  0xc2   :  { %1067 = vmatmul.mubr.msk.bf16.vlgmr.msra.gmra.mrb[32].mxu0 %vm39_vm2, %v1065_v23 }
 0x150   :  { %v128_v24 = vpop.f32.mrb[0].mxu1 }
 0x151   :  { %v1095_v25 = vpop.f32.mrb[1].mxu1 }
 0x152   :  { %v131_v26 = vpop.f32.mrb[2].mxu1 }
 0x153   :  { %v1096_v27 = vpop.f32.mrb[3].mxu1 }
 0x155   :  { %v87_v2 = vpop.f32.mrb[0].mxu0 }
 0x156   :  { %v89_v28 = vpop.f32.mrb[1].mxu0 }
 0x157   :  { %v91_v29 = vpop.f32.mrb[2].mxu0 }
 0x158   :  { %v92_v30 = vpop.f32.mrb[3].mxu0  ;;  %v221_v31 = vpop.f32.mrb[4].mxu1 }
 0x159   :  { %v222_v32 = vadd.f32 %v221_v31, %v128_v24  ;;  %v1101_v33 = vpop.f32.mrb[5].mxu1 }
 0x15a   :  { %v224_v34 = vpop.f32.mrb[6].mxu1 }
 0x15b   :  { %v1102_v35 = vpop.f32.mrb[7].mxu1 }
 0x15d   :  { %v180_v36 = vpop.f32.mrb[4].mxu0 }
 0x15e   :  { %v181_v37 = vadd.f32 %v180_v36, %v87_v2  ;;  %v182_v3 = vpop.f32.mrb[5].mxu0 }
 0x15f   :  { %v183_v38 = vadd.f32 %v182_v3, %v89_v28  ;;  %v184_v39 = vpop.f32.mrb[6].mxu0  ;;  %v1000_v3 = vld [vmem:[%s1337_s2 + $0x8] sm:$0xf] }
 0x160   :  { %v185_v40 = vpop.f32.mrb[7].mxu0  ;;  %v325_v41 = vpop.f32.mrb[8].mxu1 }
 0x161   :  { %v333_v42 = vadd.f32 %v325_v41, %v222_v32  ;;  %v1107_v43 = vpop.f32.mrb[9].mxu1 }
 0x162   :  { %v328_v44 = vpop.f32.mrb[10].mxu1  ;;  %v1003_v43 = vunpack.c.l.bf16 %v1000_v3 }
 0x163   :  { %v1108_v45 = vpop.f32.mrb[11].mxu1 }
 0x165   :  { %v284_v46 = vpop.f32.mrb[8].mxu0 }
 0x166   :  { %v331_v47 = vadd.f32 %v284_v46, %v181_v37  ;;  %v286_v48 = vpop.f32.mrb[9].mxu0 }
 0x167   :  { %v332_v49 = vadd.f32 %v286_v48, %v183_v38  ;;  %v288_v50 = vpop.f32.mrb[10].mxu0 }
 0x168   :  { %v289_v51 = vpop.f32.mrb[11].mxu0  ;;  %v432_v52 = vpop.f32.mrb[12].mxu1 }
 0x169   :  { %v440_v53 = vadd.f32 %v432_v52, %v333_v42  ;;  %v1113_v54 = vpop.f32.mrb[13].mxu1 }
 0x16a   :  { %v435_v55 = vpop.f32.mrb[14].mxu1 }
 0x16b   :  { %v1114_v56 = vpop.f32.mrb[15].mxu1 }
 0x16d   :  { %v391_v57 = vpop.f32.mrb[12].mxu0 }
 0x16e   :  { %v438_v58 = vadd.f32 %v391_v57, %v331_v47  ;;  %v393_v59 = vpop.f32.mrb[13].mxu0  ;;  %v999_v47 = vld [vmem:[%s1337_s2] sm:$0xff] }
 0x16f   :  { %v439_v60 = vadd.f32 %v393_v59, %v332_v49  ;;  %v395_v61 = vpop.f32.mrb[14].mxu0  ;;  %v1001_v52 = vunpack.c.l.bf16 %v999_v47  ;;  %v1002_v55 = vunpack.c.h.bf16 %v999_v47 }
 0x170   :  { %v396_v62 = vpop.f32.mrb[15].mxu0  ;;  %v539_v63 = vpop.f32.mrb[16].mxu1 }
 0x171   :  { %v547_v0 = vadd.f32 %v539_v63, %v440_v53  ;;  %v1119_v1 = vpop.f32.mrb[17].mxu1 }
 0x172   :  { %v542_v4 = vpop.f32.mrb[18].mxu1 }
 0x173   :  { %v1120_v5 = vpop.f32.mrb[19].mxu1 }
 0x175   :  { %v498_v6 = vpop.f32.mrb[16].mxu0 }
 0x176   :  { %v545_v7 = vadd.f32 %v498_v6, %v438_v58  ;;  %v500_v8 = vpop.f32.mrb[17].mxu0 }
 0x177   :  { %v546_v9 = vadd.f32 %v500_v8, %v439_v60  ;;  %v502_v10 = vpop.f32.mrb[18].mxu0 }
 0x178   :  { %v503_v11 = vpop.f32.mrb[19].mxu0  ;;  %v646_v12 = vpop.f32.mrb[20].mxu1 }
 0x179   :  { %v654_v13 = vadd.f32 %v646_v12, %v547_v0  ;;  %v1125_v14 = vpop.f32.mrb[21].mxu1 }
 0x17a   :  { %v649_v15 = vpop.f32.mrb[22].mxu1 }
 0x17b   :  { %v1126_v16 = vpop.f32.mrb[23].mxu1 }
 0x17d   :  { %v605_v17 = vpop.f32.mrb[20].mxu0 }
 0x17e   :  { %v652_v18 = vadd.f32 %v605_v17, %v545_v7  ;;  %v607_v19 = vpop.f32.mrb[21].mxu0 }
 0x17f   :  { %v653_v20 = vadd.f32 %v607_v19, %v546_v9  ;;  %v609_v21 = vpop.f32.mrb[22].mxu0 }
 0x180   :  { %v610_v22 = vpop.f32.mrb[23].mxu0  ;;  %v770_v23 = vpop.f32.mrb[24].mxu1 }
 0x181   :  { %v778_v24 = vadd.f32 %v770_v23, %v654_v13  ;;  %v1131_v25 = vpop.f32.mrb[25].mxu1 }
 0x182   :  { %v773_v26 = vpop.f32.mrb[26].mxu1 }
 0x183   :  { %v1132_v27 = vpop.f32.mrb[27].mxu1 }
 0x185   :  { %v729_v2 = vpop.f32.mrb[24].mxu0 }
 0x186   :  { %v776_v28 = vadd.f32 %v729_v2, %v652_v18  ;;  %v731_v29 = vpop.f32.mrb[25].mxu0 }
 0x187   :  { %v777_v30 = vadd.f32 %v731_v29, %v653_v20  ;;  %v733_v31 = vpop.f32.mrb[26].mxu0 }
 0x188   :  { %v734_v32 = vpop.f32.mrb[27].mxu0  ;;  %v880_v33 = vpop.f32.mrb[28].mxu1 }
 0x189   :  { %v888_v34 = vadd.f32 %v880_v33, %v778_v24  ;;  %v1137_v35 = vpop.f32.mrb[29].mxu1 }
 0x18a   :  { %v883_v36 = vpop.f32.mrb[30].mxu1 }
 0x18b   :  { %v1138_v37 = vpop.f32.mrb[31].mxu1 }
 0x18d   :  { %v839_v38 = vpop.f32.mrb[28].mxu0 }
 0x18e   :  { %v886_v39 = vadd.f32 %v839_v38, %v776_v28  ;;  %v841_v40 = vpop.f32.mrb[29].mxu0 }
 0x18f   :  { %v887_v41 = vadd.f32 %v841_v40, %v777_v30  ;;  %v843_v42 = vpop.f32.mrb[30].mxu0 }
 0x190   :  { %v844_v44 = vpop.f32.mrb[31].mxu0  ;;  %v990_v45 = vpop.f32.mrb[32].mxu1 }
 0x191   :  { %v998_v46 = vadd.f32 %v990_v45, %v888_v34  ;;  %v1143_v48 = vpop.f32.mrb[33].mxu1 }
 0x192   :  { %v993_v49 = vpop.f32.mrb[34].mxu1 }
 0x193   :  { %v1006_v50 = vadd.f32 %v1003_v43, %v998_v46  ;;  %v1144_v51 = vpop.f32.mrb[35].mxu1 }
 0x195   :  { %v1072_v53 = vpack.c.bf16 %v1006_v50, %v1006_v50  ;;  %v949_v54 = vpop.f32.mrb[32].mxu0 }
 0x196   :  { %v996_v56 = vadd.f32 %v949_v54, %v886_v39  ;;  %v951_v57 = vpop.f32.mrb[33].mxu0 }
 0x197   :  { %1022 = vst.msk [vmem:[%s1338_s3 + $0x8] sm:$0xf] %vm1021_vm11, %v1072_v53  ;;  %v997_v58 = vadd.f32 %v951_v57, %v887_v41  ;;  %v953_v59 = vpop.f32.mrb[34].mxu0 }
 0x198   :  { %v1004_v60 = vadd.f32 %v1001_v52, %v996_v56  ;;  %v954_v61 = vpop.f32.mrb[35].mxu0 }
 0x199   :  { %v1005_v62 = vadd.f32 %v1002_v55, %v997_v58 }
 0x19b   :  { %v1071_v63 = vpack.c.bf16 %v1005_v62, %v1004_v60 }
 0x19d   :  { %1020 = vst [vmem:[%s1338_s3] sm:$0xff] %v1071_v63 }

// kernel: _lambda_.26
= control target key start
LH: loop header
LB: loop body
LE: loop exit
PB: predicated region body
PF: predicated region fallthrough
CT: control target
= control target key end

     0   :  { %v145_v0 = vmov 0.0   ;;  %vm146_vm0 = vmmov 0   ;;  %v147_v4 = vmov 0   ;;  %vm39_vm1 = vcmask 261120   ;;  %s184_s1 = inlined_call_operand.vmem [shape: bf16[32,64], index: 1, kind: input, shape index: {}]   ;;  %s185_s0 = inlined_call_operand.vmem [shape: bf16[16,32], index: 0, kind: input, shape index: {}]   ;;  %s186_s2 = inlined_call_operand.vmem [shape: bf16[16,64], index: 2, kind: output, shape index: {}]  }
   0x1   :  { %133 = vmatprep.subr.bf16.mxu0 %v145_v0  ;;  %v14_v1 = vld [vmem:[%s184_s1] sm:$0xf]  ;;  %v15_v2 = vld [vmem:[%s184_s1 + $0x4] sm:$0xf]  ;;  %v16_v3 = vld [vmem:[%s184_s1 + $0x8] sm:$0xf]  ;;  %137 = vmatprep.mubr.msk.bf16.mxu0 %vm146_vm0, %v145_v0 }
   0x2   :  { %v18_v5 = vmax.bf16 %v147_v4, %v14_v1  ;;  %v19_v6 = vmax.bf16 %v147_v4, %v15_v2  ;;  %v17_v7 = vld [vmem:[%s184_s1 + $0xc] sm:$0xf]  ;;  %v20_v8 = vmax.bf16 %v147_v4, %v16_v3  ;;  %v144_v12 = vld [vmem:[%s185_s0] sm:$0xff]   ;;  %vm88_vm2 = vcmask 523264  }
   0x3   :  { %v21_v9 = vmax.bf16 %v147_v4, %v17_v7  ;;  %vm115_vm3 = vcmask 519168  }
   0x4   :  { %v123_v10 = vcombine.low %v18_v5, %v19_v6 }
   0x5   :  { %v124_v11 = vcombine.low %v20_v8, %v21_v9 }
   0x6   :  { %134 = vmatpush3.bf16.msra.mxu0 %v123_v10 }
   0x7   :  { %135 = vmatprep.subr.bf16.mxu0 %v145_v0 }
   0xa   :  { %136 = vmatpush3.bf16.msra.mxu0 %v124_v11 }
   0xd   :  { %138 = vmatmul.mubr.msk.bf16.vlgmr.msra.gmra.mrb[0].mxu0 %vm39_vm1, %v144_v12 }
  0xe0   :  { %v77_v13 = vpop.f32.mrb[0].mxu0 }
  0xe1   :  { %89 = vst.msk [vmem:[#allocation2] sm:$0xff] %vm88_vm2, %v77_v13  ;;  %v139_v14 = vpop.f32.mrb[1].mxu0 }
  0xe2   :  { %v80_v15 = vpop.f32.mrb[2].mxu0 }
  0xe3   :  { %90 = vst.msk [vmem:[#allocation2 + $0x8] sm:$0xff] %vm88_vm2, %v80_v15  ;;  %v140_v16 = vpop.f32.mrb[3].mxu0 }
  0xe8   :  { %v105_v17 = vld [vmem:[#allocation2] sm:$0xff] }
  0xe9   :  { %v128_v18 = vpack.c.bf16 %v105_v17, %v105_v17 }
  0xea   :  { %v106_v19 = vld [vmem:[#allocation2 + $0x8] sm:$0xff] }
  0xeb   :  { %116 = vst.msk [vmem:[%s186_s2] sm:$0xf] %vm115_vm3, %v128_v18  ;;  %v129_v20 = vpack.c.bf16 %v106_v19, %v106_v19 }
  0xed   :  { %117 = vst.msk [vmem:[%s186_s2 + $0x4] sm:$0xf] %vm115_vm3, %v129_v20 }

// kernel: _lambda_.27
= control target key start
LH: loop header
LB: loop body
LE: loop exit
PB: predicated region body
PF: predicated region fallthrough
CT: control target
= control target key end

     0   :  { %v742_v2 = vmov 0.0   ;;  %v743_v3 = vmov 0   ;;  %vm744_vm0 = vmmov 0   ;;  %s745_s17 = smov 116   ;;  %s746_s18 = smov 117   ;;  %vm271_vm1 = vcmask 957440   ;;  %s849_s0 = inlined_call_operand.vmem [shape: bf16[16,142], index: 0, kind: input, shape index: {}]   ;;  %s850_s1 = inlined_call_operand.vmem [shape: bf16[9,16,16], index: 1, kind: input, shape index: {}]   ;;  %s851_s2 = inlined_call_operand.vmem [shape: bf16[16,120], index: 2, kind: output, shape index: {}]  }
   0x1   :  { %v186_v0 = vld [vmem:[%s849_s0] sm:$0xff]  ;;  %v187_v1 = vld [vmem:[%s849_s0 + $0x8] sm:$0xff]  ;;  %662 = vmatprep.subr.bf16.mxu0 %v742_v2  ;;  %638 = vmatprep.subr.bf16.mxu1 %v742_v2  ;;  %s747_s19 = smov 127   ;;  %s749_s20 = smov 107   ;;  %vm332_vm2 = vcmask 949248   ;;  %vm34_vm3 = vcmask 130048  }
   0x2   :  { %v188_v4 = vmax.bf16 %v743_v3, %v186_v0  ;;  %v189_v5 = vmax.bf16 %v743_v3, %v187_v1  ;;  %v12_v6 = vld [vmem:[%s849_s0] sm:$0xf]  ;;  %v13_v7 = vld [vmem:[%s849_s0 + $0x8] sm:$0xf]  ;;  %664 = vmatprep.mubr.msk.bf16.mxu0 %vm744_vm0, %v742_v2  ;;  %640 = vmatprep.mubr.msk.bf16.mxu1 %vm744_vm0, %v742_v2  ;;  %s748_s0 = smov 108   ;;  %s750_s21 = smov 126  }
   0x3   :  { %v14_v10 = vmax.bf16 %v743_v3, %v12_v6  ;;  %v15_v11 = vmax.bf16 %v743_v3, %v13_v7  ;;  %s751_s22 = smov 118   ;;  %s752_s23 = smov 106   ;;  %v733_v18 = vld [vmem:[%s850_s1 + $0x20] sm:$0xff]   ;;  %v734_v21 = vld [vmem:[%s850_s1 + $0x8] sm:$0xff]   ;;  %vm393_vm4 = vcmask 883712   ;;  %vm454_vm5 = vcmask 875520  }
   0x4   :  { %v593_v8 = vcombine.low %v188_v4, %v189_v5  ;;  %v594_v9 = vcombine.high %v188_v4, %v189_v5  ;;  %v735_v25 = vld [vmem:[%s850_s1 + $0x28] sm:$0xff]   ;;  %v736_v27 = vld [vmem:[%s850_s1] sm:$0xff]   ;;  %v737_v30 = vld [vmem:[%s850_s1 + $0x30] sm:$0xff]   ;;  %vm210_vm6 = vcmask 965632   ;;  %vm515_vm7 = vcmask 867328  }
   0x5   :  { %v582_v12 = vcombine.low %v14_v10, %v15_v11  ;;  %v738_v34 = vld [vmem:[%s850_s1 + $0x10] sm:$0xff]   ;;  %v739_v38 = vld [vmem:[%s850_s1 + $0x38] sm:$0xff]   ;;  %v741_v41 = vld [vmem:[%s850_s1 + $0x40] sm:$0xff]   ;;  %vm572_vm8 = vcmask 977920  }
   0x6   :  { %328 = vrot.lane.b32.xlu1 %v593_v8, %s745_s17  ;;  %267 = vrot.lane.b32.xlu0 %v593_v8, %s746_s18  ;;  %v740_v40 = vld [vmem:[%s850_s1 + $0x18] sm:$0xff]  }
   0xa   :  { %330 = vrot.lane.b32.xlu1 %v594_v9, %s745_s17  ;;  %269 = vrot.lane.b32.xlu0 %v594_v9, %s746_s18 }
   0xe   :  { %31 = vrot.lane.b32.xlu0 %v582_v12, %s747_s19  ;;  %389 = vrot.lane.b32.xlu1 %v593_v8, %s748_s0 }
  0x12   :  { %391 = vrot.lane.b32.xlu0 %v594_v9, %s748_s0  ;;  %450 = vrot.lane.b32.xlu1 %v593_v8, %s749_s20 }
  0x16   :  { %452 = vrot.lane.b32.xlu0 %v594_v9, %s749_s20  ;;  %137 = vrot.lane.b32.xlu1 %v582_v12, %s750_s21 }
  0x1a   :  { %208 = vrot.lane.b32.xlu1 %v594_v9, %s751_s22  ;;  %206 = vrot.lane.b32.xlu0 %v593_v8, %s751_s22 }
  0x1e   :  { %513 = vrot.lane.b32.xlu1 %v594_v9, %s752_s23  ;;  %511 = vrot.lane.b32.xlu0 %v593_v8, %s752_s23 }
  0x78   :  { %v329_v13 = vpop.permute.xlu1 %328  ;;  %v268_v14 = vpop.permute.xlu0 %267 }
  0x7c   :  { %v331_v15 = vpop.permute.xlu1 %330  ;;  %v270_v16 = vpop.permute.xlu0 %269 }
  0x7d   :  { %v272_v17 = vsel %vm271_vm1, %v268_v14, %v270_v16  ;;  %v333_v19 = vsel %vm332_vm2, %v329_v13, %v331_v15 }
  0x7e   :  { %663 = vmatpush3.bf16.msra.mxu0 %v272_v17 }
  0x7f   :  { %668 = vmatprep.subr.bf16.mxu0 %v742_v2 }
  0x80   :  { %v32_v20 = vpop.permute.xlu0 %31  ;;  %v390_v22 = vpop.permute.xlu1 %389 }
  0x81   :  { %639 = vmatpush3.bf16.msra.mxu1 %v32_v20  ;;  %665 = vmatmul.mubr.msk.bf16.vlgmr.msra.gmra.mrb[0].mxu0 %vm34_vm3, %v733_v18 }
  0x82   :  { %669 = vmatpush3.bf16.msra.mxu0 %v333_v19  ;;  %644 = vmatprep.subr.bf16.mxu1 %v742_v2 }
  0x83   :  { %670 = vmatprep.mubr.msk.bf16.mxu0 %vm744_vm0, %v742_v2  ;;  %674 = vmatprep.subr.bf16.mxu0 %v742_v2 }
  0x84   :  { %641 = vmatmul.mubr.msk.bf16.vlgmr.msra.gmra.mrb[0].mxu1 %vm34_vm3, %v734_v21  ;;  %v392_v23 = vpop.permute.xlu0 %391  ;;  %v451_v24 = vpop.permute.xlu1 %450 }
  0x85   :  { %645 = vmatpush3.bf16.msra.mxu1 %v582_v12  ;;  %646 = vmatprep.mubr.msk.bf16.mxu1 %vm744_vm0, %v742_v2  ;;  %v394_v26 = vsel %vm393_vm4, %v390_v22, %v392_v23 }
  0x86   :  { %650 = vmatprep.subr.bf16.mxu1 %v742_v2 }
  0x88   :  { %v138_v28 = vpop.permute.xlu1 %137  ;;  %v453_v29 = vpop.permute.xlu0 %452 }
  0x89   :  { %v455_v31 = vsel %vm454_vm5, %v451_v24, %v453_v29 }
  0x8c   :  { %v209_v32 = vpop.permute.xlu1 %208  ;;  %v207_v33 = vpop.permute.xlu0 %206 }
  0x8d   :  { %671 = vmatmul.mubr.msk.bf16.vlgmr.msra.gmra.mrb[0].mxu0 %vm34_vm3, %v735_v25  ;;  %v211_v35 = vsel %vm210_vm6, %v207_v33, %v209_v32 }
  0x8e   :  { %675 = vmatpush3.bf16.msra.mxu0 %v394_v26  ;;  %676 = vmatprep.mubr.msk.bf16.mxu0 %vm744_vm0, %v742_v2 }
  0x8f   :  { %680 = vmatprep.subr.bf16.mxu0 %v742_v2 }
  0x90   :  { %647 = vmatmul.mubr.msk.bf16.vlgmr.msra.gmra.mrb[0].mxu1 %vm34_vm3, %v736_v27  ;;  %v514_v36 = vpop.permute.xlu1 %513  ;;  %v512_v37 = vpop.permute.xlu0 %511 }
  0x91   :  { %651 = vmatpush3.bf16.msra.mxu1 %v138_v28  ;;  %652 = vmatprep.mubr.msk.bf16.mxu1 %vm744_vm0, %v742_v2  ;;  %v516_v39 = vsel %vm515_vm7, %v512_v37, %v514_v36 }
  0x92   :  { %656 = vmatprep.subr.bf16.mxu1 %v742_v2 }
  0x99   :  { %677 = vmatmul.mubr.msk.bf16.vlgmr.msra.gmra.mrb[0].mxu0 %vm34_vm3, %v737_v30 }
  0x9a   :  { %681 = vmatpush3.bf16.msra.mxu0 %v455_v31  ;;  %682 = vmatprep.mubr.msk.bf16.mxu0 %vm744_vm0, %v742_v2 }
  0x9b   :  { %686 = vmatprep.subr.bf16.mxu0 %v742_v2 }
  0x9c   :  { %653 = vmatmul.mubr.msk.bf16.vlgmr.msra.gmra.mrb[0].mxu1 %vm34_vm3, %v738_v34 }
  0x9d   :  { %657 = vmatpush3.bf16.msra.mxu1 %v211_v35  ;;  %658 = vmatprep.mubr.msk.bf16.mxu1 %vm744_vm0, %v742_v2 }
  0xa5   :  { %683 = vmatmul.mubr.msk.bf16.vlgmr.msra.gmra.mrb[0].mxu0 %vm34_vm3, %v739_v38 }
  0xa6   :  { %687 = vmatpush3.bf16.msra.mxu0 %v516_v39  ;;  %688 = vmatprep.mubr.msk.bf16.mxu0 %vm744_vm0, %v742_v2 }
  0xa8   :  { %659 = vmatmul.mubr.msk.bf16.vlgmr.msra.gmra.mrb[0].mxu1 %vm34_vm3, %v740_v40 }
  0xb1   :  { %689 = vmatmul.mubr.msk.bf16.vlgmr.msra.gmra.mrb[0].mxu0 %vm34_vm3, %v741_v41 }
 0x17b   :  { %v250_v42 = vpop.f32.mrb[0].mxu1 }
 0x17c   :  { %v660_v43 = vpop.f32.mrb[1].mxu1 }
 0x17d   :  { %v253_v44 = vpop.f32.mrb[2].mxu1 }
 0x17e   :  { %v661_v45 = vpop.f32.mrb[3].mxu1 }
 0x184   :  { %v555_v46 = vpop.f32.mrb[0].mxu0 }
 0x185   :  { %v692_v47 = vadd.f32 %v555_v46, %v250_v42  ;;  %v690_v48 = vpop.f32.mrb[1].mxu0 }
 0x186   :  { %v558_v49 = vpop.f32.mrb[2].mxu0 }
 0x187   :  { %v618_v50 = vpack.c.bf16 %v692_v47, %v692_v47  ;;  %v693_v51 = vadd.f32 %v558_v49, %v253_v44  ;;  %v691_v52 = vpop.f32.mrb[3].mxu0 }
 0x189   :  { %573 = vst.msk [vmem:[%s851_s2] sm:$0xf] %vm572_vm8, %v618_v50  ;;  %v619_v53 = vpack.c.bf16 %v693_v51, %v693_v51 }
 0x18b   :  { %574 = vst.msk [vmem:[%s851_s2 + $0x4] sm:$0xf] %vm572_vm8, %v619_v53 }

// kernel: _lambda_.28
= control target key start
LH: loop header
LB: loop body
LE: loop exit
PB: predicated region body
PF: predicated region fallthrough
CT: control target
= control target key end

     0   :  { %vm110_vm0 = vcmask 1043456   ;;  %v469_v4 = vmov 0   ;;  %vm85_vm1 = vcmask 64512   ;;  %vm215_vm2 = vcmask 15360   ;;  %s624_s1 = inlined_call_operand.vmem [shape: bf16[8,2], index: 1, kind: input, shape index: {}]   ;;  %s625_s0 = inlined_call_operand.vmem [shape: bf16[128,8], index: 0, kind: input, shape index: {}]   ;;  %s626_s2 = inlined_call_operand.vmem [shape: bf16[128,2], index: 2, kind: output, shape index: {}]  }
   0x1   :  { %v28_v0 = vld [vmem:[%s624_s1] sm:$0xf]  ;;  %v13_v2 = vld [vmem:[%s625_s0 + $0x4] sm:$0xf]  ;;  %v14_v11 = vld [vmem:[%s625_s0 + $0x8] sm:$0xf] }
   0x2   :  { %v12_v1 = vld [vmem:[%s625_s0] sm:$0xf]  ;;  %466 = vmatprep.subr.msk.bf16.mxu0 %vm110_vm0, %v28_v0  ;;  %467 = vmatprep.subr.msk.bf16.mxu1 %vm110_vm0, %v28_v0  ;;  %v112_v3 = vsel %vm110_vm0, %v28_v0, 0  ;;  %v30_v6 = vmax.bf16 %v469_v4, %v13_v2  ;;  %v21_v8 = vld [vmem:[%s625_s0 + $0x24] sm:$0xf]  ;;  %v31_v15 = vmax.bf16 %v469_v4, %v14_v11  ;;  %vm368_vm3 = vcmask 11264  }
   0x3   :  { %v29_v5 = vmax.bf16 %v469_v4, %v12_v1  ;;  %v20_v7 = vld [vmem:[%s625_s0 + $0x20] sm:$0xf]  ;;  %447 = vmatpush3.bf16.msra.mxu0 %v112_v3  ;;  %465 = vmatpush3.bf16.msra.mxu1 %v112_v3  ;;  %v38_v10 = vmax.bf16 %v469_v4, %v21_v8  ;;  %v15_v12 = vld [vmem:[%s625_s0 + $0xc] sm:$0xf]  ;;  %v22_v13 = vld [vmem:[%s625_s0 + $0x28] sm:$0xf] }
   0x4   :  { %v37_v9 = vmax.bf16 %v469_v4, %v20_v7  ;;  %v32_v16 = vmax.bf16 %v469_v4, %v15_v12  ;;  %v23_v17 = vld [vmem:[%s625_s0 + $0x2c] sm:$0xf]  ;;  %v39_v18 = vmax.bf16 %v469_v4, %v22_v13  ;;  %v16_v19 = vld [vmem:[%s625_s0 + $0x10] sm:$0xf]  ;;  %v17_v20 = vld [vmem:[%s625_s0 + $0x14] sm:$0xf] }
   0x5   :  { %v389_v14 = vcombine.low %v29_v5, %v30_v6  ;;  %v40_v22 = vmax.bf16 %v469_v4, %v23_v17  ;;  %v33_v23 = vmax.bf16 %v469_v4, %v16_v19  ;;  %v34_v24 = vmax.bf16 %v469_v4, %v17_v20  ;;  %v24_v25 = vld [vmem:[%s625_s0 + $0x30] sm:$0xf]  ;;  %v25_v26 = vld [vmem:[%s625_s0 + $0x34] sm:$0xf]  ;;  %v18_v27 = vld [vmem:[%s625_s0 + $0x18] sm:$0xf] }
   0x6   :  { %v393_v21 = vcombine.low %v37_v9, %v38_v10  ;;  %v390_v28 = vcombine.low %v31_v15, %v32_v16  ;;  %v41_v29 = vmax.bf16 %v469_v4, %v24_v25  ;;  %v42_v30 = vmax.bf16 %v469_v4, %v25_v26  ;;  %v19_v31 = vld [vmem:[%s625_s0 + $0x1c] sm:$0xf]  ;;  %v26_v32 = vld [vmem:[%s625_s0 + $0x38] sm:$0xf] }
   0x7   :  { %448 = vmatprep.mubr.msk.bf16.mxu0 %vm85_vm1, %v389_v14  ;;  %v27_v33 = vld [vmem:[%s625_s0 + $0x3c] sm:$0xf]  ;;  %v394_v34 = vcombine.low %v39_v18, %v40_v22  ;;  %v391_v35 = vcombine.low %v33_v23, %v34_v24  ;;  %v35_v37 = vmax.bf16 %v469_v4, %v18_v27  ;;  %v36_v38 = vmax.bf16 %v469_v4, %v19_v31 }
   0x8   :  { %456 = vmatprep.mubr.msk.bf16.mxu1 %vm85_vm1, %v393_v21  ;;  %449 = vmatmul.mubr.msk.bf16.vlgmr.msra.gmra.mrb[0].mxu0 %vm85_vm1, %v390_v28  ;;  %v395_v36 = vcombine.low %v41_v29, %v42_v30  ;;  %v43_v39 = vmax.bf16 %v469_v4, %v26_v32  ;;  %v44_v40 = vmax.bf16 %v469_v4, %v27_v33 }
   0x9   :  { %457 = vmatmul.mubr.msk.bf16.vlgmr.msra.gmra.mrb[0].mxu1 %vm85_vm1, %v394_v34  ;;  %452 = vmatprep.mubr.msk.bf16.mxu0 %vm85_vm1, %v391_v35  ;;  %v392_v41 = vcombine.low %v35_v37, %v36_v38 }
   0xa   :  { %460 = vmatprep.mubr.msk.bf16.mxu1 %vm85_vm1, %v395_v36  ;;  %v396_v42 = vcombine.low %v43_v39, %v44_v40 }
  0x10   :  { %453 = vmatmul.mubr.msk.bf16.gmra.mrb[4].mxu0 %vm85_vm1, %v392_v41 }
  0x11   :  { %461 = vmatmul.mubr.msk.bf16.gmra.mrb[4].mxu1 %vm85_vm1, %v396_v42 }
  0xdb   :  { %v450_v43 = vpop.f32.mrb[0].mxu0 }
  0xdc   :  { %218 = vst.msk [vmem:[#allocation2 + $0x10] sm:$0xff] %vm215_vm2, %v450_v43  ;;  %v458_v44 = vpop.f32.mrb[0].mxu1  ;;  %v148_v45 = vpop.f32.mrb[1].mxu0 }
  0xdd   :  { %226 = vst.msk [vmem:[#allocation2 + $0x50] sm:$0xff] %vm215_vm2, %v458_v44  ;;  %216 = vst.msk [vmem:[#allocation2] sm:$0xff] %vm215_vm2, %v148_v45  ;;  %v180_v46 = vpop.f32.mrb[1].mxu1  ;;  %v451_v47 = vpop.f32.mrb[2].mxu0 }
  0xde   :  { %224 = vst.msk [vmem:[#allocation2 + $0x40] sm:$0xff] %vm215_vm2, %v180_v46  ;;  %219 = vst.msk [vmem:[#allocation2 + $0x18] sm:$0xff] %vm215_vm2, %v451_v47  ;;  %v459_v48 = vpop.f32.mrb[2].mxu1  ;;  %v151_v49 = vpop.f32.mrb[3].mxu0 }
  0xdf   :  { %227 = vst.msk [vmem:[#allocation2 + $0x58] sm:$0xff] %vm215_vm2, %v459_v48  ;;  %217 = vst.msk [vmem:[#allocation2 + $0x8] sm:$0xff] %vm215_vm2, %v151_v49  ;;  %v183_v50 = vpop.f32.mrb[3].mxu1 }
  0xe0   :  { %225 = vst.msk [vmem:[#allocation2 + $0x48] sm:$0xff] %vm215_vm2, %v183_v50 }
  0xe3   :  { %v290_v51 = vld [vmem:[#allocation2 + $0x10] sm:$0xff]  ;;  %v454_v52 = vpop.f32.mrb[4].mxu0 }
  0xe4   :  { %v423_v53 = vpack.c.bf16 %v290_v51, %v290_v51  ;;  %v298_v54 = vld [vmem:[#allocation2 + $0x50] sm:$0xff]  ;;  %v288_v55 = vld [vmem:[#allocation2] sm:$0xff]  ;;  %222 = vst.msk [vmem:[#allocation2 + $0x30] sm:$0xff] %vm215_vm2, %v454_v52  ;;  %v462_v56 = vpop.f32.mrb[4].mxu1  ;;  %v164_v57 = vpop.f32.mrb[5].mxu0 }
  0xe5   :  { %v431_v58 = vpack.c.bf16 %v298_v54, %v298_v54  ;;  %v421_v59 = vpack.c.bf16 %v288_v55, %v288_v55  ;;  %v296_v60 = vld [vmem:[#allocation2 + $0x40] sm:$0xff]  ;;  %v291_v61 = vld [vmem:[#allocation2 + $0x18] sm:$0xff]  ;;  %230 = vst.msk [vmem:[#allocation2 + $0x70] sm:$0xff] %vm215_vm2, %v462_v56  ;;  %220 = vst.msk [vmem:[#allocation2 + $0x20] sm:$0xff] %vm215_vm2, %v164_v57  ;;  %v196_v62 = vpop.f32.mrb[5].mxu1  ;;  %v455_v63 = vpop.f32.mrb[6].mxu0 }
  0xe6   :  { %371 = vst.msk [vmem:[%s626_s2 + $0x8] sm:$0xf] %vm368_vm3, %v423_v53  ;;  %v429_v0 = vpack.c.bf16 %v296_v60, %v296_v60  ;;  %v424_v1 = vpack.c.bf16 %v291_v61, %v291_v61  ;;  %v299_v2 = vld [vmem:[#allocation2 + $0x58] sm:$0xff]  ;;  %v289_v3 = vld [vmem:[#allocation2 + $0x8] sm:$0xff]  ;;  %v463_v4 = vpop.f32.mrb[6].mxu1  ;;  %v167_v5 = vpop.f32.mrb[7].mxu0 }
  0xe7   :  { %228 = vst.msk [vmem:[#allocation2 + $0x60] sm:$0xff] %vm215_vm2, %v196_v62  ;;  %223 = vst.msk [vmem:[#allocation2 + $0x38] sm:$0xff] %vm215_vm2, %v455_v63  ;;  %v432_v6 = vpack.c.bf16 %v299_v2, %v299_v2  ;;  %v422_v7 = vpack.c.bf16 %v289_v3, %v289_v3  ;;  %v297_v8 = vld [vmem:[#allocation2 + $0x48] sm:$0xff]  ;;  %v199_v9 = vpop.f32.mrb[7].mxu1 }
  0xe8   :  { %379 = vst.msk [vmem:[%s626_s2 + $0x28] sm:$0xf] %vm368_vm3, %v431_v58  ;;  %369 = vst.msk [vmem:[%s626_s2] sm:$0xf] %vm368_vm3, %v421_v59  ;;  %v430_v10 = vpack.c.bf16 %v297_v8, %v297_v8 }
  0xe9   :  { %231 = vst.msk [vmem:[#allocation2 + $0x78] sm:$0xff] %vm215_vm2, %v463_v4  ;;  %221 = vst.msk [vmem:[#allocation2 + $0x28] sm:$0xff] %vm215_vm2, %v167_v5 }
  0xea   :  { %377 = vst.msk [vmem:[%s626_s2 + $0x20] sm:$0xf] %vm368_vm3, %v429_v0  ;;  %372 = vst.msk [vmem:[%s626_s2 + $0xc] sm:$0xf] %vm368_vm3, %v424_v1 }
  0xeb   :  { %229 = vst.msk [vmem:[#allocation2 + $0x68] sm:$0xff] %vm215_vm2, %v199_v9  ;;  %v294_v11 = vld [vmem:[#allocation2 + $0x30] sm:$0xff] }
  0xec   :  { %380 = vst.msk [vmem:[%s626_s2 + $0x2c] sm:$0xf] %vm368_vm3, %v432_v6  ;;  %370 = vst.msk [vmem:[%s626_s2 + $0x4] sm:$0xf] %vm368_vm3, %v422_v7  ;;  %v427_v12 = vpack.c.bf16 %v294_v11, %v294_v11  ;;  %v302_v13 = vld [vmem:[#allocation2 + $0x70] sm:$0xff]  ;;  %v292_v14 = vld [vmem:[#allocation2 + $0x20] sm:$0xff] }
  0xed   :  { %378 = vst.msk [vmem:[%s626_s2 + $0x24] sm:$0xf] %vm368_vm3, %v430_v10  ;;  %v435_v15 = vpack.c.bf16 %v302_v13, %v302_v13  ;;  %v425_v16 = vpack.c.bf16 %v292_v14, %v292_v14 }
  0xee   :  { %v300_v17 = vld [vmem:[#allocation2 + $0x60] sm:$0xff]  ;;  %v295_v18 = vld [vmem:[#allocation2 + $0x38] sm:$0xff]  ;;  %375 = vst.msk [vmem:[%s626_s2 + $0x18] sm:$0xf] %vm368_vm3, %v427_v12 }
  0xef   :  { %v433_v19 = vpack.c.bf16 %v300_v17, %v300_v17  ;;  %v428_v20 = vpack.c.bf16 %v295_v18, %v295_v18  ;;  %383 = vst.msk [vmem:[%s626_s2 + $0x38] sm:$0xf] %vm368_vm3, %v435_v15  ;;  %373 = vst.msk [vmem:[%s626_s2 + $0x10] sm:$0xf] %vm368_vm3, %v425_v16 }
  0xf0   :  { %v303_v21 = vld [vmem:[#allocation2 + $0x78] sm:$0xff]  ;;  %v293_v22 = vld [vmem:[#allocation2 + $0x28] sm:$0xff] }
  0xf1   :  { %v436_v23 = vpack.c.bf16 %v303_v21, %v303_v21  ;;  %v426_v24 = vpack.c.bf16 %v293_v22, %v293_v22  ;;  %381 = vst.msk [vmem:[%s626_s2 + $0x30] sm:$0xf] %vm368_vm3, %v433_v19  ;;  %376 = vst.msk [vmem:[%s626_s2 + $0x1c] sm:$0xf] %vm368_vm3, %v428_v20 }
  0xf2   :  { %v301_v25 = vld [vmem:[#allocation2 + $0x68] sm:$0xff] }
  0xf3   :  { %v434_v26 = vpack.c.bf16 %v301_v25, %v301_v25  ;;  %384 = vst.msk [vmem:[%s626_s2 + $0x3c] sm:$0xf] %vm368_vm3, %v436_v23  ;;  %374 = vst.msk [vmem:[%s626_s2 + $0x14] sm:$0xf] %vm368_vm3, %v426_v24 }
  0xf5   :  { %382 = vst.msk [vmem:[%s626_s2 + $0x34] sm:$0xf] %vm368_vm3, %v434_v26 }

// kernel: _lambda_.29
= control target key start
LH: loop header
LB: loop body
LE: loop exit
PB: predicated region body
PF: predicated region fallthrough
CT: control target
= control target key end

     0   :  { %vm113_vm0 = vcmask 1040384   ;;  %v559_v4 = vmov 0   ;;  %vm88_vm1 = vcmask 15360   ;;  %vm218_vm2 = vcmask 64512   ;;  %s747_s1 = inlined_call_operand.vmem [shape: bf16[2,8], index: 1, kind: input, shape index: {}]   ;;  %s748_s0 = inlined_call_operand.vmem [shape: bf16[128,2], index: 0, kind: input, shape index: {}]   ;;  %s749_s2 = inlined_call_operand.vmem [shape: bf16[128,8], index: 2, kind: input, shape index: {}]   ;;  %s750_s3 = inlined_call_operand.vmem [shape: bf16[128,8], index: 3, kind: output, shape index: {}]  }
   0x1   :  { %v31_v0 = vld [vmem:[%s747_s1] sm:$0x1]  ;;  %v16_v2 = vld [vmem:[%s748_s0 + $0x4] sm:$0xf]  ;;  %v17_v11 = vld [vmem:[%s748_s0 + $0x8] sm:$0xf] }
   0x2   :  { %v15_v1 = vld [vmem:[%s748_s0] sm:$0xf]  ;;  %556 = vmatprep.subr.msk.bf16.mxu0 %vm113_vm0, %v31_v0  ;;  %557 = vmatprep.subr.msk.bf16.mxu1 %vm113_vm0, %v31_v0  ;;  %v115_v3 = vsel %vm113_vm0, %v31_v0, 0  ;;  %v33_v6 = vmax.bf16 %v559_v4, %v16_v2  ;;  %v24_v8 = vld [vmem:[%s748_s0 + $0x24] sm:$0xf]  ;;  %v34_v15 = vmax.bf16 %v559_v4, %v17_v11  ;;  %v520_v46 = vld [vmem:[%s749_s2 + $0x8] sm:$0xff]  }
   0x3   :  { %v32_v5 = vmax.bf16 %v559_v4, %v15_v1  ;;  %v23_v7 = vld [vmem:[%s748_s0 + $0x20] sm:$0xf]  ;;  %537 = vmatpush3.bf16.msra.mxu0 %v115_v3  ;;  %555 = vmatpush3.bf16.msra.mxu1 %v115_v3  ;;  %v41_v10 = vmax.bf16 %v559_v4, %v24_v8  ;;  %v18_v12 = vld [vmem:[%s748_s0 + $0xc] sm:$0xf]  ;;  %v25_v13 = vld [vmem:[%s748_s0 + $0x28] sm:$0xf]  ;;  %v494_v55 = vunpack.c.l.bf16 %v520_v46  ;;  %v495_v59 = vunpack.c.h.bf16 %v520_v46 }
   0x4   :  { %v40_v9 = vmax.bf16 %v559_v4, %v23_v7  ;;  %v35_v16 = vmax.bf16 %v559_v4, %v18_v12  ;;  %v26_v17 = vld [vmem:[%s748_s0 + $0x2c] sm:$0xf]  ;;  %v42_v18 = vmax.bf16 %v559_v4, %v25_v13  ;;  %v19_v19 = vld [vmem:[%s748_s0 + $0x10] sm:$0xf]  ;;  %v20_v20 = vld [vmem:[%s748_s0 + $0x14] sm:$0xf] }
   0x5   :  { %v440_v14 = vcombine.low %v32_v5, %v33_v6  ;;  %v43_v22 = vmax.bf16 %v559_v4, %v26_v17  ;;  %v36_v23 = vmax.bf16 %v559_v4, %v19_v19  ;;  %v37_v24 = vmax.bf16 %v559_v4, %v20_v20  ;;  %v27_v25 = vld [vmem:[%s748_s0 + $0x30] sm:$0xf]  ;;  %v28_v26 = vld [vmem:[%s748_s0 + $0x34] sm:$0xf]  ;;  %v21_v27 = vld [vmem:[%s748_s0 + $0x18] sm:$0xf] }
   0x6   :  { %v444_v21 = vcombine.low %v40_v9, %v41_v10  ;;  %v441_v28 = vcombine.low %v34_v15, %v35_v16  ;;  %v44_v29 = vmax.bf16 %v559_v4, %v27_v25  ;;  %v45_v30 = vmax.bf16 %v559_v4, %v28_v26  ;;  %v22_v31 = vld [vmem:[%s748_s0 + $0x1c] sm:$0xf]  ;;  %v29_v32 = vld [vmem:[%s748_s0 + $0x38] sm:$0xf]  ;;  %v524_v49 = vld [vmem:[%s749_s2 + $0x28] sm:$0xff]  }
   0x7   :  { %538 = vmatprep.mubr.msk.bf16.mxu0 %vm88_vm1, %v440_v14  ;;  %v30_v33 = vld [vmem:[%s748_s0 + $0x3c] sm:$0xf]  ;;  %v445_v34 = vcombine.low %v42_v18, %v43_v22  ;;  %v442_v35 = vcombine.low %v36_v23, %v37_v24  ;;  %v38_v37 = vmax.bf16 %v559_v4, %v21_v27  ;;  %v39_v38 = vmax.bf16 %v559_v4, %v22_v31  ;;  %v489_v50 = vld [vmem:[%s749_s2] sm:$0xff]   ;;  %v521_v19 = vld [vmem:[%s749_s2 + $0x10] sm:$0xff]  }
   0x8   :  { %546 = vmatprep.mubr.msk.bf16.mxu1 %vm88_vm1, %v444_v21  ;;  %539 = vmatmul.mubr.msk.bf16.vlgmr.msra.gmra.mrb[0].mxu0 %vm88_vm1, %v441_v28  ;;  %v446_v36 = vcombine.low %v44_v29, %v45_v30  ;;  %v46_v39 = vmax.bf16 %v559_v4, %v29_v32  ;;  %v47_v40 = vmax.bf16 %v559_v4, %v30_v33  ;;  %v523_v53 = vld [vmem:[%s749_s2 + $0x20] sm:$0xff]   ;;  %v510_v56 = vunpack.c.l.bf16 %v524_v49  ;;  %v663_v4 = vld [vmem:[%s749_s2 + $0x18] sm:$0xff]   ;;  %v525_v27 = vld [vmem:[%s749_s2 + $0x30] sm:$0xff]  }
   0x9   :  { %547 = vmatmul.mubr.msk.bf16.vlgmr.msra.gmra.mrb[0].mxu1 %vm88_vm1, %v445_v34  ;;  %542 = vmatprep.mubr.msk.bf16.mxu0 %vm88_vm1, %v442_v35  ;;  %v443_v41 = vcombine.low %v38_v37, %v39_v38  ;;  %v490_v57 = vunpack.c.l.bf16 %v489_v50  ;;  %v506_v58 = vunpack.c.l.bf16 %v523_v53  ;;  %v511_v61 = vunpack.c.h.bf16 %v524_v49  ;;  %v526_v11 = vld [vmem:[%s749_s2 + $0x38] sm:$0xff]  }
   0xa   :  { %550 = vmatprep.mubr.msk.bf16.mxu1 %vm88_vm1, %v446_v36  ;;  %v447_v42 = vcombine.low %v46_v39, %v47_v40  ;;  %v491_v62 = vunpack.c.h.bf16 %v489_v50  ;;  %v507_v3 = vunpack.c.h.bf16 %v523_v53  ;;  %vm419_vm3 = vcmask 60416  }
   0xb   :  { %v502_v32 = vunpack.c.l.bf16 %v663_v4  ;;  %v518_v35 = vunpack.c.l.bf16 %v526_v11  ;;  %v498_v36 = vunpack.c.l.bf16 %v521_v19  ;;  %v514_v38 = vunpack.c.l.bf16 %v525_v27 }
   0xc   :  { %v503_v39 = vunpack.c.h.bf16 %v663_v4  ;;  %v515_v46 = vunpack.c.h.bf16 %v525_v27 }
  0x10   :  { %543 = vmatmul.mubr.msk.bf16.gmra.mrb[4].mxu0 %vm88_vm1, %v443_v41  ;;  %v519_v41 = vunpack.c.h.bf16 %v526_v11 }
  0x11   :  { %551 = vmatmul.mubr.msk.bf16.gmra.mrb[4].mxu1 %vm88_vm1, %v447_v42  ;;  %v499_v42 = vunpack.c.h.bf16 %v521_v19 }
  0xdb   :  { %v540_v43 = vpop.f32.mrb[0].mxu0 }
  0xdc   :  { %221 = vst.msk [vmem:[#allocation2 + $0x10] sm:$0xff] %vm218_vm2, %v540_v43  ;;  %v548_v44 = vpop.f32.mrb[0].mxu1  ;;  %v151_v45 = vpop.f32.mrb[1].mxu0 }
  0xdd   :  { %229 = vst.msk [vmem:[#allocation2 + $0x50] sm:$0xff] %vm218_vm2, %v548_v44  ;;  %219 = vst.msk [vmem:[#allocation2] sm:$0xff] %vm218_vm2, %v151_v45  ;;  %v183_v47 = vpop.f32.mrb[1].mxu1  ;;  %v541_v48 = vpop.f32.mrb[2].mxu0 }
  0xde   :  { %227 = vst.msk [vmem:[#allocation2 + $0x40] sm:$0xff] %vm218_vm2, %v183_v47  ;;  %222 = vst.msk [vmem:[#allocation2 + $0x18] sm:$0xff] %vm218_vm2, %v541_v48  ;;  %v549_v51 = vpop.f32.mrb[2].mxu1  ;;  %v154_v52 = vpop.f32.mrb[3].mxu0 }
  0xdf   :  { %230 = vst.msk [vmem:[#allocation2 + $0x58] sm:$0xff] %vm218_vm2, %v549_v51  ;;  %220 = vst.msk [vmem:[#allocation2 + $0x8] sm:$0xff] %vm218_vm2, %v154_v52  ;;  %v186_v54 = vpop.f32.mrb[3].mxu1 }
  0xe0   :  { %228 = vst.msk [vmem:[#allocation2 + $0x48] sm:$0xff] %vm218_vm2, %v186_v54 }
  0xe3   :  { %v293_v60 = vld [vmem:[#allocation2 + $0x10] sm:$0xff]  ;;  %v544_v63 = vpop.f32.mrb[4].mxu0 }
  0xe4   :  { %v341_v0 = vadd.f32 %v494_v55, %v293_v60  ;;  %v301_v1 = vld [vmem:[#allocation2 + $0x50] sm:$0xff]  ;;  %v291_v2 = vld [vmem:[#allocation2] sm:$0xff]  ;;  %225 = vst.msk [vmem:[#allocation2 + $0x30] sm:$0xff] %vm218_vm2, %v544_v63  ;;  %v552_v5 = vpop.f32.mrb[4].mxu1  ;;  %v167_v6 = vpop.f32.mrb[5].mxu0 }
  0xe5   :  { %v349_v7 = vadd.f32 %v510_v56, %v301_v1  ;;  %v339_v8 = vadd.f32 %v490_v57, %v291_v2  ;;  %v299_v9 = vld [vmem:[#allocation2 + $0x40] sm:$0xff]  ;;  %v294_v10 = vld [vmem:[#allocation2 + $0x18] sm:$0xff]  ;;  %233 = vst.msk [vmem:[#allocation2 + $0x70] sm:$0xff] %vm218_vm2, %v552_v5  ;;  %223 = vst.msk [vmem:[#allocation2 + $0x20] sm:$0xff] %vm218_vm2, %v167_v6  ;;  %v199_v12 = vpop.f32.mrb[5].mxu1  ;;  %v545_v13 = vpop.f32.mrb[6].mxu0 }
  0xe6   :  { %v474_v14 = vpack.c.bf16 %v341_v0, %v341_v0  ;;  %v347_v15 = vadd.f32 %v506_v58, %v299_v9  ;;  %v342_v16 = vadd.f32 %v495_v59, %v294_v10  ;;  %v302_v17 = vld [vmem:[#allocation2 + $0x58] sm:$0xff]  ;;  %v292_v18 = vld [vmem:[#allocation2 + $0x8] sm:$0xff]  ;;  %231 = vst.msk [vmem:[#allocation2 + $0x60] sm:$0xff] %vm218_vm2, %v199_v12  ;;  %226 = vst.msk [vmem:[#allocation2 + $0x38] sm:$0xff] %vm218_vm2, %v545_v13  ;;  %v553_v20 = vpop.f32.mrb[6].mxu1  ;;  %v170_v21 = vpop.f32.mrb[7].mxu0 }
  0xe7   :  { %v482_v22 = vpack.c.bf16 %v349_v7, %v349_v7  ;;  %v472_v23 = vpack.c.bf16 %v339_v8, %v339_v8  ;;  %v350_v24 = vadd.f32 %v511_v61, %v302_v17  ;;  %v340_v25 = vadd.f32 %v491_v62, %v292_v18  ;;  %v300_v26 = vld [vmem:[#allocation2 + $0x48] sm:$0xff]  ;;  %234 = vst.msk [vmem:[#allocation2 + $0x78] sm:$0xff] %vm218_vm2, %v553_v20  ;;  %v202_v28 = vpop.f32.mrb[7].mxu1 }
  0xe8   :  { %224 = vst.msk [vmem:[#allocation2 + $0x28] sm:$0xff] %vm218_vm2, %v170_v21  ;;  %v480_v29 = vpack.c.bf16 %v347_v15, %v347_v15  ;;  %v475_v30 = vpack.c.bf16 %v342_v16, %v342_v16  ;;  %v348_v31 = vadd.f32 %v507_v3, %v300_v26  ;;  %232 = vst.msk [vmem:[#allocation2 + $0x68] sm:$0xff] %vm218_vm2, %v202_v28 }
  0xe9   :  { %422 = vst.msk [vmem:[%s750_s3 + $0x8] sm:$0xf] %vm419_vm3, %v474_v14  ;;  %430 = vst.msk [vmem:[%s750_s3 + $0x28] sm:$0xf] %vm419_vm3, %v482_v22  ;;  %v483_v33 = vpack.c.bf16 %v350_v24, %v350_v24  ;;  %v473_v34 = vpack.c.bf16 %v340_v25, %v340_v25 }
  0xea   :  { %420 = vst.msk [vmem:[%s750_s3] sm:$0xf] %vm419_vm3, %v472_v23  ;;  %428 = vst.msk [vmem:[%s750_s3 + $0x20] sm:$0xf] %vm419_vm3, %v480_v29  ;;  %v481_v37 = vpack.c.bf16 %v348_v31, %v348_v31 }
  0xeb   :  { %423 = vst.msk [vmem:[%s750_s3 + $0xc] sm:$0xf] %vm419_vm3, %v475_v30  ;;  %431 = vst.msk [vmem:[%s750_s3 + $0x2c] sm:$0xf] %vm419_vm3, %v483_v33  ;;  %v297_v40 = vld [vmem:[#allocation2 + $0x30] sm:$0xff] }
  0xec   :  { %421 = vst.msk [vmem:[%s750_s3 + $0x4] sm:$0xf] %vm419_vm3, %v473_v34  ;;  %429 = vst.msk [vmem:[%s750_s3 + $0x24] sm:$0xf] %vm419_vm3, %v481_v37  ;;  %v345_v43 = vadd.f32 %v502_v32, %v297_v40  ;;  %v305_v44 = vld [vmem:[#allocation2 + $0x70] sm:$0xff]  ;;  %v295_v45 = vld [vmem:[#allocation2 + $0x20] sm:$0xff] }
  0xed   :  { %v353_v47 = vadd.f32 %v518_v35, %v305_v44  ;;  %v343_v48 = vadd.f32 %v498_v36, %v295_v45  ;;  %v303_v49 = vld [vmem:[#allocation2 + $0x60] sm:$0xff]  ;;  %v298_v50 = vld [vmem:[#allocation2 + $0x38] sm:$0xff] }
  0xee   :  { %v478_v51 = vpack.c.bf16 %v345_v43, %v345_v43  ;;  %v351_v52 = vadd.f32 %v514_v38, %v303_v49  ;;  %v346_v53 = vadd.f32 %v503_v39, %v298_v50  ;;  %v306_v54 = vld [vmem:[#allocation2 + $0x78] sm:$0xff] }
  0xef   :  { %v296_v55 = vld [vmem:[#allocation2 + $0x28] sm:$0xff]  ;;  %v486_v56 = vpack.c.bf16 %v353_v47, %v353_v47  ;;  %v476_v57 = vpack.c.bf16 %v343_v48, %v343_v48  ;;  %v354_v58 = vadd.f32 %v519_v41, %v306_v54 }
  0xf0   :  { %v344_v59 = vadd.f32 %v499_v42, %v296_v55  ;;  %v304_v60 = vld [vmem:[#allocation2 + $0x68] sm:$0xff]  ;;  %426 = vst.msk [vmem:[%s750_s3 + $0x18] sm:$0xf] %vm419_vm3, %v478_v51  ;;  %v484_v61 = vpack.c.bf16 %v351_v52, %v351_v52  ;;  %v479_v62 = vpack.c.bf16 %v346_v53, %v346_v53 }
  0xf1   :  { %v352_v63 = vadd.f32 %v515_v46, %v304_v60  ;;  %434 = vst.msk [vmem:[%s750_s3 + $0x38] sm:$0xf] %vm419_vm3, %v486_v56  ;;  %424 = vst.msk [vmem:[%s750_s3 + $0x10] sm:$0xf] %vm419_vm3, %v476_v57  ;;  %v487_v0 = vpack.c.bf16 %v354_v58, %v354_v58 }
  0xf2   :  { %v477_v1 = vpack.c.bf16 %v344_v59, %v344_v59  ;;  %432 = vst.msk [vmem:[%s750_s3 + $0x30] sm:$0xf] %vm419_vm3, %v484_v61  ;;  %427 = vst.msk [vmem:[%s750_s3 + $0x1c] sm:$0xf] %vm419_vm3, %v479_v62 }
  0xf3   :  { %v485_v2 = vpack.c.bf16 %v352_v63, %v352_v63  ;;  %435 = vst.msk [vmem:[%s750_s3 + $0x3c] sm:$0xf] %vm419_vm3, %v487_v0 }
  0xf4   :  { %425 = vst.msk [vmem:[%s750_s3 + $0x14] sm:$0xf] %vm419_vm3, %v477_v1 }
  0xf5   :  { %433 = vst.msk [vmem:[%s750_s3 + $0x34] sm:$0xf] %vm419_vm3, %v485_v2 }

// kernel: _lambda_.30
= control target key start
LH: loop header
LB: loop body
LE: loop exit
PB: predicated region body
PF: predicated region fallthrough
CT: control target
= control target key end

     0   :  { %v129_v0 = vmov 0.0   ;;  %vm130_vm0 = vmmov 0   ;;  %vm27_vm1 = vcmask 130048   ;;  %vm76_vm2 = vcmask 523264   ;;  %s158_s1 = inlined_call_operand.vmem [shape: bf16[16,64], index: 1, kind: input, shape index: {}]   ;;  %s159_s0 = inlined_call_operand.vmem [shape: bf16[16,16], index: 0, kind: input, shape index: {}]   ;;  %s160_s2 = inlined_call_operand.vmem [shape: bf16[16,64], index: 2, kind: output, shape index: {}]  }
   0x1   :  { %119 = vmatprep.subr.bf16.mxu0 %v129_v0  ;;  %v127_v1 = vld [vmem:[%s158_s1] sm:$0xff]   ;;  %121 = vmatprep.mubr.msk.bf16.mxu0 %vm130_vm0, %v129_v0  ;;  %vm103_vm3 = vcmask 519168  }
   0x2   :  { %v128_v2 = vld [vmem:[%s159_s0] sm:$0xff]   ;;  %120 = vmatpush3.bf16.msra.mxu0 %v127_v1 }
   0x5   :  { %122 = vmatmul.mubr.msk.bf16.vlgmr.msra.gmra.mrb[0].mxu0 %vm27_vm1, %v128_v2 }
  0xd8   :  { %v65_v3 = vpop.f32.mrb[0].mxu0 }
  0xd9   :  { %77 = vst.msk [vmem:[#allocation2] sm:$0xff] %vm76_vm2, %v65_v3  ;;  %v123_v4 = vpop.f32.mrb[1].mxu0 }
  0xda   :  { %v68_v5 = vpop.f32.mrb[2].mxu0 }
  0xdb   :  { %78 = vst.msk [vmem:[#allocation2 + $0x8] sm:$0xff] %vm76_vm2, %v68_v5  ;;  %v124_v6 = vpop.f32.mrb[3].mxu0 }
  0xe0   :  { %v93_v7 = vld [vmem:[#allocation2] sm:$0xff] }
  0xe1   :  { %v115_v8 = vpack.c.bf16 %v93_v7, %v93_v7 }
  0xe2   :  { %v94_v9 = vld [vmem:[#allocation2 + $0x8] sm:$0xff] }
  0xe3   :  { %104 = vst.msk [vmem:[%s160_s2] sm:$0xf] %vm103_vm3, %v115_v8  ;;  %v116_v10 = vpack.c.bf16 %v94_v9, %v94_v9 }
  0xe5   :  { %105 = vst.msk [vmem:[%s160_s2 + $0x4] sm:$0xf] %vm103_vm3, %v116_v10 }

// kernel: _lambda_.31
= control target key start
LH: loop header
LB: loop body
LE: loop exit
PB: predicated region body
PF: predicated region fallthrough
CT: control target
= control target key end

     0   :  { %v725_v3 = vmov 0.0   ;;  %v726_v4 = vmov 0   ;;  %vm727_vm0 = vmmov 0   ;;  %s728_s20 = smov 118   ;;  %vm37_vm1 = vcmask 130048   ;;  %s730_s23 = smov 126   ;;  %s840_s0 = inlined_call_operand.vmem [shape: bf16[16,142], index: 0, kind: input, shape index: {}]   ;;  %s841_s1 = inlined_call_operand.vmem [shape: bf16[9,16,16], index: 1, kind: input, shape index: {}]   ;;  %s842_s2 = inlined_call_operand.vmem [shape: bf16[16,120], index: 2, kind: input, shape index: {}]   ;;  %s843_s3 = inlined_call_operand.vmem [shape: bf16[16,120], index: 3, kind: output, shape index: {}]  }
   0x1   :  { %v189_v0 = vld [vmem:[%s840_s0] sm:$0xff]  ;;  %v190_v1 = vld [vmem:[%s840_s0 + $0x8] sm:$0xff]  ;;  %651 = vmatprep.subr.bf16.mxu0 %v725_v3  ;;  %657 = vmatprep.subr.bf16.mxu1 %v725_v3  ;;  %s731_s24 = smov 117   ;;  %s732_s25 = smov 116   ;;  %vm213_vm2 = vcmask 965632   ;;  %v719_v20 = vld [vmem:[%s841_s1 + $0x18] sm:$0xff]  }
   0x2   :  { %v15_v2 = vld [vmem:[%s840_s0] sm:$0xf]  ;;  %v191_v5 = vmax.bf16 %v726_v4, %v189_v0  ;;  %v192_v6 = vmax.bf16 %v726_v4, %v190_v1  ;;  %v16_v7 = vld [vmem:[%s840_s0 + $0x8] sm:$0xf]  ;;  %653 = vmatprep.mubr.msk.bf16.mxu0 %vm727_vm0, %v725_v3  ;;  %659 = vmatprep.mubr.msk.bf16.mxu1 %vm727_vm0, %v725_v3  ;;  %s729_s0 = smov 127   ;;  %s733_s26 = smov 108  }
   0x3   :  { %v17_v8 = vmax.bf16 %v726_v4, %v15_v2  ;;  %v18_v9 = vmax.bf16 %v726_v4, %v16_v7  ;;  %v717_v13 = vld [vmem:[%s841_s1] sm:$0xff]   ;;  %s734_s27 = smov 107   ;;  %s735_s28 = smov 106   ;;  %v716_v16 = vld [vmem:[%s841_s1 + $0x8] sm:$0xff]   ;;  %vm274_vm3 = vcmask 957440   ;;  %v718_v23 = vld [vmem:[%s841_s1 + $0x10] sm:$0xff]  }
   0x4   :  { %v602_v10 = vcombine.low %v191_v5, %v192_v6  ;;  %v603_v12 = vcombine.high %v191_v5, %v192_v6  ;;  %vm335_vm4 = vcmask 949248   ;;  %v721_v28 = vld [vmem:[%s841_s1 + $0x28] sm:$0xff]   ;;  %vm396_vm5 = vcmask 883712   ;;  %v720_v31 = vld [vmem:[%s841_s1 + $0x20] sm:$0xff]   ;;  %v723_v36 = vld [vmem:[%s841_s1 + $0x38] sm:$0xff]  }
   0x5   :  { %v591_v11 = vcombine.low %v17_v8, %v18_v9  ;;  %vm457_vm6 = vcmask 875520   ;;  %vm518_vm7 = vcmask 867328   ;;  %v722_v39 = vld [vmem:[%s841_s1 + $0x30] sm:$0xff]   ;;  %v724_v41 = vld [vmem:[%s841_s1 + $0x40] sm:$0xff]   ;;  %vm581_vm8 = vcmask 977920  }
   0x6   :  { %209 = vrot.lane.b32.xlu1 %v602_v10, %s728_s20 }
   0x7   :  { %34 = vrot.lane.b32.xlu0 %v591_v11, %s729_s0  ;;  %658 = vmatpush3.bf16.msra.mxu1 %v591_v11 }
   0x8   :  { %669 = vmatprep.subr.bf16.mxu1 %v725_v3 }
   0xa   :  { %211 = vrot.lane.b32.xlu1 %v603_v12, %s728_s20  ;;  %660 = vmatmul.mubr.msk.bf16.vlgmr.msra.gmra.mrb[0].mxu1 %vm37_vm1, %v717_v13 }
   0xb   :  { %140 = vrot.lane.b32.xlu0 %v591_v11, %s730_s23  ;;  %671 = vmatprep.mubr.msk.bf16.mxu1 %vm727_vm0, %v725_v3 }
   0xe   :  { %272 = vrot.lane.b32.xlu1 %v603_v12, %s731_s24 }
   0xf   :  { %270 = vrot.lane.b32.xlu0 %v602_v10, %s731_s24 }
  0x12   :  { %333 = vrot.lane.b32.xlu1 %v603_v12, %s732_s25 }
  0x13   :  { %331 = vrot.lane.b32.xlu0 %v602_v10, %s732_s25 }
  0x16   :  { %394 = vrot.lane.b32.xlu1 %v603_v12, %s733_s26 }
  0x17   :  { %392 = vrot.lane.b32.xlu0 %v602_v10, %s733_s26 }
  0x1a   :  { %455 = vrot.lane.b32.xlu1 %v603_v12, %s734_s27 }
  0x1b   :  { %453 = vrot.lane.b32.xlu0 %v602_v10, %s734_s27 }
  0x1e   :  { %516 = vrot.lane.b32.xlu1 %v603_v12, %s735_s28 }
  0x1f   :  { %514 = vrot.lane.b32.xlu0 %v602_v10, %s735_s28 }
  0x78   :  { %v210_v14 = vpop.permute.xlu1 %209 }
  0x79   :  { %v35_v15 = vpop.permute.xlu0 %34 }
  0x7a   :  { %652 = vmatpush3.bf16.msra.mxu0 %v35_v15 }
  0x7b   :  { %663 = vmatprep.subr.bf16.mxu0 %v725_v3 }
  0x7c   :  { %v212_v17 = vpop.permute.xlu1 %211 }
  0x7d   :  { %v214_v18 = vsel %vm213_vm2, %v210_v14, %v212_v17  ;;  %654 = vmatmul.mubr.msk.bf16.vlgmr.msra.gmra.mrb[0].mxu0 %vm37_vm1, %v716_v16  ;;  %v141_v19 = vpop.permute.xlu0 %140 }
  0x7e   :  { %664 = vmatpush3.bf16.msra.mxu0 %v141_v19  ;;  %670 = vmatpush3.bf16.msra.mxu1 %v214_v18 }
  0x7f   :  { %665 = vmatprep.mubr.msk.bf16.mxu0 %vm727_vm0, %v725_v3  ;;  %675 = vmatprep.subr.bf16.mxu0 %v725_v3 }
  0x80   :  { %v273_v21 = vpop.permute.xlu1 %272  ;;  %681 = vmatprep.subr.bf16.mxu1 %v725_v3 }
  0x81   :  { %v271_v22 = vpop.permute.xlu0 %270  ;;  %672 = vmatmul.mubr.msk.bf16.vlgmr.msra.gmra.mrb[4].mxu1 %vm37_vm1, %v719_v20 }
  0x82   :  { %683 = vmatprep.mubr.msk.bf16.mxu1 %vm727_vm0, %v725_v3  ;;  %v275_v24 = vsel %vm274_vm3, %v271_v22, %v273_v21 }
  0x84   :  { %v334_v25 = vpop.permute.xlu1 %333 }
  0x85   :  { %666 = vmatmul.mubr.msk.bf16.vlgmr.msra.gmra.mrb[4].mxu0 %vm37_vm1, %v718_v23  ;;  %v332_v26 = vpop.permute.xlu0 %331  ;;  %v630_v23 = vld [vmem:[%s842_s2] sm:$0xff]  }
  0x86   :  { %676 = vmatpush3.bf16.msra.mxu0 %v275_v24  ;;  %v336_v27 = vsel %vm335_vm4, %v332_v26, %v334_v25  ;;  %677 = vmatprep.mubr.msk.bf16.mxu0 %vm727_vm0, %v725_v3  ;;  %v631_v25 = vunpack.c.l.bf16 %v630_v23 }
  0x87   :  { %682 = vmatpush3.bf16.msra.mxu1 %v336_v27  ;;  %687 = vmatprep.subr.bf16.mxu0 %v725_v3 }
  0x88   :  { %v395_v29 = vpop.permute.xlu1 %394  ;;  %693 = vmatprep.subr.bf16.mxu1 %v725_v3 }
  0x89   :  { %v393_v30 = vpop.permute.xlu0 %392 }
  0x8a   :  { %684 = vmatmul.mubr.msk.bf16.vlgmr.msra.gmra.mrb[8].mxu1 %vm37_vm1, %v721_v28  ;;  %v397_v32 = vsel %vm396_vm5, %v393_v30, %v395_v29  ;;  %v632_v29 = vunpack.c.h.bf16 %v630_v23 }
  0x8b   :  { %695 = vmatprep.mubr.msk.bf16.mxu1 %vm727_vm0, %v725_v3 }
  0x8c   :  { %v456_v33 = vpop.permute.xlu1 %455 }
  0x8d   :  { %678 = vmatmul.mubr.msk.bf16.vlgmr.msra.gmra.mrb[8].mxu0 %vm37_vm1, %v720_v31  ;;  %v454_v34 = vpop.permute.xlu0 %453 }
  0x8e   :  { %688 = vmatpush3.bf16.msra.mxu0 %v397_v32  ;;  %v458_v35 = vsel %vm457_vm6, %v454_v34, %v456_v33  ;;  %689 = vmatprep.mubr.msk.bf16.mxu0 %vm727_vm0, %v725_v3 }
  0x8f   :  { %694 = vmatpush3.bf16.msra.mxu1 %v458_v35  ;;  %699 = vmatprep.subr.bf16.mxu0 %v725_v3 }
  0x90   :  { %v517_v37 = vpop.permute.xlu1 %516 }
  0x91   :  { %v515_v38 = vpop.permute.xlu0 %514 }
  0x92   :  { %696 = vmatmul.mubr.msk.bf16.vlgmr.msra.gmra.mrb[12].mxu1 %vm37_vm1, %v723_v36  ;;  %v519_v40 = vsel %vm518_vm7, %v515_v38, %v517_v37 }
  0x95   :  { %690 = vmatmul.mubr.msk.bf16.vlgmr.msra.gmra.mrb[12].mxu0 %vm37_vm1, %v722_v39 }
  0x96   :  { %700 = vmatpush3.bf16.msra.mxu0 %v519_v40  ;;  %701 = vmatprep.mubr.msk.bf16.mxu0 %vm727_vm0, %v725_v3 }
  0x9d   :  { %702 = vmatmul.mubr.msk.bf16.vlgmr.msra.gmra.mrb[16].mxu0 %vm37_vm1, %v724_v41 }
  0xdd   :  { %v125_v42 = vpop.f32.mrb[0].mxu1 }
  0xde   :  { %v661_v43 = vpop.f32.mrb[1].mxu1 }
  0xdf   :  { %v128_v44 = vpop.f32.mrb[2].mxu1 }
  0xe0   :  { %v662_v45 = vpop.f32.mrb[3].mxu1 }
 0x150   :  { %v75_v46 = vpop.f32.mrb[0].mxu0 }
 0x151   :  { %v126_v47 = vadd.f32 %v125_v42, %v75_v46  ;;  %v655_v48 = vpop.f32.mrb[1].mxu0 }
 0x152   :  { %v78_v49 = vpop.f32.mrb[2].mxu0 }
 0x153   :  { %v129_v50 = vadd.f32 %v128_v44, %v78_v49  ;;  %v656_v51 = vpop.f32.mrb[3].mxu0 }
 0x154   :  { %v253_v52 = vpop.f32.mrb[4].mxu1 }
 0x155   :  { %v673_v53 = vpop.f32.mrb[5].mxu1 }
 0x156   :  { %v256_v54 = vpop.f32.mrb[6].mxu1 }
 0x157   :  { %v674_v55 = vpop.f32.mrb[7].mxu1 }
 0x158   :  { %v180_v56 = vpop.f32.mrb[4].mxu0 }
 0x159   :  { %v187_v57 = vadd.f32 %v180_v56, %v126_v47  ;;  %v667_v58 = vpop.f32.mrb[5].mxu0 }
 0x15a   :  { %v183_v59 = vpop.f32.mrb[6].mxu0 }
 0x15b   :  { %v188_v60 = vadd.f32 %v183_v59, %v129_v50  ;;  %v260_v61 = vadd.f32 %v253_v52, %v187_v57  ;;  %v668_v62 = vpop.f32.mrb[7].mxu0 }
 0x15d   :  { %v261_v63 = vadd.f32 %v256_v54, %v188_v60  ;;  %v375_v0 = vpop.f32.mrb[8].mxu1 }
 0x15e   :  { %v685_v1 = vpop.f32.mrb[9].mxu1 }
 0x15f   :  { %v378_v2 = vpop.f32.mrb[10].mxu1 }
 0x160   :  { %v314_v3 = vpop.f32.mrb[8].mxu0  ;;  %v686_v4 = vpop.f32.mrb[11].mxu1 }
 0x161   :  { %v321_v5 = vadd.f32 %v314_v3, %v260_v61  ;;  %v679_v6 = vpop.f32.mrb[9].mxu0 }
 0x162   :  { %v317_v7 = vpop.f32.mrb[10].mxu0 }
 0x163   :  { %v322_v8 = vadd.f32 %v317_v7, %v261_v63  ;;  %v382_v9 = vadd.f32 %v375_v0, %v321_v5  ;;  %v680_v10 = vpop.f32.mrb[11].mxu0 }
 0x165   :  { %v383_v11 = vadd.f32 %v378_v2, %v322_v8  ;;  %v497_v12 = vpop.f32.mrb[12].mxu1 }
 0x166   :  { %v697_v13 = vpop.f32.mrb[13].mxu1 }
 0x167   :  { %v500_v14 = vpop.f32.mrb[14].mxu1 }
 0x168   :  { %v436_v15 = vpop.f32.mrb[12].mxu0  ;;  %v698_v16 = vpop.f32.mrb[15].mxu1 }
 0x169   :  { %v443_v17 = vadd.f32 %v436_v15, %v382_v9  ;;  %v691_v18 = vpop.f32.mrb[13].mxu0 }
 0x16a   :  { %v439_v19 = vpop.f32.mrb[14].mxu0 }
 0x16b   :  { %v444_v20 = vadd.f32 %v439_v19, %v383_v11  ;;  %v504_v21 = vadd.f32 %v497_v12, %v443_v17  ;;  %v692_v22 = vpop.f32.mrb[15].mxu0 }
 0x16d   :  { %v505_v24 = vadd.f32 %v500_v14, %v444_v20 }
 0x170   :  { %v558_v26 = vpop.f32.mrb[16].mxu0 }
 0x171   :  { %v565_v27 = vadd.f32 %v558_v26, %v504_v21  ;;  %v703_v28 = vpop.f32.mrb[17].mxu0 }
 0x172   :  { %v561_v30 = vpop.f32.mrb[18].mxu0 }
 0x173   :  { %v571_v31 = vadd.f32 %v631_v25, %v565_v27  ;;  %v566_v32 = vadd.f32 %v561_v30, %v505_v24  ;;  %v704_v33 = vpop.f32.mrb[19].mxu0 }
 0x175   :  { %v627_v34 = vpack.c.bf16 %v571_v31, %v571_v31  ;;  %v572_v35 = vadd.f32 %v632_v29, %v566_v32 }
 0x177   :  { %582 = vst.msk [vmem:[%s843_s3] sm:$0xf] %vm581_vm8, %v627_v34  ;;  %v628_v36 = vpack.c.bf16 %v572_v35, %v572_v35 }
 0x179   :  { %583 = vst.msk [vmem:[%s843_s3 + $0x4] sm:$0xf] %vm581_vm8, %v628_v36 }

// kernel: _lambda_.32
= control target key start
LH: loop header
LB: loop body
LE: loop exit
PB: predicated region body
PF: predicated region fallthrough
CT: control target
= control target key end

     0   :  { %vm36_vm0 = vcmask 130048   ;;  %v175_v2 = vmov 0   ;;  %vm96_vm1 = vcmask 523264   ;;  %vm141_vm2 = vcmask 519168   ;;  %s215_s1 = inlined_call_operand.vmem [shape: bf16[16,64], index: 1, kind: input, shape index: {}]   ;;  %s216_s0 = inlined_call_operand.vmem [shape: bf16[32,16], index: 0, kind: input, shape index: {}]   ;;  %s217_s2 = inlined_call_operand.vmem [shape: bf16[32,64], index: 2, kind: output, shape index: {}]  }
   0x1   :  { %v16_v0 = vld [vmem:[%s215_s1] sm:$0xf]  ;;  %v17_v1 = vld [vmem:[%s215_s1 + $0x4] sm:$0xf]  ;;  %v174_v7 = vld [vmem:[%s216_s0 + $0x8] sm:$0xff]  }
   0x2   :  { %v18_v3 = vmax.bf16 %v175_v2, %v16_v0  ;;  %v19_v4 = vmax.bf16 %v175_v2, %v17_v1  ;;  %v173_v5 = vld [vmem:[%s216_s0] sm:$0xff]  }
   0x3   :  { %168 = vmatprep.mubr.msk.bf16.mxu0 %vm36_vm0, %v173_v5 }
   0x4   :  { %v152_v6 = vcombine.low %v18_v3, %v19_v4 }
   0x6   :  { %166 = vmatprep.subr.bf16.mxu0 %v152_v6 }
   0x7   :  { %167 = vmatpush3.bf16.msra.mxu0 %v152_v6 }
   0xa   :  { %169 = vmatmul.mubr.msk.bf16.vlgmr.msra.gmra.mrb[0].mxu0 %vm36_vm0, %v174_v7 }
  0xdd   :  { %v170_v8 = vpop.f32.mrb[0].mxu0 }
  0xde   :  { %99 = vst.msk [vmem:[#allocation2 + $0x10] sm:$0xff] %vm96_vm1, %v170_v8  ;;  %v77_v9 = vpop.f32.mrb[1].mxu0 }
  0xdf   :  { %97 = vst.msk [vmem:[#allocation2] sm:$0xff] %vm96_vm1, %v77_v9  ;;  %v171_v10 = vpop.f32.mrb[2].mxu0 }
  0xe0   :  { %100 = vst.msk [vmem:[#allocation2 + $0x18] sm:$0xff] %vm96_vm1, %v171_v10  ;;  %v80_v11 = vpop.f32.mrb[3].mxu0 }
  0xe1   :  { %98 = vst.msk [vmem:[#allocation2 + $0x8] sm:$0xff] %vm96_vm1, %v80_v11 }
  0xe5   :  { %v123_v12 = vld [vmem:[#allocation2 + $0x10] sm:$0xff] }
  0xe6   :  { %v161_v13 = vpack.c.bf16 %v123_v12, %v123_v12  ;;  %v121_v14 = vld [vmem:[#allocation2] sm:$0xff] }
  0xe7   :  { %v159_v15 = vpack.c.bf16 %v121_v14, %v121_v14  ;;  %v124_v16 = vld [vmem:[#allocation2 + $0x18] sm:$0xff] }
  0xe8   :  { %144 = vst.msk [vmem:[%s217_s2 + $0x8] sm:$0xf] %vm141_vm2, %v161_v13  ;;  %v162_v17 = vpack.c.bf16 %v124_v16, %v124_v16  ;;  %v122_v18 = vld [vmem:[#allocation2 + $0x8] sm:$0xff] }
  0xe9   :  { %142 = vst.msk [vmem:[%s217_s2] sm:$0xf] %vm141_vm2, %v159_v15  ;;  %v160_v19 = vpack.c.bf16 %v122_v18, %v122_v18 }
  0xea   :  { %145 = vst.msk [vmem:[%s217_s2 + $0xc] sm:$0xf] %vm141_vm2, %v162_v17 }
  0xeb   :  { %143 = vst.msk [vmem:[%s217_s2 + $0x4] sm:$0xf] %vm141_vm2, %v160_v19 }

// kernel: _lambda_.36
= control target key start
LH: loop header
LB: loop body
LE: loop exit
PB: predicated region body
PF: predicated region fallthrough
CT: control target
= control target key end

     0   :  { %v113_v1 = vmov 0   ;;  %vm25_vm0 = vcmask 130048   ;;  %s141_s1 = inlined_call_operand.vmem [shape: bf16[16,256], index: 1, kind: input, shape index: {}]   ;;  %s142_s0 = inlined_call_operand.vmem [shape: bf16[8,16], index: 0, kind: input, shape index: {}]   ;;  %s143_s2 = inlined_call_operand.vmem [shape: bf16[8,256], index: 2, kind: output, shape index: {}]  }
   0x1   :  { %v110_v0 = vld [vmem:[%s141_s1 + $0x4] ss:$8 sps:$4 sm:$0xff]   ;;  %61 = vmatprep.mubr.bf16.mxu0 %v113_v1  ;;  %v112_v2 = vld [vmem:[%s141_s1] ss:$8 sps:$4 sm:$0xff]  }
   0x2   :  { %29 = vmatprep.subr.bf16.mxu0 %v110_v0  ;;  %v12_v3 = vld [vmem:[%s142_s0] sm:$0xf] }
   0x3   :  { %30 = vmatpush1.bf16.msra.mxu0 %v112_v2 }
   0x6   :  { %106 = vmatmul.mubr.msk.bf16.vlgmr.msra.gmra.mrb[0].mxu0 %vm25_vm0, %v12_v3 }
  0xd9   :  { %v63_v4 = vpop.f32.mrb[0].mxu0 }
  0xda   :  { %v65_v5 = vpop.f32.mrb[1].mxu0 }
  0xdb   :  { %v108_v6 = vpack.c.bf16 %v65_v5, %v63_v4  ;;  %v67_v7 = vpop.f32.mrb[2].mxu0 }
  0xdc   :  { %v68_v8 = vpop.f32.mrb[3].mxu0 }
  0xdd   :  { %99 = vst [vmem:[%s143_s2] sm:$0xff] %v108_v6 }

// kernel: _lambda_.33
= control target key start
LH: loop header
LB: loop body
LE: loop exit
PB: predicated region body
PF: predicated region fallthrough
CT: control target
= control target key end

     0   :  { %v1164_v3 = vmov 0.0   ;;  %vm1165_vm0 = vmmov 0   ;;  %v1166_v4 = vmov 0   ;;  %s1167_s17 = smov 127   ;;  %s1168_s18 = smov 126   ;;  %vm42_vm1 = vcmask 1039360   ;;  %s1329_s0 = inlined_call_operand.vmem [shape: bf16[16,398], index: 0, kind: input, shape index: {}]   ;;  %s1330_s1 = inlined_call_operand.vmem [shape: bf16[9,8,16], index: 1, kind: input, shape index: {}]   ;;  %s1331_s2 = inlined_call_operand.vmem [shape: bf16[8,360], index: 2, kind: output, shape index: {}]  }
   0x1   :  { %v12_v0 = vld [vmem:[%s1329_s0] sm:$0xff]  ;;  %v14_v1 = vld [vmem:[%s1329_s0 + $0x10] sm:$0xff]  ;;  %v13_v2 = vld [vmem:[%s1329_s0 + $0x8] sm:$0xf]  ;;  %1035 = vmatprep.subr.bf16.mxu1 %v1164_v3  ;;  %1037 = vmatprep.mubr.msk.bf16.mxu1 %vm1165_vm0, %v1164_v3  ;;  %s1169_s19 = smov 110   ;;  %s1170_s20 = smov 109  }
   0x2   :  { %v16_v5 = vmax.bf16 %v1166_v4, %v12_v0  ;;  %v18_v6 = vmax.bf16 %v1166_v4, %v14_v1  ;;  %v15_v7 = vld [vmem:[%s1329_s0 + $0x18] sm:$0xf]  ;;  %v17_v8 = vmax.bf16 %v1166_v4, %v13_v2  ;;  %84 = vmatprep.mubr.bf16.mxu0 %v1166_v4  ;;  %v625_v13 = vld [vmem:[%s1329_s0 + $0x8] sm:$0xff]  ;;  %s1171_s25 = smov 108   ;;  %s1172_s26 = smov 92   ;;  %vm48_vm2 = vcmask 130048  }
   0x3   :  { %v19_v9 = vmax.bf16 %v1166_v4, %v15_v7  ;;  %v627_v14 = vld [vmem:[%s1329_s0 + $0x18] sm:$0xff]  ;;  %v629_v15 = vmax.bf16 %v1166_v4, %v625_v13  ;;  %s1173_s27 = smov 91   ;;  %s1174_s0 = smov 90   ;;  %v980_v23 = vld [vmem:[%s1330_s1 + $0x4] sm:$0xf]  ;;  %vm228_vm3 = vcmask 1031168  }
   0x4   :  { %v982_v10 = vcombine.high %v16_v5, %v18_v6  ;;  %v1210_v11 = vcombine.low %v16_v5, %v18_v6  ;;  %v631_v16 = vmax.bf16 %v1166_v4, %v627_v14  ;;  %v20_v29 = vld [vmem:[%s1330_s1] sm:$0xf]  ;;  %vm329_vm4 = vcmask 900096   ;;  %v988_v35 = vld [vmem:[%s1330_s1 + $0x8] sm:$0xf] }
   0x5   :  { %v983_v12 = vcombine.low %v17_v8, %v19_v9  ;;  %vm430_vm5 = vcmask 891904   ;;  %v991_v41 = vld [vmem:[%s1330_s1 + $0xc] sm:$0xf]  ;;  %vm531_vm6 = vcmask 883712   ;;  %v994_v47 = vld [vmem:[%s1330_s1 + $0x10] sm:$0xf] }
   0x6   :  { %38 = vrot.lane.b32.xlu0 %v982_v10, %s1167_s17  ;;  %36 = vrot.lane.b32.xlu1 %v1210_v11, %s1167_s17  ;;  %v1003_v17 = vcombine.low %v629_v15, %v631_v16  ;;  %v1004_v18 = vcombine.high %v629_v15, %v631_v16  ;;  %vm658_vm7 = vcmask 752640   ;;  %v997_v54 = vld [vmem:[%s1330_s1 + $0x14] sm:$0xf]  ;;  %vm762_vm8 = vcmask 744448   ;;  %v1000_v62 = vld [vmem:[%s1330_s1 + $0x18] sm:$0xf] }
   0x7   :  { %vm866_vm9 = vcmask 736256   ;;  %v1007_v8 = vld [vmem:[%s1330_s1 + $0x1c] sm:$0xf]  ;;  %vm974_vm10 = vcmask 846848  }
   0xa   :  { %40 = vrot.lane.b32.xlu0 %v983_v12, %s1167_s17  ;;  %224 = vrot.lane.b32.xlu1 %v982_v10, %s1168_s18 }
   0xe   :  { %226 = vrot.lane.b32.xlu0 %v983_v12, %s1168_s18  ;;  %222 = vrot.lane.b32.xlu1 %v1210_v11, %s1168_s18 }
  0x12   :  { %325 = vrot.lane.b32.xlu0 %v982_v10, %s1169_s19  ;;  %327 = vrot.lane.b32.xlu1 %v983_v12, %s1169_s19 }
  0x16   :  { %323 = vrot.lane.b32.xlu0 %v1210_v11, %s1169_s19  ;;  %426 = vrot.lane.b32.xlu1 %v982_v10, %s1170_s20 }
  0x1a   :  { %428 = vrot.lane.b32.xlu0 %v983_v12, %s1170_s20  ;;  %424 = vrot.lane.b32.xlu1 %v1210_v11, %s1170_s20 }
  0x1e   :  { %527 = vrot.lane.b32.xlu0 %v982_v10, %s1171_s25  ;;  %529 = vrot.lane.b32.xlu1 %v983_v12, %s1171_s25 }
  0x22   :  { %525 = vrot.lane.b32.xlu0 %v1210_v11, %s1171_s25  ;;  %652 = vrot.lane.b32.xlu1 %v982_v10, %s1172_s26 }
  0x26   :  { %654 = vrot.lane.b32.xlu0 %v1003_v17, %s1172_s26  ;;  %650 = vrot.lane.b32.xlu1 %v1210_v11, %s1172_s26 }
  0x2a   :  { %656 = vrot.lane.b32.xlu0 %v1004_v18, %s1172_s26  ;;  %756 = vrot.lane.b32.xlu1 %v982_v10, %s1173_s27 }
  0x2e   :  { %758 = vrot.lane.b32.xlu0 %v1003_v17, %s1173_s27  ;;  %754 = vrot.lane.b32.xlu1 %v1210_v11, %s1173_s27 }
  0x32   :  { %760 = vrot.lane.b32.xlu0 %v1004_v18, %s1173_s27  ;;  %860 = vrot.lane.b32.xlu1 %v982_v10, %s1174_s0 }
  0x36   :  { %862 = vrot.lane.b32.xlu0 %v1003_v17, %s1174_s0  ;;  %858 = vrot.lane.b32.xlu1 %v1210_v11, %s1174_s0 }
  0x3a   :  { %864 = vrot.lane.b32.xlu0 %v1004_v18, %s1174_s0 }
  0x78   :  { %v39_v19 = vpop.permute.xlu0 %38  ;;  %v37_v20 = vpop.permute.xlu1 %36 }
  0x79   :  { %v43_v24 = vsel %vm42_vm1, %v37_v20, %v39_v19 }
  0x7c   :  { %v41_v21 = vpop.permute.xlu0 %40  ;;  %v225_v25 = vpop.permute.xlu1 %224 }
  0x7d   :  { %1036 = vmatpush3.bf16.msra.mxu1 %v41_v21  ;;  %v44_v22 = vsel %vm42_vm1, %v39_v19, %v41_v21 }
  0x7e   :  { %52 = vmatprep.subr.bf16.mxu0 %v44_v22  ;;  %1041 = vmatprep.subr.bf16.mxu1 %v1164_v3 }
  0x7f   :  { %53 = vmatpush1.bf16.msra.mxu0 %v43_v24 }
  0x80   :  { %1038 = vmatmul.mubr.msk.bf16.vlgmr.msra.gmra.mrb[0].mxu1 %vm48_vm2, %v980_v23  ;;  %139 = vmatprep.subr.bf16.mxu0 %v982_v10  ;;  %v227_v26 = vpop.permute.xlu0 %226  ;;  %v223_v28 = vpop.permute.xlu1 %222 }
  0x81   :  { %1042 = vmatpush3.bf16.msra.mxu1 %v983_v12  ;;  %1043 = vmatprep.mubr.msk.bf16.mxu1 %vm1165_vm0, %v1164_v3  ;;  %v230_v27 = vsel %vm228_vm3, %v225_v25, %v227_v26  ;;  %v229_v31 = vsel %vm228_vm3, %v223_v28, %v225_v25 }
  0x82   :  { %984 = vmatmul.mubr.msk.bf16.vlgmr.msra.gmra.mrb[0].mxu0 %vm48_vm2, %v980_v23  ;;  %1047 = vmatprep.subr.bf16.mxu1 %v1164_v3 }
  0x83   :  { %140 = vmatpush1.bf16.msra.mxu0 %v1210_v11  ;;  %171 = vmatprep.mubr.bf16.mxu0 %v1166_v4  ;;  %v1010_v11 = vld [vmem:[%s1330_s1 + $0x20] sm:$0xf] }
  0x84   :  { %237 = vmatprep.subr.bf16.mxu0 %v230_v27  ;;  %v328_v30 = vpop.permute.xlu1 %327  ;;  %v326_v32 = vpop.permute.xlu0 %325 }
  0x85   :  { %v331_v33 = vsel %vm329_vm4, %v326_v32, %v328_v30 }
  0x88   :  { %v324_v34 = vpop.permute.xlu0 %323  ;;  %v427_v38 = vpop.permute.xlu1 %426 }
  0x89   :  { %v330_v37 = vsel %vm329_vm4, %v324_v34, %v326_v32 }
  0x8c   :  { %1044 = vmatmul.mubr.msk.bf16.vlgmr.msra.gmra.mrb[0].mxu1 %vm48_vm2, %v20_v29  ;;  %v429_v36 = vpop.permute.xlu0 %428  ;;  %v425_v40 = vpop.permute.xlu1 %424 }
  0x8d   :  { %1048 = vmatpush3.bf16.msra.mxu1 %v227_v26  ;;  %1049 = vmatprep.mubr.msk.bf16.mxu1 %vm1165_vm0, %v1164_v3  ;;  %v432_v39 = vsel %vm430_vm5, %v427_v38, %v429_v36  ;;  %v431_v43 = vsel %vm430_vm5, %v425_v40, %v427_v38 }
  0x8e   :  { %986 = vmatmul.mubr.msk.bf16.vlgmr.msra.gmra.mrb[0].mxu0 %vm48_vm2, %v20_v29  ;;  %1053 = vmatprep.subr.bf16.mxu1 %v1164_v3 }
  0x8f   :  { %238 = vmatpush1.bf16.msra.mxu0 %v229_v31  ;;  %269 = vmatprep.mubr.bf16.mxu0 %v1166_v4 }
  0x90   :  { %338 = vmatprep.subr.bf16.mxu0 %v331_v33  ;;  %v530_v42 = vpop.permute.xlu1 %529  ;;  %v528_v44 = vpop.permute.xlu0 %527 }
  0x91   :  { %v533_v45 = vsel %vm531_vm6, %v528_v44, %v530_v42 }
  0x94   :  { %v526_v46 = vpop.permute.xlu0 %525  ;;  %v653_v49 = vpop.permute.xlu1 %652 }
  0x95   :  { %v532_v48 = vsel %vm531_vm6, %v526_v46, %v528_v44 }
  0x98   :  { %1050 = vmatmul.mubr.msk.bf16.vlgmr.msra.gmra.mrb[0].mxu1 %vm48_vm2, %v988_v35  ;;  %v655_v50 = vpop.permute.xlu0 %654  ;;  %v651_v53 = vpop.permute.xlu1 %650 }
  0x99   :  { %1054 = vmatpush3.bf16.msra.mxu1 %v328_v30  ;;  %1055 = vmatprep.mubr.msk.bf16.mxu1 %vm1165_vm0, %v1164_v3  ;;  %v660_v51 = vsel %vm658_vm7, %v653_v49, %v655_v50  ;;  %v659_v56 = vsel %vm658_vm7, %v651_v53, %v653_v49 }
  0x9a   :  { %989 = vmatmul.mubr.msk.bf16.vlgmr.msra.gmra.mrb[0].mxu0 %vm48_vm2, %v988_v35  ;;  %1059 = vmatprep.subr.bf16.mxu1 %v1164_v3 }
  0x9b   :  { %339 = vmatpush1.bf16.msra.mxu0 %v330_v37  ;;  %370 = vmatprep.mubr.bf16.mxu0 %v1166_v4 }
  0x9c   :  { %439 = vmatprep.subr.bf16.mxu0 %v432_v39  ;;  %v657_v52 = vpop.permute.xlu0 %656  ;;  %v757_v57 = vpop.permute.xlu1 %756 }
  0x9d   :  { %v661_v55 = vsel %vm658_vm7, %v655_v50, %v657_v52 }
  0xa0   :  { %v759_v58 = vpop.permute.xlu0 %758  ;;  %v755_v61 = vpop.permute.xlu1 %754 }
  0xa1   :  { %v764_v59 = vsel %vm762_vm8, %v757_v57, %v759_v58  ;;  %v763_v0 = vsel %vm762_vm8, %v755_v61, %v757_v57 }
  0xa4   :  { %1056 = vmatmul.mubr.msk.bf16.vlgmr.msra.gmra.mrb[0].mxu1 %vm48_vm2, %v991_v41  ;;  %v761_v60 = vpop.permute.xlu0 %760  ;;  %v861_v1 = vpop.permute.xlu1 %860 }
  0xa5   :  { %1060 = vmatpush3.bf16.msra.mxu1 %v429_v36  ;;  %1061 = vmatprep.mubr.msk.bf16.mxu1 %vm1165_vm0, %v1164_v3  ;;  %v765_v63 = vsel %vm762_vm8, %v759_v58, %v761_v60 }
  0xa6   :  { %992 = vmatmul.mubr.msk.bf16.vlgmr.msra.gmra.mrb[0].mxu0 %vm48_vm2, %v991_v41  ;;  %1065 = vmatprep.subr.bf16.mxu1 %v1164_v3 }
  0xa7   :  { %440 = vmatpush1.bf16.msra.mxu0 %v431_v43  ;;  %471 = vmatprep.mubr.bf16.mxu0 %v1166_v4 }
  0xa8   :  { %540 = vmatprep.subr.bf16.mxu0 %v533_v45  ;;  %v863_v2 = vpop.permute.xlu0 %862  ;;  %v859_v7 = vpop.permute.xlu1 %858 }
  0xa9   :  { %v868_v5 = vsel %vm866_vm9, %v861_v1, %v863_v2  ;;  %v867_v10 = vsel %vm866_vm9, %v859_v7, %v861_v1 }
  0xac   :  { %v865_v6 = vpop.permute.xlu0 %864 }
  0xad   :  { %v869_v9 = vsel %vm866_vm9, %v863_v2, %v865_v6 }
  0xb0   :  { %1062 = vmatmul.mubr.msk.bf16.vlgmr.msra.gmra.mrb[0].mxu1 %vm48_vm2, %v994_v47 }
  0xb1   :  { %1066 = vmatpush3.bf16.msra.mxu1 %v530_v42  ;;  %1067 = vmatprep.mubr.msk.bf16.mxu1 %vm1165_vm0, %v1164_v3 }
  0xb2   :  { %995 = vmatmul.mubr.msk.bf16.vlgmr.msra.gmra.mrb[0].mxu0 %vm48_vm2, %v994_v47  ;;  %1071 = vmatprep.subr.bf16.mxu1 %v1164_v3 }
  0xb3   :  { %541 = vmatpush1.bf16.msra.mxu0 %v532_v48  ;;  %572 = vmatprep.mubr.bf16.mxu0 %v1166_v4 }
  0xb4   :  { %668 = vmatprep.subr.bf16.mxu0 %v660_v51 }
  0xbc   :  { %1068 = vmatmul.mubr.msk.bf16.vlgmr.msra.gmra.mrb[0].mxu1 %vm48_vm2, %v997_v54 }
  0xbd   :  { %1072 = vmatpush3.bf16.msra.mxu1 %v661_v55  ;;  %1073 = vmatprep.mubr.msk.bf16.mxu1 %vm1165_vm0, %v1164_v3 }
  0xbe   :  { %998 = vmatmul.mubr.msk.bf16.vlgmr.msra.gmra.mrb[0].mxu0 %vm48_vm2, %v997_v54  ;;  %1077 = vmatprep.subr.bf16.mxu1 %v1164_v3 }
  0xbf   :  { %669 = vmatpush1.bf16.msra.mxu0 %v659_v56  ;;  %700 = vmatprep.mubr.bf16.mxu0 %v1166_v4 }
  0xc0   :  { %772 = vmatprep.subr.bf16.mxu0 %v764_v59 }
  0xc8   :  { %1074 = vmatmul.mubr.msk.bf16.vlgmr.msra.gmra.mrb[0].mxu1 %vm48_vm2, %v1000_v62 }
  0xc9   :  { %1078 = vmatpush3.bf16.msra.mxu1 %v765_v63  ;;  %1079 = vmatprep.mubr.msk.bf16.mxu1 %vm1165_vm0, %v1164_v3 }
  0xca   :  { %1005 = vmatmul.mubr.msk.bf16.vlgmr.msra.gmra.mrb[0].mxu0 %vm48_vm2, %v1000_v62  ;;  %1083 = vmatprep.subr.bf16.mxu1 %v1164_v3 }
  0xcb   :  { %773 = vmatpush1.bf16.msra.mxu0 %v763_v0  ;;  %804 = vmatprep.mubr.bf16.mxu0 %v1166_v4 }
  0xcc   :  { %876 = vmatprep.subr.bf16.mxu0 %v868_v5 }
  0xd4   :  { %1080 = vmatmul.mubr.msk.bf16.vlgmr.msra.gmra.mrb[0].mxu1 %vm48_vm2, %v1007_v8 }
  0xd5   :  { %1084 = vmatpush3.bf16.msra.mxu1 %v869_v9  ;;  %1085 = vmatprep.mubr.msk.bf16.mxu1 %vm1165_vm0, %v1164_v3 }
  0xd6   :  { %1008 = vmatmul.mubr.msk.bf16.vlgmr.msra.gmra.mrb[0].mxu0 %vm48_vm2, %v1007_v8 }
  0xd7   :  { %877 = vmatpush1.bf16.msra.mxu0 %v867_v10  ;;  %908 = vmatprep.mubr.bf16.mxu0 %v1166_v4 }
  0xe0   :  { %1086 = vmatmul.mubr.msk.bf16.vlgmr.msra.gmra.mrb[0].mxu1 %vm48_vm2, %v1010_v11 }
  0xe2   :  { %1011 = vmatmul.mubr.msk.bf16.vlgmr.msra.gmra.mrb[0].mxu0 %vm48_vm2, %v1010_v11 }
 0x1b3   :  { %v951_v12 = vpop.f32.mrb[0].mxu1 }
 0x1b4   :  { %v1016_v13 = vpack.c.bf16 %v951_v12, %v951_v12  ;;  %v1087_v14 = vpop.f32.mrb[1].mxu1 }
 0x1b5   :  { %v910_v15 = vpop.f32.mrb[0].mxu0  ;;  %v954_v16 = vpop.f32.mrb[2].mxu1 }
 0x1b6   :  { %v912_v3 = vpop.f32.mrb[1].mxu0  ;;  %975 = vst.msk [vmem:[%s1331_s2 + $0x8] sm:$0xf] %vm974_vm10, %v1016_v13  ;;  %v1088_v4 = vpop.f32.mrb[3].mxu1 }
 0x1b7   :  { %v1015_v17 = vpack.c.bf16 %v912_v3, %v910_v15  ;;  %v914_v18 = vpop.f32.mrb[2].mxu0 }
 0x1b8   :  { %v915_v19 = vpop.f32.mrb[3].mxu0 }
 0x1b9   :  { %973 = vst [vmem:[%s1331_s2] sm:$0xff] %v1015_v17 }

// kernel: _lambda_.37
= control target key start
LH: loop header
LB: loop body
LE: loop exit
PB: predicated region body
PF: predicated region fallthrough
CT: control target
= control target key end

     0   :  { %v1167_v2 = vmov 0.0   ;;  %vm1168_vm0 = vmmov 0   ;;  %v1169_v3 = vmov 0   ;;  %s1170_s19 = smov 127   ;;  %s1171_s20 = smov 126   ;;  %vm46_vm1 = vcmask 1043456   ;;  %s1357_s0 = inlined_call_operand.vmem [shape: bf16[8,398], index: 0, kind: input, shape index: {}]   ;;  %s1358_s1 = inlined_call_operand.vmem [shape: bf16[9,8,8], index: 1, kind: input, shape index: {}]   ;;  %s1359_s2 = inlined_call_operand.vmem [shape: bf16[8,360], index: 2, kind: input, shape index: {}]   ;;  %s1360_s3 = inlined_call_operand.vmem [shape: bf16[8,360], index: 3, kind: input, shape index: {}]   ;;  %s1361_s4 = inlined_call_operand.vmem [shape: bf16[8,360], index: 4, kind: output, shape index: {}]  }
   0x1   :  { %v19_v0 = vld [vmem:[%s1357_s0 + $0x8] sm:$0xf]  ;;  %v18_v1 = vld [vmem:[%s1357_s0] sm:$0xff]  ;;  %1102 = vmatprep.subr.bf16.mxu1 %v1167_v2  ;;  %1104 = vmatprep.mubr.msk.bf16.mxu1 %vm1168_vm0, %v1167_v2  ;;  %s1172_s21 = smov 110   ;;  %s1173_s22 = smov 109   ;;  %vm42_vm2 = vcmask 64512  }
   0x2   :  { %v21_v4 = vmax.bf16 %v1169_v3, %v19_v0  ;;  %v20_v5 = vmax.bf16 %v1169_v3, %v18_v1  ;;  %88 = vmatprep.mubr.bf16.mxu0 %v1169_v3  ;;  %v659_v9 = vld [vmem:[%s1357_s0 + $0x8] sm:$0xff]  ;;  %s1174_s25 = smov 108   ;;  %s1175_s26 = smov 92   ;;  %v1038_v16 = vld [vmem:[%s1358_s1 + $0x4] sm:$0xf]  ;;  %vm39_vm3 = vcmask 1039360  }
   0x3   :  { %v661_v10 = vmax.bf16 %v1169_v3, %v659_v9  ;;  %s1176_s27 = smov 91   ;;  %s1177_s0 = smov 90   ;;  %vm238_vm4 = vcmask 1031168   ;;  %v22_v27 = vld [vmem:[%s1358_s1] sm:$0xf]  ;;  %vm345_vm5 = vcmask 900096  }
   0x4   :  { %v1041_v6 = vcombine.low %v21_v4, %v21_v4  ;;  %v1215_v7 = vcombine.low %v20_v5, %v20_v5  ;;  %v1040_v8 = vcombine.high %v20_v5, %v20_v5  ;;  %v1048_v36 = vld [vmem:[%s1358_s1 + $0x8] sm:$0xf]  ;;  %vm452_vm6 = vcmask 891904   ;;  %v1052_v45 = vld [vmem:[%s1358_s1 + $0xc] sm:$0xf] }
   0x5   :  { %v1067_v11 = vcombine.low %v661_v10, %v661_v10  ;;  %v1068_v12 = vcombine.high %v661_v10, %v661_v10  ;;  %vm559_vm7 = vcmask 883712   ;;  %v1056_v54 = vld [vmem:[%s1358_s1 + $0x10] sm:$0xf]  ;;  %vm682_vm8 = vcmask 752640   ;;  %v1060_v0 = vld [vmem:[%s1358_s1 + $0x14] sm:$0xf] }
   0x6   :  { %37 = vrot.lane.b32.xlu1 %v1041_v6, %s1170_s19  ;;  %33 = vrot.lane.b32.xlu0 %v1215_v7, %s1170_s19  ;;  %v147_v17 = vsel %vm46_vm1, %v1041_v6, 0  ;;  %v141_v23 = vsel %vm46_vm1, %v1215_v7, 0  ;;  %vm792_vm9 = vcmask 744448   ;;  %vm902_vm10 = vcmask 736256  }
   0x7   :  { %vm1032_vm11 = vcmask 846848  }
   0xa   :  { %35 = vrot.lane.b32.xlu0 %v1040_v8, %s1170_s19  ;;  %232 = vrot.lane.b32.xlu1 %v1215_v7, %s1171_s20 }
   0xe   :  { %234 = vrot.lane.b32.xlu0 %v1040_v8, %s1171_s20  ;;  %236 = vrot.lane.b32.xlu1 %v1041_v6, %s1171_s20 }
  0x12   :  { %339 = vrot.lane.b32.xlu0 %v1215_v7, %s1172_s21  ;;  %341 = vrot.lane.b32.xlu1 %v1040_v8, %s1172_s21 }
  0x16   :  { %343 = vrot.lane.b32.xlu0 %v1041_v6, %s1172_s21  ;;  %446 = vrot.lane.b32.xlu1 %v1215_v7, %s1173_s22 }
  0x1a   :  { %448 = vrot.lane.b32.xlu0 %v1040_v8, %s1173_s22  ;;  %450 = vrot.lane.b32.xlu1 %v1041_v6, %s1173_s22 }
  0x1e   :  { %553 = vrot.lane.b32.xlu0 %v1215_v7, %s1174_s25  ;;  %555 = vrot.lane.b32.xlu1 %v1040_v8, %s1174_s25 }
  0x22   :  { %557 = vrot.lane.b32.xlu0 %v1041_v6, %s1174_s25  ;;  %674 = vrot.lane.b32.xlu1 %v1215_v7, %s1175_s26 }
  0x26   :  { %676 = vrot.lane.b32.xlu0 %v1040_v8, %s1175_s26  ;;  %678 = vrot.lane.b32.xlu1 %v1067_v11, %s1175_s26 }
  0x2a   :  { %680 = vrot.lane.b32.xlu0 %v1068_v12, %s1175_s26  ;;  %784 = vrot.lane.b32.xlu1 %v1215_v7, %s1176_s27 }
  0x2e   :  { %786 = vrot.lane.b32.xlu0 %v1040_v8, %s1176_s27  ;;  %788 = vrot.lane.b32.xlu1 %v1067_v11, %s1176_s27 }
  0x32   :  { %790 = vrot.lane.b32.xlu0 %v1068_v12, %s1176_s27  ;;  %894 = vrot.lane.b32.xlu1 %v1215_v7, %s1177_s0 }
  0x36   :  { %896 = vrot.lane.b32.xlu0 %v1040_v8, %s1177_s0  ;;  %898 = vrot.lane.b32.xlu1 %v1067_v11, %s1177_s0  ;;  %v1064_v11 = vld [vmem:[%s1358_s1 + $0x18] sm:$0xf] }
  0x3a   :  { %900 = vrot.lane.b32.xlu0 %v1068_v12, %s1177_s0 }
  0x78   :  { %v38_v13 = vpop.permute.xlu1 %37  ;;  %v34_v14 = vpop.permute.xlu0 %33 }
  0x79   :  { %v54_v15 = vsel %vm46_vm1, %v38_v13, 0 }
  0x7a   :  { %1103 = vmatpush3.bf16.msra.mxu1 %v54_v15 }
  0x7b   :  { %1108 = vmatprep.subr.bf16.mxu1 %v1167_v2 }
  0x7c   :  { %v36_v18 = vpop.permute.xlu0 %35  ;;  %v233_v19 = vpop.permute.xlu1 %232 }
  0x7d   :  { %1105 = vmatmul.mubr.msk.bf16.vlgmr.msra.gmra.mrb[0].mxu1 %vm42_vm2, %v1038_v16  ;;  %v41_v20 = vsel %vm39_vm3, %v36_v18, %v38_v13  ;;  %v40_v21 = vsel %vm39_vm3, %v34_v14, %v36_v18 }
  0x7e   :  { %1042 = vmatprep.subr.msk.bf16.mxu0 %vm46_vm1, %v41_v20  ;;  %v48_v22 = vsel %vm46_vm1, %v40_v21, 0  ;;  %1109 = vmatpush3.bf16.msra.mxu1 %v147_v17 }
  0x7f   :  { %57 = vmatpush1.bf16.msra.mxu0 %v48_v22  ;;  %1110 = vmatprep.mubr.msk.bf16.mxu1 %vm1168_vm0, %v1167_v2 }
  0x80   :  { %1045 = vmatprep.subr.msk.bf16.mxu0 %vm46_vm1, %v1040_v8  ;;  %v235_v24 = vpop.permute.xlu0 %234  ;;  %v237_v25 = vpop.permute.xlu1 %236  ;;  %1114 = vmatprep.subr.bf16.mxu1 %v1167_v2 }
  0x81   :  { %v240_v26 = vsel %vm238_vm4, %v235_v24, %v237_v25  ;;  %v251_v28 = vsel %vm46_vm1, %v237_v25, 0  ;;  %v239_v31 = vsel %vm238_vm4, %v233_v19, %v235_v24  ;;  %v1072_v19 = vld [vmem:[%s1358_s1 + $0x1c] sm:$0xf] }
  0x82   :  { %1043 = vmatmul.mubr.msk.bf16.vlgmr.msra.gmra.mrb[0].mxu0 %vm42_vm2, %v1038_v16  ;;  %v245_v32 = vsel %vm46_vm1, %v239_v31, 0 }
  0x83   :  { %150 = vmatpush1.bf16.msra.mxu0 %v141_v23  ;;  %181 = vmatprep.mubr.bf16.mxu0 %v1169_v3  ;;  %v1076_v23 = vld [vmem:[%s1358_s1 + $0x20] sm:$0xf] }
  0x84   :  { %1049 = vmatprep.subr.msk.bf16.mxu0 %vm46_vm1, %v240_v26  ;;  %v340_v29 = vpop.permute.xlu0 %339  ;;  %v342_v30 = vpop.permute.xlu1 %341 }
  0x85   :  { %1111 = vmatmul.mubr.msk.bf16.vlgmr.msra.gmra.mrb[4].mxu1 %vm42_vm2, %v22_v27  ;;  %v346_v40 = vsel %vm345_vm5, %v340_v29, %v342_v30 }
  0x86   :  { %1115 = vmatpush3.bf16.msra.mxu1 %v251_v28  ;;  %1116 = vmatprep.mubr.msk.bf16.mxu1 %vm1168_vm0, %v1167_v2  ;;  %v352_v41 = vsel %vm46_vm1, %v346_v40, 0 }
  0x87   :  { %1120 = vmatprep.subr.bf16.mxu1 %v1167_v2 }
  0x88   :  { %v344_v33 = vpop.permute.xlu0 %343  ;;  %v447_v34 = vpop.permute.xlu1 %446 }
  0x89   :  { %v347_v35 = vsel %vm345_vm5, %v342_v30, %v344_v33  ;;  %v358_v37 = vsel %vm46_vm1, %v344_v33, 0 }
  0x8a   :  { %1046 = vmatmul.mubr.msk.bf16.vlgmr.msra.gmra.mrb[4].mxu0 %vm42_vm2, %v22_v27 }
  0x8b   :  { %254 = vmatpush1.bf16.msra.mxu0 %v245_v32  ;;  %285 = vmatprep.mubr.bf16.mxu0 %v1169_v3 }
  0x8c   :  { %1053 = vmatprep.subr.msk.bf16.mxu0 %vm46_vm1, %v347_v35  ;;  %v449_v38 = vpop.permute.xlu0 %448  ;;  %v451_v39 = vpop.permute.xlu1 %450 }
  0x8d   :  { %1117 = vmatmul.mubr.msk.bf16.vlgmr.msra.gmra.mrb[8].mxu1 %vm42_vm2, %v1048_v36  ;;  %v454_v44 = vsel %vm452_vm6, %v449_v38, %v451_v39  ;;  %v465_v46 = vsel %vm46_vm1, %v451_v39, 0  ;;  %v453_v49 = vsel %vm452_vm6, %v447_v34, %v449_v38 }
  0x8e   :  { %1121 = vmatpush3.bf16.msra.mxu1 %v358_v37  ;;  %1122 = vmatprep.mubr.msk.bf16.mxu1 %vm1168_vm0, %v1167_v2  ;;  %v459_v50 = vsel %vm46_vm1, %v453_v49, 0 }
  0x8f   :  { %1126 = vmatprep.subr.bf16.mxu1 %v1167_v2 }
  0x90   :  { %v554_v42 = vpop.permute.xlu0 %553  ;;  %v556_v43 = vpop.permute.xlu1 %555 }
  0x91   :  { %v560_v58 = vsel %vm559_vm7, %v554_v42, %v556_v43 }
  0x92   :  { %1050 = vmatmul.mubr.msk.bf16.vlgmr.msra.gmra.mrb[8].mxu0 %vm42_vm2, %v1048_v36  ;;  %v566_v59 = vsel %vm46_vm1, %v560_v58, 0 }
  0x93   :  { %361 = vmatpush1.bf16.msra.mxu0 %v352_v41  ;;  %392 = vmatprep.mubr.bf16.mxu0 %v1169_v3 }
  0x94   :  { %1057 = vmatprep.subr.msk.bf16.mxu0 %vm46_vm1, %v454_v44  ;;  %v558_v47 = vpop.permute.xlu0 %557  ;;  %v675_v48 = vpop.permute.xlu1 %674 }
  0x95   :  { %1123 = vmatmul.mubr.msk.bf16.vlgmr.msra.gmra.mrb[12].mxu1 %vm42_vm2, %v1052_v45  ;;  %v561_v53 = vsel %vm559_vm7, %v556_v43, %v558_v47  ;;  %v572_v55 = vsel %vm46_vm1, %v558_v47, 0 }
  0x96   :  { %1127 = vmatpush3.bf16.msra.mxu1 %v465_v46  ;;  %1128 = vmatprep.mubr.msk.bf16.mxu1 %vm1168_vm0, %v1167_v2 }
  0x97   :  { %1132 = vmatprep.subr.bf16.mxu1 %v1167_v2 }
  0x98   :  { %v677_v51 = vpop.permute.xlu0 %676  ;;  %v679_v52 = vpop.permute.xlu1 %678 }
  0x99   :  { %v684_v62 = vsel %vm682_vm8, %v677_v51, %v679_v52  ;;  %v683_v5 = vsel %vm682_vm8, %v675_v48, %v677_v51 }
  0x9a   :  { %1054 = vmatmul.mubr.msk.bf16.vlgmr.msra.gmra.mrb[12].mxu0 %vm42_vm2, %v1052_v45  ;;  %v690_v7 = vsel %vm46_vm1, %v683_v5, 0 }
  0x9b   :  { %468 = vmatpush1.bf16.msra.mxu0 %v459_v50  ;;  %499 = vmatprep.mubr.bf16.mxu0 %v1169_v3 }
  0x9c   :  { %1061 = vmatprep.subr.msk.bf16.mxu0 %vm46_vm1, %v561_v53  ;;  %v681_v56 = vpop.permute.xlu0 %680  ;;  %v785_v57 = vpop.permute.xlu1 %784 }
  0x9d   :  { %1129 = vmatmul.mubr.msk.bf16.vlgmr.msra.gmra.mrb[16].mxu1 %vm42_vm2, %v1056_v54  ;;  %v685_v60 = vsel %vm682_vm8, %v679_v52, %v681_v56 }
  0x9e   :  { %1133 = vmatpush3.bf16.msra.mxu1 %v572_v55  ;;  %1134 = vmatprep.mubr.msk.bf16.mxu1 %vm1168_vm0, %v1167_v2  ;;  %v696_v1 = vsel %vm46_vm1, %v685_v60, 0 }
  0x9f   :  { %1138 = vmatprep.subr.bf16.mxu1 %v1167_v2 }
  0xa0   :  { %v787_v61 = vpop.permute.xlu0 %786  ;;  %v789_v63 = vpop.permute.xlu1 %788 }
  0xa1   :  { %v794_v10 = vsel %vm792_vm9, %v787_v61, %v789_v63  ;;  %v793_v13 = vsel %vm792_vm9, %v785_v57, %v787_v61 }
  0xa2   :  { %1058 = vmatmul.mubr.msk.bf16.vlgmr.msra.gmra.mrb[16].mxu0 %vm42_vm2, %v1056_v54  ;;  %v800_v16 = vsel %vm46_vm1, %v793_v13, 0 }
  0xa3   :  { %575 = vmatpush1.bf16.msra.mxu0 %v566_v59  ;;  %606 = vmatprep.mubr.bf16.mxu0 %v1169_v3 }
  0xa4   :  { %1069 = vmatprep.subr.msk.bf16.mxu0 %vm46_vm1, %v684_v62  ;;  %v791_v4 = vpop.permute.xlu0 %790  ;;  %v895_v6 = vpop.permute.xlu1 %894 }
  0xa5   :  { %1135 = vmatmul.mubr.msk.bf16.vlgmr.msra.gmra.mrb[20].mxu1 %vm42_vm2, %v1060_v0  ;;  %v795_v8 = vsel %vm792_vm9, %v789_v63, %v791_v4 }
  0xa6   :  { %1139 = vmatpush3.bf16.msra.mxu1 %v696_v1  ;;  %1140 = vmatprep.mubr.msk.bf16.mxu1 %vm1168_vm0, %v1167_v2  ;;  %v806_v12 = vsel %vm46_vm1, %v795_v8, 0 }
  0xa7   :  { %1144 = vmatprep.subr.bf16.mxu1 %v1167_v2 }
  0xa8   :  { %v897_v9 = vpop.permute.xlu0 %896  ;;  %v899_v14 = vpop.permute.xlu1 %898 }
  0xa9   :  { %v904_v18 = vsel %vm902_vm10, %v897_v9, %v899_v14  ;;  %v903_v21 = vsel %vm902_vm10, %v895_v6, %v897_v9 }
  0xaa   :  { %1062 = vmatmul.mubr.msk.bf16.vlgmr.msra.gmra.mrb[20].mxu0 %vm42_vm2, %v1060_v0  ;;  %v910_v22 = vsel %vm46_vm1, %v903_v21, 0 }
  0xab   :  { %699 = vmatpush1.bf16.msra.mxu0 %v690_v7  ;;  %730 = vmatprep.mubr.bf16.mxu0 %v1169_v3 }
  0xac   :  { %1073 = vmatprep.subr.msk.bf16.mxu0 %vm46_vm1, %v794_v10  ;;  %v901_v15 = vpop.permute.xlu0 %900 }
  0xad   :  { %1141 = vmatmul.mubr.msk.bf16.vlgmr.msra.gmra.mrb[24].mxu1 %vm42_vm2, %v1064_v11  ;;  %v905_v17 = vsel %vm902_vm10, %v899_v14, %v901_v15 }
  0xae   :  { %1145 = vmatpush3.bf16.msra.mxu1 %v806_v12  ;;  %1146 = vmatprep.mubr.msk.bf16.mxu1 %vm1168_vm0, %v1167_v2  ;;  %v916_v20 = vsel %vm46_vm1, %v905_v17, 0 }
  0xaf   :  { %1150 = vmatprep.subr.bf16.mxu1 %v1167_v2 }
  0xb2   :  { %1070 = vmatmul.mubr.msk.bf16.vlgmr.msra.gmra.mrb[24].mxu0 %vm42_vm2, %v1064_v11 }
  0xb3   :  { %809 = vmatpush1.bf16.msra.mxu0 %v800_v16  ;;  %840 = vmatprep.mubr.bf16.mxu0 %v1169_v3 }
  0xb4   :  { %1077 = vmatprep.subr.msk.bf16.mxu0 %vm46_vm1, %v904_v18 }
  0xb5   :  { %1147 = vmatmul.mubr.msk.bf16.vlgmr.msra.gmra.mrb[28].mxu1 %vm42_vm2, %v1072_v19 }
  0xb6   :  { %1151 = vmatpush3.bf16.msra.mxu1 %v916_v20  ;;  %1152 = vmatprep.mubr.msk.bf16.mxu1 %vm1168_vm0, %v1167_v2 }
  0xba   :  { %1074 = vmatmul.mubr.msk.bf16.vlgmr.msra.gmra.mrb[28].mxu0 %vm42_vm2, %v1072_v19 }
  0xbb   :  { %919 = vmatpush1.bf16.msra.mxu0 %v910_v22  ;;  %950 = vmatprep.mubr.bf16.mxu0 %v1169_v3 }
  0xbd   :  { %1153 = vmatmul.mubr.msk.bf16.vlgmr.msra.gmra.mrb[32].mxu1 %vm42_vm2, %v1076_v23 }
  0xc2   :  { %1078 = vmatmul.mubr.msk.bf16.vlgmr.msra.gmra.mrb[32].mxu0 %vm42_vm2, %v1076_v23 }
 0x150   :  { %v131_v24 = vpop.f32.mrb[0].mxu1 }
 0x151   :  { %v1106_v25 = vpop.f32.mrb[1].mxu1 }
 0x152   :  { %v134_v26 = vpop.f32.mrb[2].mxu1 }
 0x153   :  { %v1107_v27 = vpop.f32.mrb[3].mxu1 }
 0x155   :  { %v90_v2 = vpop.f32.mrb[0].mxu0 }
 0x156   :  { %v92_v28 = vpop.f32.mrb[1].mxu0 }
 0x157   :  { %v94_v29 = vpop.f32.mrb[2].mxu0 }
 0x158   :  { %v95_v30 = vpop.f32.mrb[3].mxu0  ;;  %v224_v31 = vpop.f32.mrb[4].mxu1 }
 0x159   :  { %v225_v32 = vadd.f32 %v224_v31, %v131_v24  ;;  %v1112_v33 = vpop.f32.mrb[5].mxu1 }
 0x15a   :  { %v227_v34 = vpop.f32.mrb[6].mxu1 }
 0x15b   :  { %v1113_v35 = vpop.f32.mrb[7].mxu1 }
 0x15d   :  { %v183_v36 = vpop.f32.mrb[4].mxu0 }
 0x15e   :  { %v184_v37 = vadd.f32 %v183_v36, %v90_v2  ;;  %v185_v3 = vpop.f32.mrb[5].mxu0 }
 0x15f   :  { %v186_v38 = vadd.f32 %v185_v3, %v92_v28  ;;  %v187_v39 = vpop.f32.mrb[6].mxu0  ;;  %v1003_v3 = vld [vmem:[%s1359_s2 + $0x8] sm:$0xf] }
 0x160   :  { %v188_v40 = vpop.f32.mrb[7].mxu0  ;;  %v328_v41 = vpop.f32.mrb[8].mxu1 }
 0x161   :  { %v336_v42 = vadd.f32 %v328_v41, %v225_v32  ;;  %v1118_v43 = vpop.f32.mrb[9].mxu1  ;;  %v1011_v41 = vld [vmem:[%s1360_s3 + $0x8] sm:$0xf] }
 0x162   :  { %v331_v44 = vpop.f32.mrb[10].mxu1 }
 0x163   :  { %v1119_v45 = vpop.f32.mrb[11].mxu1  ;;  %v1006_v44 = vunpack.c.l.bf16 %v1003_v3 }
 0x165   :  { %v287_v46 = vpop.f32.mrb[8].mxu0 }
 0x166   :  { %v334_v47 = vadd.f32 %v287_v46, %v184_v37  ;;  %v289_v48 = vpop.f32.mrb[9].mxu0 }
 0x167   :  { %v335_v49 = vadd.f32 %v289_v48, %v186_v38  ;;  %v291_v50 = vpop.f32.mrb[10].mxu0  ;;  %v1014_v48 = vunpack.c.l.bf16 %v1011_v41 }
 0x168   :  { %v292_v51 = vpop.f32.mrb[11].mxu0  ;;  %v435_v52 = vpop.f32.mrb[12].mxu1 }
 0x169   :  { %v443_v53 = vadd.f32 %v435_v52, %v336_v42  ;;  %v1124_v54 = vpop.f32.mrb[13].mxu1 }
 0x16a   :  { %v438_v55 = vpop.f32.mrb[14].mxu1 }
 0x16b   :  { %v1125_v56 = vpop.f32.mrb[15].mxu1 }
 0x16d   :  { %v394_v57 = vpop.f32.mrb[12].mxu0 }
 0x16e   :  { %v441_v58 = vadd.f32 %v394_v57, %v334_v47  ;;  %v396_v59 = vpop.f32.mrb[13].mxu0 }
 0x16f   :  { %v442_v60 = vadd.f32 %v396_v59, %v335_v49  ;;  %v398_v61 = vpop.f32.mrb[14].mxu0  ;;  %v1002_v49 = vld [vmem:[%s1359_s2] sm:$0xff] }
 0x170   :  { %v399_v62 = vpop.f32.mrb[15].mxu0  ;;  %v542_v63 = vpop.f32.mrb[16].mxu1  ;;  %v1004_v55 = vunpack.c.l.bf16 %v1002_v49 }
 0x171   :  { %v550_v0 = vadd.f32 %v542_v63, %v443_v53  ;;  %v1130_v1 = vpop.f32.mrb[17].mxu1  ;;  %v1010_v53 = vld [vmem:[%s1360_s3] sm:$0xff] }
 0x172   :  { %v545_v4 = vpop.f32.mrb[18].mxu1 }
 0x173   :  { %v1131_v5 = vpop.f32.mrb[19].mxu1 }
 0x175   :  { %v501_v6 = vpop.f32.mrb[16].mxu0 }
 0x176   :  { %v548_v7 = vadd.f32 %v501_v6, %v441_v58  ;;  %v503_v8 = vpop.f32.mrb[17].mxu0  ;;  %v1005_v58 = vunpack.c.h.bf16 %v1002_v49 }
 0x177   :  { %v549_v9 = vadd.f32 %v503_v8, %v442_v60  ;;  %v505_v10 = vpop.f32.mrb[18].mxu0  ;;  %v1012_v60 = vunpack.c.l.bf16 %v1010_v53 }
 0x178   :  { %v506_v11 = vpop.f32.mrb[19].mxu0  ;;  %v649_v12 = vpop.f32.mrb[20].mxu1 }
 0x179   :  { %v657_v13 = vadd.f32 %v649_v12, %v550_v0  ;;  %v1136_v14 = vpop.f32.mrb[21].mxu1  ;;  %v1013_v0 = vunpack.c.h.bf16 %v1010_v53 }
 0x17a   :  { %v652_v15 = vpop.f32.mrb[22].mxu1 }
 0x17b   :  { %v1137_v16 = vpop.f32.mrb[23].mxu1 }
 0x17d   :  { %v608_v17 = vpop.f32.mrb[20].mxu0 }
 0x17e   :  { %v655_v18 = vadd.f32 %v608_v17, %v548_v7  ;;  %v610_v19 = vpop.f32.mrb[21].mxu0 }
 0x17f   :  { %v656_v20 = vadd.f32 %v610_v19, %v549_v9  ;;  %v612_v21 = vpop.f32.mrb[22].mxu0 }
 0x180   :  { %v613_v22 = vpop.f32.mrb[23].mxu0  ;;  %v773_v23 = vpop.f32.mrb[24].mxu1 }
 0x181   :  { %v781_v24 = vadd.f32 %v773_v23, %v657_v13  ;;  %v1142_v25 = vpop.f32.mrb[25].mxu1 }
 0x182   :  { %v776_v26 = vpop.f32.mrb[26].mxu1 }
 0x183   :  { %v1143_v27 = vpop.f32.mrb[27].mxu1 }
 0x185   :  { %v732_v2 = vpop.f32.mrb[24].mxu0 }
 0x186   :  { %v779_v28 = vadd.f32 %v732_v2, %v655_v18  ;;  %v734_v29 = vpop.f32.mrb[25].mxu0 }
 0x187   :  { %v780_v30 = vadd.f32 %v734_v29, %v656_v20  ;;  %v736_v31 = vpop.f32.mrb[26].mxu0 }
 0x188   :  { %v737_v32 = vpop.f32.mrb[27].mxu0  ;;  %v883_v33 = vpop.f32.mrb[28].mxu1 }
 0x189   :  { %v891_v34 = vadd.f32 %v883_v33, %v781_v24  ;;  %v1148_v35 = vpop.f32.mrb[29].mxu1 }
 0x18a   :  { %v886_v36 = vpop.f32.mrb[30].mxu1 }
 0x18b   :  { %v1149_v37 = vpop.f32.mrb[31].mxu1 }
 0x18d   :  { %v842_v38 = vpop.f32.mrb[28].mxu0 }
 0x18e   :  { %v889_v39 = vadd.f32 %v842_v38, %v779_v28  ;;  %v844_v40 = vpop.f32.mrb[29].mxu0 }
 0x18f   :  { %v890_v42 = vadd.f32 %v844_v40, %v780_v30  ;;  %v846_v43 = vpop.f32.mrb[30].mxu0 }
 0x190   :  { %v847_v45 = vpop.f32.mrb[31].mxu0  ;;  %v993_v46 = vpop.f32.mrb[32].mxu1 }
 0x191   :  { %v1001_v47 = vadd.f32 %v993_v46, %v891_v34  ;;  %v1154_v50 = vpop.f32.mrb[33].mxu1 }
 0x192   :  { %v996_v51 = vpop.f32.mrb[34].mxu1 }
 0x193   :  { %v1009_v52 = vadd.f32 %v1006_v44, %v1001_v47  ;;  %v1155_v54 = vpop.f32.mrb[35].mxu1 }
 0x195   :  { %v1017_v56 = vmul.f32 %v1014_v48, %v1009_v52  ;;  %v952_v57 = vpop.f32.mrb[32].mxu0 }
 0x196   :  { %v999_v59 = vadd.f32 %v952_v57, %v889_v39  ;;  %v954_v61 = vpop.f32.mrb[33].mxu0 }
 0x197   :  { %v1083_v62 = vpack.c.bf16 %v1017_v56, %v1017_v56  ;;  %v1000_v63 = vadd.f32 %v954_v61, %v890_v42  ;;  %v956_v1 = vpop.f32.mrb[34].mxu0 }
 0x198   :  { %v1007_v4 = vadd.f32 %v1004_v55, %v999_v59  ;;  %v957_v5 = vpop.f32.mrb[35].mxu0 }
 0x199   :  { %1033 = vst.msk [vmem:[%s1361_s4 + $0x8] sm:$0xf] %vm1032_vm11, %v1083_v62  ;;  %v1008_v6 = vadd.f32 %v1005_v58, %v1000_v63 }
 0x19a   :  { %v1015_v7 = vmul.f32 %v1012_v60, %v1007_v4 }
 0x19b   :  { %v1016_v8 = vmul.f32 %v1013_v0, %v1008_v6 }
 0x19d   :  { %v1082_v9 = vpack.c.bf16 %v1016_v8, %v1015_v7 }
 0x19f   :  { %1031 = vst [vmem:[%s1361_s4] sm:$0xff] %v1082_v9 }

// kernel: _lambda_.39
= control target key start
LH: loop header
LB: loop body
LE: loop exit
PB: predicated region body
PF: predicated region fallthrough
CT: control target
= control target key end

     0   :  { %v126_v1 = vmov 0   ;;  %vm30_vm0 = vcmask 1043456   ;;  %vm26_vm1 = vcmask 64512   ;;  %s160_s1 = inlined_call_operand.vmem [shape: bf16[8,256], index: 1, kind: input, shape index: {}]   ;;  %s161_s0 = inlined_call_operand.vmem [shape: bf16[16,8], index: 0, kind: input, shape index: {}]   ;;  %s162_s2 = inlined_call_operand.vmem [shape: f32[16,256], index: 2, kind: output, shape index: {}]  }
   0x1   :  { %v14_v0 = vld [vmem:[%s160_s1] sm:$0xff]  ;;  %69 = vmatprep.mubr.bf16.mxu0 %v126_v1 }
   0x2   :  { %v15_v2 = vmax.bf16 %v126_v1, %v14_v0  ;;  %v125_v6 = vld [vmem:[%s161_s0] sm:$0xff]  }
   0x4   :  { %v121_v3 = vcombine.high %v15_v2, %v15_v2  ;;  %v120_v4 = vcombine.low %v15_v2, %v15_v2 }
   0x6   :  { %122 = vmatprep.subr.msk.bf16.mxu0 %vm30_vm0, %v121_v3  ;;  %v32_v5 = vsel %vm30_vm0, %v120_v4, 0 }
   0x7   :  { %38 = vmatpush1.bf16.msra.mxu0 %v32_v5 }
   0xa   :  { %123 = vmatmul.mubr.msk.bf16.vlgmr.msra.gmra.mrb[0].mxu0 %vm26_vm1, %v125_v6 }
  0xdd   :  { %v71_v7 = vpop.f32.mrb[0].mxu0 }
  0xde   :  { %111 = vst [vmem:[%s162_s2] sm:$0xff] %v71_v7  ;;  %v73_v8 = vpop.f32.mrb[1].mxu0 }
  0xdf   :  { %112 = vst [vmem:[%s162_s2 + $0x8] sm:$0xff] %v73_v8  ;;  %v75_v9 = vpop.f32.mrb[2].mxu0 }
  0xe0   :  { %113 = vst [vmem:[%s162_s2 + $0x10] sm:$0xff] %v75_v9  ;;  %v77_v10 = vpop.f32.mrb[3].mxu0 }
  0xe1   :  { %114 = vst [vmem:[%s162_s2 + $0x18] sm:$0xff] %v77_v10 }

// kernel: reverse.0
= control target key start
LH: loop header
LB: loop body
LE: loop exit
PB: predicated region body
PF: predicated region fallthrough
CT: control target
= control target key end

     0   :  { %v2_v0 = vlaneseq  ;;  %s238_s0 = inlined_call_operand.vmem [shape: f32[8,8,31], index: 0, kind: input, shape index: {}]   ;;  %s239_s1 = inlined_call_operand.vmem [shape: f32[8,8,31], index: 1, kind: output, shape index: {}]  }
   0x1   :  { %v50_v2 = vld [vmem:[%s238_s0 + $0x10] sm:$0xff]  ;;  %v46_v3 = vld [vmem:[%s238_s0] sm:$0xff]  ;;  %v52_v4 = vld [vmem:[%s238_s0 + $0x18] sm:$0xff] }
   0x2   :  { %v3_v1 = vsub.s32 30, %v2_v0  ;;  %v48_v5 = vld [vmem:[%s238_s0 + $0x8] sm:$0xff]  ;;  %v54_v7 = vld [vmem:[%s238_s0 + $0x20] sm:$0xff]  ;;  %v60_v8 = vld [vmem:[%s238_s0 + $0x38] sm:$0xff] }
   0x3   :  { %v56_v6 = vld [vmem:[%s238_s0 + $0x28] sm:$0xff]  ;;  %v58_v9 = vld [vmem:[%s238_s0 + $0x30] sm:$0xff] }
   0x4   :  { %4 = vset.pattern.permute.xlu0 %v3_v1  ;;  %179 = vset.pattern.permute.xlu1 %v3_v1 }
   0x5   :  { %78 = vperm.xlu1 %179, %v50_v2   ;;  %66 = vperm.xlu0 %4, %v46_v3  }
   0x9   :  { %84 = vperm.xlu1 %179, %v52_v4   ;;  %72 = vperm.xlu0 %4, %v48_v5  }
   0xd   :  { %96 = vperm.xlu1 %179, %v56_v6   ;;  %90 = vperm.xlu0 %4, %v54_v7  }
  0x11   :  { %108 = vperm.xlu1 %179, %v60_v8   ;;  %102 = vperm.xlu0 %4, %v58_v9  }
  0x84   :  { %v79_v10 = vpop.permute.xlu1 %78  ;;  %v67_v11 = vpop.permute.xlu0 %66 }
  0x85   :  { %157 = vst [vmem:[%s239_s1 + $0x10] sm:$0xff] %v79_v10  ;;  %153 = vst [vmem:[%s239_s1] sm:$0xff] %v67_v11 }
  0x88   :  { %v85_v12 = vpop.permute.xlu1 %84  ;;  %v73_v13 = vpop.permute.xlu0 %72 }
  0x89   :  { %159 = vst [vmem:[%s239_s1 + $0x18] sm:$0xff] %v85_v12  ;;  %155 = vst [vmem:[%s239_s1 + $0x8] sm:$0xff] %v73_v13 }
  0x8c   :  { %v97_v14 = vpop.permute.xlu1 %96  ;;  %v91_v15 = vpop.permute.xlu0 %90 }
  0x8d   :  { %163 = vst [vmem:[%s239_s1 + $0x28] sm:$0xff] %v97_v14  ;;  %161 = vst [vmem:[%s239_s1 + $0x20] sm:$0xff] %v91_v15 }
  0x90   :  { %v109_v16 = vpop.permute.xlu1 %108  ;;  %v103_v17 = vpop.permute.xlu0 %102 }
  0x91   :  { %167 = vst [vmem:[%s239_s1 + $0x38] sm:$0xff] %v109_v16  ;;  %165 = vst [vmem:[%s239_s1 + $0x30] sm:$0xff] %v103_v17 }

</bundles_post_ra>
